<compile_context>
chip_gen: v5e
topology: v5e:2x2
jax: 0.10.0
libtpu: 0.0.40
codegen_flags: <defaults>
</compile_context>

<pallas_src>
import functools
import math

import jax
import jax.numpy as jnp
from jax import lax
from jax.experimental import pallas as pl
from jax.experimental.pallas import tpu as pltpu

SQRT2 = 1.414213562  # keep the PyTorch module's constant


# ----------------------------------------------------------------------------- helpers
def _round_up(v, m):
    return (v + m - 1) // m * m


def _cdiv(a, b):
    return -(-a // b)


def _largest_aligned_divisor(dim, cap, quantum=128):
    """Largest multiple of `quantum` that divides `dim` and is <= cap (dim % quantum == 0)."""
    best = quantum
    t = quantum
    while t <= min(dim, cap):
        if dim % t == 0:
            best = t
        t += quantum
    return best


def _device_vmem_and_cores():
    """(vmem_limit_bytes, tensorcores_per_device) heuristic by TPU generation."""
    try:
        kind = jax.devices()[0].device_kind.lower()
    except Exception:
        kind = ""
    if "v7" in kind:                       # 64 MiB VMEM per TC, 2 TCs/chip
        return 48 * 1024 * 1024, 2
    if "v5p" in kind or "v4" in kind:      # 128 MiB, megacore (2 TCs)
        return 100 * 1024 * 1024, 2
    if "v6" in kind or "v5" in kind:       # v6e / v5e: 128 MiB, 1 TC
        return 100 * 1024 * 1024, 1
    return 48 * 1024 * 1024, 1             # unknown: conservative


def _pad2d(a, rows, cols, dtype):
    if a.shape == (rows, cols) and a.dtype == jnp.dtype(dtype):
        return a
    return jnp.zeros((rows, cols), dtype).at[: a.shape[0], : a.shape[1]].set(a.astype(dtype))


# ----------------------------------------------------------------------------- kernels
def _twolayer_kernel_resident(x_ref, w1_ref, w2_ref, o_ref, *, mxu_dtype):
    # Weights already include the 1/sqrt(dim)/SQRT2 scales.
    x = x_ref[...].astype(mxu_dtype)
    h = lax.erf(jnp.dot(x, w1_ref[...], preferred_element_type=jnp.float32))
    z2 = jnp.dot(h.astype(mxu_dtype), w2_ref[...], preferred_element_type=jnp.float32)
    o_ref[...] = lax.erf(z2).astype(o_ref.dtype)


def _twolayer_kernel_ktiled(x_ref, w1_ref, w2_ref, o_ref, acc_ref, *, mxu_dtype):
    # Hidden dim K is tiled on the second grid axis ("arbitrary"); erf is applied
    # per hidden tile (valid: it is elementwise over hidden units), layer-2
    # contributions are accumulated in f32.
    k = pl.program_id(1)

    @pl.when(k == 0)
    def _():
        acc_ref[...] = jnp.zeros_like(acc_ref)

    x = x_ref[...].astype(mxu_dtype)
    h = lax.erf(jnp.dot(x, w1_ref[...], preferred_element_type=jnp.float32))
    acc_ref[...] += jnp.dot(h.astype(mxu_dtype), w2_ref[...],
                            preferred_element_type=jnp.float32)

    @pl.when(k == pl.num_programs(1) - 1)
    def _():
        o_ref[...] = lax.erf(acc_ref[...]).astype(o_ref.dtype)


# ----------------------------------------------------------------------------- weight prep (one-time, hoistable)
def prepare_twolayer_weights(w1, w2, *, normalise1=True, normalise2=True,
                             mxu_dtype=jnp.bfloat16):
    """Fold scales into the weights, transpose, lane-pad, cast. Do this once and reuse.

    w1: [K, N] (fc1.weight), w2: [C, K] (fc2.weight)
    Returns (w1p [Np,Kp], w2p [Kp,Cp], (N, K, C)).
    """
    K, N = w1.shape
    C, K2 = w2.shape
    assert K == K2
    scale1 = (1.0 / math.sqrt(N) if normalise1 else 1.0) / SQRT2
    scale2 = (1.0 / math.sqrt(K) if normalise2 else 1.0) / SQRT2
    Np, Kp, Cp = _round_up(N, 128), _round_up(K, 128), _round_up(C, 128)
    w1t = (w1.astype(jnp.float32) * scale1).T          # [N, K], scale folded in f32
    w2t = (w2.astype(jnp.float32) * scale2).T          # [K, C]
    w1p = _pad2d(w1t, Np, Kp, mxu_dtype)
    w2p = _pad2d(w2t, Kp, Cp, mxu_dtype)
    return w1p, w2p, (N, K, C)


# ----------------------------------------------------------------------------- forward
def twolayer_apply(x, w1p, w2p, dims, *, batch_tile=None, out_dtype=None,
                   force_ktiled=False):
    """Apply the MLP with pre-prepared (scaled/transposed/padded) weights."""
    N, K, C = dims
    B, Nx = x.shape
    assert Nx == N
    Np, Kp = w1p.shape
    Kp2, Cp = w2p.shape
    assert Kp == Kp2
    mxu_dtype = w1p.dtype
    out_dtype = out_dtype if out_dtype is not None else x.dtype

    vmem_limit, num_cores = _device_vmem_and_cores()

    # Only materialize a padded x when the feature dim is not lane-aligned
    # (padded W1^T rows are exact zeros, so zero-fill is exact).
    xk = x if Np == N else jnp.zeros((B, Np), x.dtype).at[:, :N].set(x)

    x_item = jnp.dtype(xk.dtype).itemsize
    o_item = jnp.dtype(out_dtype).itemsize
    w_item = jnp.dtype(mxu_dtype).itemsize

    wbytes = (Np * Kp + Kp * Cp) * w_item            # single-buffered resident weights
    use_resident = (not force_ktiled) and (wbytes <= int(0.45 * vmem_limit))

    if use_resident:
        TK = Kp
        fixed = wbytes
        per_row = 2 * Np * x_item + 2 * Cp * o_item + 4 * Kp + 4 * Cp
    else:
        # TODO(synk): very large N or C would additionally need N/C tiling; only the
        # hidden dim K is tiled in the fallback path.
        TK = _largest_aligned_divisor(Kp, cap=512)
        fixed = 2 * (Np * TK + TK * Cp) * w_item     # double-buffered weight tiles
        per_row = 2 * Np * x_item + 2 * Cp * o_item + 4 * TK + 8 * Cp

    # Batch tile: respect VMEM, feed both v7x TensorCores + >=2 pipeline steps,
    # and minimize padded-batch work for awkward B.
    free = max(vmem_limit - fixed, 2 * 1024 * 1024)
    tb_vmem = max(8, (free // per_row) // 8 * 8)
    tb_cfg = batch_tile if batch_tile is not None else (512 if vmem_limit <= 56 * 1024 * 1024 else 1024)
    tb_cap = max(8, min(tb_vmem, _round_up(tb_cfg, 8)))
    n_tiles = max(_cdiv(B, tb_cap), min(2 * num_cores, _cdiv(B, 8)), 1)
    TB = min(_round_up(_cdiv(B, n_tiles), 8), _round_up(B, 8))
    grid_b = _cdiv(B, TB)

    def _cparams(dim_sem):
        return pltpu.CompilerParams(dimension_semantics=dim_sem,
                                    vmem_limit_bytes=vmem_limit)

    out_shape = jax.ShapeDtypeStruct((B, Cp), out_dtype)

    if use_resident:
        def build(weight_mode):
            wkw = {} if weight_mode is None else {"pipeline_mode": weight_mode}
            return pl.pallas_call(
                functools.partial(_twolayer_kernel_resident, mxu_dtype=mxu_dtype),
                out_shape=out_shape,
                grid_spec=pltpu.PrefetchScalarGridSpec(
                    num_scalar_prefetch=0,
                    grid=(grid_b,),
                    in_specs=[
                        pl.BlockSpec((TB, Np), lambda i: (i, 0)),            # x tile (pipelined)
                        pl.BlockSpec((Np, Kp), lambda i: (0, 0), **wkw),     # W1^T resident
                        pl.BlockSpec((Kp, Cp), lambda i: (0, 0), **wkw),     # W2^T resident
                    ],
                    out_specs=pl.BlockSpec((TB, Cp), lambda i: (i, 0)),
                ),
                compiler_params=_cparams(("parallel",)),
            )

        try:
            # Single-buffer the resident weights (constant index_map -> one DMA).
            out = build(pl.Buffered(1))(xk, w1p, w2p)
        except Exception:
            # Fallback if this JAX build rejects pipeline_mode on pallas_call specs.
            out = build(None)(xk, w1p, w2p)
    else:
        out = pl.pallas_call(
            functools.partial(_twolayer_kernel_ktiled, mxu_dtype=mxu_dtype),
            out_shape=out_shape,
            grid_spec=pltpu.PrefetchScalarGridSpec(
                num_scalar_prefetch=0,
                grid=(grid_b, Kp // TK),
                in_specs=[
                    pl.BlockSpec((TB, Np), lambda i, k: (i, 0)),   # x tile (reused over k)
                    pl.BlockSpec((Np, TK), lambda i, k: (0, k)),   # W1^T column tile
                    pl.BlockSpec((TK, Cp), lambda i, k: (k, 0)),   # W2^T row tile
                ],
                out_specs=pl.BlockSpec((TB, Cp), lambda i, k: (i, 0)),
                scratch_shapes=[pltpu.VMEM((TB, Cp), jnp.float32)],
            ),
            compiler_params=_cparams(("parallel", "arbitrary")),
        )(xk, w1p, w2p)

    return out if Cp == C else out[:, :C]


def twolayer_forward(x, w1, w2, *, normalise1=True, normalise2=True,
                     use_bf16=True, batch_tile=None, out_dtype=None,
                     force_ktiled=False):
    """Forward pass of TwoLayer. x: [B, N], w1: [K, N], w2: [C, K] -> [B, C]."""
    # use_bf16=False keeps f32 MXU operands: correct but several times slower.
    mxu_dtype = jnp.bfloat16 if use_bf16 else jnp.float32
    w1p, w2p, dims = prepare_twolayer_weights(
        w1, w2, normalise1=normalise1, normalise2=normalise2, mxu_dtype=mxu_dtype)
    return twolayer_apply(x, w1p, w2p, dims, batch_tile=batch_tile,
                          out_dtype=out_dtype, force_ktiled=force_ktiled)


# ----------------------------------------------------------------------------- reference + init
def xavier_normal(key, shape, gain):
    """nn.init.xavier_normal_: std = gain * sqrt(2 / (fan_in + fan_out)); shape = (out, in)."""
    fan_out, fan_in = shape
    std = gain * math.sqrt(2.0 / (fan_in + fan_out))
    return std * jax.random.normal(key, shape, dtype=jnp.float32)


def reference_forward(x, w1, w2, *, normalise1=True, normalise2=True):
    n1 = math.sqrt(x.shape[1]) if normalise1 else 1.0
    h = lax.erf((x @ w1.T) / n1 / SQRT2)
    n2 = math.sqrt(w1.shape[0]) if normalise2 else 1.0
    return lax.erf((h @ w2.T) / n2 / SQRT2)


if __name__ == "__main__":
    gain = 5.0 / 3.0  # g1 = g2 = erfscaled -> getName -> 'tanh' -> Xavier gain 5/3

    # Case 1: module-natural small shapes (unaligned feature dims -> padded-x path).
    B, N, K, C = 256, 32, 16, 4
    kx, k1, k2 = jax.random.split(jax.random.PRNGKey(0), 3)
    x = jax.random.normal(kx, (B, N), dtype=jnp.float32)
    w1 = xavier_normal(k1, (K, N), gain)   # fc1.weight [K, N]
    w2 = xavier_normal(k2, (C, K), gain)   # fc2.weight [C, K]
    out = jax.block_until_ready(
        twolayer_forward(x, w1, w2, normalise1=True, normalise2=True))
    ref = reference_forward(x, w1, w2, normalise1=True, normalise2=True)
    assert out.shape == (B, C)
    assert jnp.allclose(out, ref, atol=2e-2, rtol=2e-2), "case 1 mismatch"

    # Case 2: lane-aligned feature dims + ragged batch -> no-copy x fast path,
    # partial last batch tile handled by Pallas.
    B2, N2, K2, C2 = 200, 128, 128, 128
    kx2, k12, k22 = jax.random.split(jax.random.PRNGKey(1), 3)
    x2 = jax.random.normal(kx2, (B2, N2), dtype=jnp.float32)
    w12 = xavier_normal(k12, (K2, N2), gain)
    w22 = xavier_normal(k22, (C2, K2), gain)
    out2 = jax.block_until_ready(twolayer_forward(x2, w12, w22))
    ref2 = reference_forward(x2, w12, w22)
    assert out2.shape == (B2, C2)
    assert jnp.allclose(out2, ref2, atol=2e-2, rtol=2e-2), "case 2 mismatch"

    # Case 3: force the K-tiled (large-weight) fallback kernel on the same data.
    out3 = jax.block_until_ready(twolayer_forward(x2, w12, w22, force_ktiled=True))
    assert jnp.allclose(out3, ref2, atol=2e-2, rtol=2e-2), "case 3 (k-tiled) mismatch"

    print("KERNEL_OK")
</pallas_src>

<mosaic_0001>
module attributes {stable_mosaic.version = 11 : i64} {
  func.func @_twolayer_kernel_resident(%arg0: i32, %arg1: memref<128x128xf32, #tpu.memory_space<vmem>>, %arg2: memref<128x128xbf16, #tpu.memory_space<vmem>>, %arg3: memref<128x128xbf16, #tpu.memory_space<vmem>>, %arg4: memref<128x128xf32, #tpu.memory_space<vmem>>) attributes {dimension_semantics = [#tpu.dimension_semantics<parallel>], iteration_bounds = array<i64: 2>, scalar_prefetch = 0 : i64, scratch_operands = 0 : i64, tpu.core_type = #tpu.core_type<tc>, window_params = [{transform_indices = @transform_0, window_bounds = array<i64: 128, 128>}, {pipeline_mode = #tpu.pipeline_mode<synchronous>, transform_indices = @transform_1, window_bounds = array<i64: 128, 128>}, {pipeline_mode = #tpu.pipeline_mode<synchronous>, transform_indices = @transform_2, window_bounds = array<i64: 128, 128>}, {transform_indices = @transform_3, window_bounds = array<i64: 128, 128>}]} {
    %c0 = arith.constant 0 : index
    %c0_0 = arith.constant 0 : index
    %0 = vector.load %arg1[%c0, %c0_0] : memref<128x128xf32, #tpu.memory_space<vmem>>, vector<128x128xf32>
    %1 = arith.truncf %0 : vector<128x128xf32> to vector<128x128xbf16>
    %c0_1 = arith.constant 0 : index
    %c0_2 = arith.constant 0 : index
    %2 = vector.load %arg2[%c0_1, %c0_2] : memref<128x128xbf16, #tpu.memory_space<vmem>>, vector<128x128xbf16>
    %cst = arith.constant dense<0.000000e+00> : vector<128x128xf32>
    %3 = tpu.matmul %1, %2, %cst {dimension_numbers = #tpu.dot_dimension_numbers<[1], [0], [0], [1], [0, 0, 1, 1], [], []>} : vector<128x128xbf16>, vector<128x128xbf16>, vector<128x128xf32> -> vector<128x128xf32>
    %4 = math.erf %3 : vector<128x128xf32>
    %5 = arith.truncf %4 : vector<128x128xf32> to vector<128x128xbf16>
    %c0_3 = arith.constant 0 : index
    %c0_4 = arith.constant 0 : index
    %6 = vector.load %arg3[%c0_3, %c0_4] : memref<128x128xbf16, #tpu.memory_space<vmem>>, vector<128x128xbf16>
    %cst_5 = arith.constant dense<0.000000e+00> : vector<128x128xf32>
    %7 = tpu.matmul %5, %6, %cst_5 {dimension_numbers = #tpu.dot_dimension_numbers<[1], [0], [0], [1], [0, 0, 1, 1], [], []>} : vector<128x128xbf16>, vector<128x128xbf16>, vector<128x128xf32> -> vector<128x128xf32>
    %8 = math.erf %7 : vector<128x128xf32>
    %c0_6 = arith.constant 0 : index
    %c0_7 = arith.constant 0 : index
    %9 = vector.load %arg4[%c0_6, %c0_7] : memref<128x128xf32, #tpu.memory_space<vmem>>, vector<128x128xf32>
    tpu.vector_store %arg4[%c0_6, %c0_7], %8 {strides = array<i32>} : memref<128x128xf32, #tpu.memory_space<vmem>>, vector<128x128xf32>,
    return
  }
  func.func @transform_0(%arg0: i32) -> (i32, i32) {
    %c0_i32 = arith.constant 0 : i32
    %c0_i32_0 = arith.constant 0 : i32
    return %arg0, %c0_i32 : i32, i32
  }
  func.func @transform_1(%arg0: i32) -> (i32, i32) {
    %c0_i32 = arith.constant 0 : i32
    %c0_i32_0 = arith.constant 0 : i32
    %c0_i32_1 = arith.constant 0 : i32
    return %c0_i32, %c0_i32_0 : i32, i32
  }
  func.func @transform_2(%arg0: i32) -> (i32, i32) {
    %c0_i32 = arith.constant 0 : i32
    %c0_i32_0 = arith.constant 0 : i32
    %c0_i32_1 = arith.constant 0 : i32
    return %c0_i32, %c0_i32_0 : i32, i32
  }
  func.func @transform_3(%arg0: i32) -> (i32, i32) {
    %c0_i32 = arith.constant 0 : i32
    %c0_i32_0 = arith.constant 0 : i32
    return %arg0, %c0_i32 : i32, i32
  }
}

module attributes {stable_mosaic.version = 11 : i64} {
  func.func @_twolayer_kernel_resident(%arg0: i32, %arg1: memref<128x128xf32, #tpu.memory_space<vmem>>, %arg2: memref<128x128xbf16, #tpu.memory_space<vmem>>, %arg3: memref<128x128xbf16, #tpu.memory_space<vmem>>, %arg4: memref<128x128xf32, #tpu.memory_space<vmem>>) attributes {dimension_semantics = [#tpu.dimension_semantics<parallel>], iteration_bounds = array<i64: 2>, scalar_prefetch = 0 : i64, scratch_operands = 0 : i64, tpu.core_type = #tpu.core_type<tc>, window_params = [{transform_indices = @transform_0, window_bounds = array<i64: 128, 128>}, {pipeline_mode = #tpu.pipeline_mode<synchronous>, transform_indices = @transform_1, window_bounds = array<i64: 128, 128>}, {pipeline_mode = #tpu.pipeline_mode<synchronous>, transform_indices = @transform_2, window_bounds = array<i64: 128, 128>}, {transform_indices = @transform_3, window_bounds = array<i64: 128, 128>}]} {
    %c0 = arith.constant 0 : index
    %c0_0 = arith.constant 0 : index
    %0 = vector.load %arg1[%c0, %c0_0] : memref<128x128xf32, #tpu.memory_space<vmem>>, vector<128x128xf32>
    %1 = arith.truncf %0 : vector<128x128xf32> to vector<128x128xbf16>
    %c0_1 = arith.constant 0 : index
    %c0_2 = arith.constant 0 : index
    %2 = vector.load %arg2[%c0_1, %c0_2] : memref<128x128xbf16, #tpu.memory_space<vmem>>, vector<128x128xbf16>
    %cst = arith.constant dense<0.000000e+00> : vector<128x128xf32>
    %3 = tpu.matmul %1, %2, %cst {dimension_numbers = #tpu.dot_dimension_numbers<[1], [0], [0], [1], [0, 0, 1, 1], [], []>} : vector<128x128xbf16>, vector<128x128xbf16>, vector<128x128xf32> -> vector<128x128xf32>
    %4 = math.erf %3 : vector<128x128xf32>
    %5 = arith.truncf %4 : vector<128x128xf32> to vector<128x128xbf16>
    %c0_3 = arith.constant 0 : index
    %c0_4 = arith.constant 0 : index
    %6 = vector.load %arg3[%c0_3, %c0_4] : memref<128x128xbf16, #tpu.memory_space<vmem>>, vector<128x128xbf16>
    %cst_5 = arith.constant dense<0.000000e+00> : vector<128x128xf32>
    %7 = tpu.matmul %5, %6, %cst_5 {dimension_numbers = #tpu.dot_dimension_numbers<[1], [0], [0], [1], [0, 0, 1, 1], [], []>} : vector<128x128xbf16>, vector<128x128xbf16>, vector<128x128xf32> -> vector<128x128xf32>
    %8 = math.erf %7 : vector<128x128xf32>
    %c0_6 = arith.constant 0 : index
    %c0_7 = arith.constant 0 : index
    %9 = vector.load %arg4[%c0_6, %c0_7] : memref<128x128xf32, #tpu.memory_space<vmem>>, vector<128x128xf32>
    tpu.vector_store %arg4[%c0_6, %c0_7], %8 {strides = array<i32>} : memref<128x128xf32, #tpu.memory_space<vmem>>, vector<128x128xf32>,
    return
  }
  func.func @transform_0(%arg0: i32) -> (i32, i32) {
    %c0_i32 = arith.constant 0 : i32
    %c0_i32_0 = arith.constant 0 : i32
    return %arg0, %c0_i32 : i32, i32
  }
  func.func @transform_1(%arg0: i32) -> (i32, i32) {
    %c0_i32 = arith.constant 0 : i32
    %c0_i32_0 = arith.constant 0 : i32
    %c0_i32_1 = arith.constant 0 : i32
    return %c0_i32, %c0_i32_0 : i32, i32
  }
  func.func @transform_2(%arg0: i32) -> (i32, i32) {
    %c0_i32 = arith.constant 0 : i32
    %c0_i32_0 = arith.constant 0 : i32
    %c0_i32_1 = arith.constant 0 : i32
    return %c0_i32, %c0_i32_0 : i32, i32
  }
  func.func @transform_3(%arg0: i32) -> (i32, i32) {
    %c0_i32 = arith.constant 0 : i32
    %c0_i32_0 = arith.constant 0 : i32
    return %arg0, %c0_i32 : i32, i32
  }
}

</mosaic_0001>

<bundles_post_ra>
// kernel: tpu_custom_call.1
= control target key start
LH: loop header
LB: loop body
LE: loop exit
PB: predicated region body
PF: predicated region fallthrough
CT: control target
= control target key end

     0   :  { %8 = vsyncpa [#allocation3], 0  ;;  %s3682_s0 = inlined_call_operand.hbm [shape: f32[256,128], index: 0, kind: input, shape index: {}]   ;;  %s3683_s1 = inlined_call_operand.hbm [shape: bf16[128,128], index: 1, kind: input, shape index: {}]   ;;  %s3684_s2 = inlined_call_operand.hbm [shape: bf16[128,128], index: 2, kind: input, shape index: {}]   ;;  %s3685_s3 = inlined_call_operand.hbm [shape: f32[256,128], index: 3, kind: output, shape index: {}]  }
   0x1   :  { %10 = vsyncpa [#allocation3 + $0x1], 0 }
   0x2   :  { %11 = vsyncpa [#allocation6], 0 }
   0x3   :  { %12 = vsyncpa [#allocation4], 0 }
   0x4   :  { %14 = vsyncpa [#allocation4 + $0x1], 0  ;;  %s2363_s12 = smov 0   ;;  %s2365_s13 = smov 0  }
   0x5   :  { %s2367_s14 = smov 0   ;;  %s2369_s15 = smov 0  }
   0x6 LB: > { %s2384_s16 = sadd.s32 4294967295, %s2333_s15   ;;  %s1888_s17 = sadd.s32 4294967294, %s2333_s15   ;;  %s2333_s15 = sphi %s2369_s15, %s3755_s15   ;;  %s2329_s14 = sphi %s2367_s14, %s3754_s14   ;;  %s2325_s13 = sphi %s2365_s13, %s3753_s13   ;;  %s2321_s12 = sphi %s2363_s12, %s3752_s12  }
   0x7   : > { %p40_p0 = scmp.ne.s32.totalorder %s2325_s13, %s2321_s12  ;;  %p41_p1 = scmp.eq.s32.totalorder %s2384_s16, 0 }
   0x8   : > { %p106_p2 = scmp.eq.s32.totalorder %s2384_s16, 1  ;;  %p112_p3 = scmp.eq.s32.totalorder %s1888_s17, 1 }
   0x9   : > { %p2393_p4 = por %p41_p1, %p40_p0  ;;  %p1889_p5 = scmp.ge.s32.totalorder %s2333_s15, 1 }
   0xa   : > { %p2398_p6 = por %p112_p3, %p40_p0  ;;  %p119_p7 = scmp.lt.s32.totalorder %s2333_s15, 3 }
   0xb   : > { %s130_s22 = sshll.u32 %s3683_s1, 4  ;;  %s2335_s24 = smov [#allocation5]   ;;  %s131_s22 = int_to_ptr.hbm [resolvable:$true] %s130_s22 }
   0xc   : > { %p2406_p8 = pnand %p1889_p5, %p119_p7  ;;  %s132_s25 = sshll.u32 %s2335_s24, 4  ;;  %s133_s25 = int_to_ptr.vmem [resolvable:$true] %s132_s25 }
   0xd   : > { %s144_s28 = sshll.u32 %s3684_s2, 4  ;;  %s2336_s29 = smov 64   ;;  %s145_s28 = int_to_ptr.hbm [resolvable:$true] %s144_s28 }
   0xe   : > { %p2048_p9 = pneg %p2406_p8  ;;  %s2337_s30 = smov 4  }
   0xf   : > { %s2338_s4 = smov [#allocation7]   ;;  %s2419_s6 = sadd.s32 1, %s2333_s15  }
  0x10   : > { %p2049_p10 = pnand %p2048_p9, %p41_p1  ;;  %s146_s5 = sshll.u32 %s2338_s4, 4  ;;  %s147_s5 = int_to_ptr.vmem [resolvable:$true] %s146_s5 }
  0x11   : > { %s27_s7 = sadd.s32 1, %s2329_s14  ;;  %s24_s8 = ssub.s32 %s2333_s15, %s2419_s6 }
  0x12   : > { %2051 = dma.hbm_to_vmem [thread:$0]  (!%p2049_p10), %s131_s22, 1024, %s133_s25, [#allocation6], %s2336_s29, %s2336_s29, %s2337_s30  }
  0x13   : > { %2054 = dma.hbm_to_vmem [thread:$0]  (!%p2049_p10), %s145_s28, 1024, %s147_s5, [#allocation6], %s2336_s29, %s2336_s29, %s2337_s30  }
  0x14   : > { %p34_p12 = scmp.ne.s32.totalorder %s2329_s14, %s2325_s13  ;;  %p25_p13 = scmp.eq.s32.totalorder %s24_s8, 0 }
  0x15   : > { %p35_p0 = scmp.eq.s32.totalorder %s2333_s15, 0  ;;  %p2065_p5 = scmp.lt.s32.totalorder %s2333_s15, 2 }
  0x16   : > { %p2429_p3 = por %p106_p2, %p34_p12  ;;  %s160_s11 = sand.u32 1, %s2329_s14  }
  0x17   : > { %s2435_s10 = scalar_select %p25_p13, %s2329_s14, %s27_s7  }
  0x18   : > { %p36_p7 = por %p35_p0, %p34_p12  ;;  %s1893_s17 = sshll.u32 %s160_s11, 7 }
  0x19   : > { %s2002_s20 = sshll.u32 %s2333_s15, 7  ;;  %s164_s25 = scalar_lea.vmem [#allocation2], %s1893_s17 }
  0x1a   : > { %s169_s24 = scalar_lea.hbm %s3682_s0, %s2002_s20  ;;  %s172_s26 = sshll.u32 %s164_s25, 4  ;;  %s173_s26 = int_to_ptr.vmem [resolvable:$true] %s172_s26 }
  0x1b   : > { %s170_s27 = sshll.u32 %s169_s24, 4  ;;  %p2442_p2 = pnand %p2065_p5, %p36_p7  ;;  %s171_s27 = int_to_ptr.hbm [resolvable:$true] %s170_s27 }
  0x1c   : > { %s161_s29 = scalar_lea.sflag [#allocation3], %s160_s11  ;;  %s2233_s30 = sshra.s32 %s171_s27, 4  ;;  %s2234_s30 = int_to_ptr.hbm [resolvable:$true] %s2233_s30 }
  0x1d   : > { %s2235_s4 = scalar_lea.hbm %s2234_s30, 128  ;;  %p2237_p10 = pneg %p2442_p2 }
  0x1e   : > { %p2236_p9 = scmp.ne.s32.totalorder %s2234_s30, %s2235_s4  ;;  %s2240_s8 = scalar_lea.hbm %s3682_s0, 256 }
  0x1f   : > { %p2241_p0 = scmp.lt.s32.totalorder %s2234_s30, %s3682_s0  ;;  %p2242_p5 = scmp.lt.s32.totalorder %s2240_s8, %s2235_s4 }
  0x20   : > { %p2238_p12 = pnand %p2237_p10, %p2236_p9 }
  0x21   : > { %p2243_p7 = por %p2242_p5, %p2241_p0 }
  0x22   : > { %p2239_p13 = pneg %p2238_p12 }
  0x24   : > { %p2244_p11 = pnand %p2243_p7, %p2239_p13 }
  0x26   : > { %2247 = shalt.err (!%p2244_p11)
}
  0x27   : > { %s2339_s11 = smov 128   ;;  %s2340_s21 = smov 8  }
  0x28   : > { %2058 = dma.hbm_to_vmem [thread:$0]  (!%p2442_p2), %s171_s27, 2048, %s173_s26, %s161_s29, %s2339_s11, %s2339_s11, %s2340_s21  }
  0x29   : > { %184 = sbr.rel (%p2406_p8) target bundleno = 634 (0x27a), region = 32  ;;  %s2459_s22 = sand.u32 (!%p2406_p8), 1, %s2325_s13  }
  0x2a   : > { %s1897_s24 = sshll.u32 (!%p2406_p8), %s2459_s22, 7  ;;  %s187_s25 = scalar_lea.sflag (!%p2406_p8), [#allocation3], %s2459_s22 }
  0x2b   : > { %s2465_s30 = scalar_lea.vmem (!%p2406_p8), [#allocation2], %s1897_s24 }
  0x2e   : > { %2308 = dma.done.wait (%p2393_p4), %s187_s25, 2048  }
  0x2f   : > { %2310 = vsyncadd (%p2393_p4), %s187_s25, 4294965248 }
  0x30   : > { %2312 = dma.done.wait (%p41_p1), [#allocation6], 2048  }
  0x31   : > { %2314 = vsyncadd (%p41_p1), [#allocation6], 4294965248  ;;  %v2010_v0 = vld [vmem:[#allocation5 + $0x38] sm:$0xff]  ;;  %v2009_v1 = vld [vmem:[#allocation5 + $0x30] sm:$0xff]  ;;  %s3328_s18 = scalar_lea.vmem [#allocation8], %s1897_s24  ;;  %s2019_s23 = sshll.u32 %s2384_s16, 7 }
  0x32   : > { %314 = vmatpush.bf16.msra.mxu0 %v2010_v0  ;;  %2020 = vmatpush.bf16.msra.mxu2 %v2010_v0  ;;  %v2008_v2 = vld [vmem:[#allocation5 + $0x28] sm:$0xff]  ;;  %v2007_v3 = vld [vmem:[#allocation5 + $0x20] sm:$0xff]  ;;  %v2006_v4 = vld [vmem:[#allocation5 + $0x18] sm:$0xff]  ;;  %s1792_s28 = scalar_lea.hbm %s3685_s3, %s2019_s23  ;;  %s1793_s16 = sshll.u32 %s3328_s18, 4  ;;  %s1794_s16 = int_to_ptr.vmem [resolvable:$true] %s1793_s16 }
  0x33   : > { %v2005_v5 = vld [vmem:[#allocation5 + $0x10] sm:$0xff]  ;;  %v2004_v6 = vld [vmem:[#allocation5 + $0x8] sm:$0xff]  ;;  %v2003_v7 = vld [vmem:[#allocation5] sm:$0xff]  ;;  %s1795_s29 = sshll.u32 %s1792_s28, 4  ;;  %s1781_s4 = scalar_lea.sflag [#allocation4], %s2459_s22  ;;  %s1796_s29 = int_to_ptr.hbm [resolvable:$true] %s1795_s29 }
  0x34   : > { %v226_v8 = vld [vmem:[%s2465_s30] sm:$0xff]  ;;  %v227_v9 = vld [vmem:[%s2465_s30 + $0x8] sm:$0xff]  ;;  %v228_v14 = vld [vmem:[%s2465_s30 + $0x10] sm:$0xff]  ;;  %s2277_s5 = sshra.s32 %s1796_s29, 4  ;;  %s2283_s20 = scalar_lea.hbm %s3685_s3, 256  ;;  %s2278_s5 = int_to_ptr.hbm [resolvable:$true] %s2277_s5 }
  0x35   : > { %v234_v10 = vld [vmem:[%s2465_s30 + $0x40] sm:$0xff]  ;;  %v235_v11 = vld [vmem:[%s2465_s30 + $0x48] sm:$0xff]  ;;  %v242_v12 = vpack.c.bf16 %v227_v9, %v226_v8  ;;  %v229_v15 = vld [vmem:[%s2465_s30 + $0x18] sm:$0xff]  ;;  %s2279_s7 = scalar_lea.hbm %s2278_s5, 128  ;;  %p2284_p11 = scmp.lt.s32.totalorder %s2278_s5, %s3685_s3 }
  0x36   : > { %315 = vmatpush.bf16.msra.mxu0 %v2009_v1  ;;  %2021 = vmatpush.bf16.msra.mxu2 %v2009_v1  ;;  %v246_v13 = vpack.c.bf16 %v235_v11, %v234_v10  ;;  %v236_v16 = vld [vmem:[%s2465_s30 + $0x50] sm:$0xff]  ;;  %v237_v17 = vld [vmem:[%s2465_s30 + $0x58] sm:$0xff]  ;;  %v243_v18 = vpack.c.bf16 %v229_v15, %v228_v14  ;;  %v230_v20 = vld [vmem:[%s2465_s30 + $0x20] sm:$0xff]  ;;  %p2280_p1 = scmp.ne.s32.totalorder %s2278_s5, %s2279_s7  ;;  %p2285_p2 = scmp.lt.s32.totalorder %s2283_s20, %s2279_s7 }
  0x37   : > { %v247_v19 = vpack.c.bf16 %v237_v17, %v236_v16  ;;  %v231_v21 = vld [vmem:[%s2465_s30 + $0x28] sm:$0xff]  ;;  %v238_v22 = vld [vmem:[%s2465_s30 + $0x60] sm:$0xff]  ;;  %v232_v26 = vld [vmem:[%s2465_s30 + $0x30] sm:$0xff] }
  0x38   : > { %v239_v23 = vld [vmem:[%s2465_s30 + $0x68] sm:$0xff]  ;;  %v244_v24 = vpack.c.bf16 %v231_v21, %v230_v20  ;;  %v233_v27 = vld [vmem:[%s2465_s30 + $0x38] sm:$0xff]  ;;  %v240_v28 = vld [vmem:[%s2465_s30 + $0x70] sm:$0xff]  ;;  %p2281_p4 = pnand %p2280_p1, %p2429_p3  ;;  %p2286_p9 = por %p2285_p2, %p2284_p11 }
  0x39   : > { %v248_v25 = vpack.c.bf16 %v239_v23, %v238_v22  ;;  %v241_v29 = vld [vmem:[%s2465_s30 + $0x78] sm:$0xff]  ;;  %v245_v30 = vpack.c.bf16 %v233_v27, %v232_v26  ;;  %v2017_v62 = vld [vmem:[#allocation7 + $0x30] sm:$0xff] }
  0x3a   : > { %316 = vmatpush.bf16.msra.mxu0 %v2008_v2  ;;  %2022 = vmatpush.bf16.msra.mxu2 %v2008_v2  ;;  %v249_v31 = vpack.c.bf16 %v241_v29, %v240_v28  ;;  %v2018_v59 = vld [vmem:[#allocation7 + $0x38] sm:$0xff]  ;;  %p2282_p8 = pneg %p2281_p4 }
  0x3b   : > { %1075 = vmatpush.bf16.msra.mxu1 %v2018_v59  ;;  %2028 = vmatpush.bf16.msra.mxu3 %v2018_v59 }
  0x3c   : > { %p2287_p10 = pnand %p2286_p9, %p2282_p8 }
  0x3e   : > { %317 = vmatpush.bf16.msra.mxu0 %v2007_v3  ;;  %2023 = vmatpush.bf16.msra.mxu2 %v2007_v3 }
  0x3f   : > { %1076 = vmatpush.bf16.msra.mxu1 %v2017_v62  ;;  %2029 = vmatpush.bf16.msra.mxu3 %v2017_v62 }
  0x42   : > { %318 = vmatpush.bf16.msra.mxu0 %v2006_v4  ;;  %2024 = vmatpush.bf16.msra.mxu2 %v2006_v4 }
  0x46   : > { %319 = vmatpush.bf16.msra.mxu0 %v2005_v5  ;;  %2025 = vmatpush.bf16.msra.mxu2 %v2005_v5 }
  0x4a   : > { %320 = vmatpush.bf16.msra.mxu0 %v2004_v6  ;;  %2026 = vmatpush.bf16.msra.mxu2 %v2004_v6 }
  0x4e   : > { %321 = vmatpush.bf16.msra.mxu0 %v2003_v7  ;;  %2027 = vmatpush.bf16.msra.mxu2 %v2003_v7 }
  0x51   : > { %322 = vmatmul.bf16.vlgmr.msra.gmra.mxu0 %v242_v12  ;;  %342 = vmatmul.bf16.vlgmr.msra.gmra.mxu2 %v246_v13 }
  0x61   : > { %327 = vmatmul.bf16.gmra.mxu0 %v243_v18  ;;  %347 = vmatmul.bf16.gmra.mxu2 %v247_v19 }
  0x71   : > { %332 = vmatmul.bf16.gmra.mxu0 %v244_v24  ;;  %352 = vmatmul.bf16.gmra.mxu2 %v248_v25 }
  0x81   : > { %337 = vmatmul.bf16.gmra.mxu0 %v245_v30  ;;  %357 = vmatmul.bf16.gmra.mxu2 %v249_v31 }
  0xce   : > { %v2491_v32 = vpop.f32.mrf.mxu0 }
  0xcf   : > { %v363_v33 = vmul.f32 %v2491_v32, %v2491_v32 }
  0xd1   : > { %v2495_v34 = vmin.f32 %v363_v33, 16.0 }
  0xd3   : > { %v376_v35 = vmul.f32 3.8918573e-05, %v2495_v34  ;;  %v365_v50 = vmul.f32 2.1237322e-06, %v2495_v34 }
  0xd4   : > { %v2498_v36 = vpop.f32.mrf.mxu2 }
  0xd5   : > { %v377_v37 = vadd.f32 0.001143296, %v376_v35  ;;  %v683_v38 = vmul.f32 %v2498_v36, %v2498_v36  ;;  %v366_v55 = vadd.f32 0.00028619796, %v365_v50 }
  0xd6   : > { %v2502_v39 = vpop.f32.mrf.mxu0 }
  0xd7   : > { %v378_v40 = vmul.f32 %v377_v37, %v2495_v34  ;;  %v2505_v41 = vmin.f32 %v683_v38, 16.0  ;;  %v403_v42 = vmul.f32 %v2502_v39, %v2502_v39  ;;  %v367_v63 = vmul.f32 %v366_v55, %v2495_v34 }
  0xd9   : > { %v696_v43 = vmul.f32 3.8918573e-05, %v2505_v41  ;;  %v2510_v44 = vmin.f32 %v403_v42, 16.0  ;;  %v379_v45 = vadd.f32 0.014752088, %v378_v40 }
  0xda   : > { %v685_v58 = vmul.f32 2.1237322e-06, %v2505_v41  ;;  %v368_v7 = vadd.f32 0.0036580483, %v367_v63 }
  0xdb   : > { %v697_v46 = vadd.f32 0.001143296, %v696_v43  ;;  %v416_v48 = vmul.f32 3.8918573e-05, %v2510_v44  ;;  %v380_v51 = vmul.f32 %v379_v45, %v2495_v34  ;;  %v405_v3 = vmul.f32 2.1237322e-06, %v2510_v44 }
  0xdc   : > { %v2512_v47 = vpop.f32.mrf.mxu2  ;;  %v686_v2 = vadd.f32 0.00028619796, %v685_v58  ;;  %v369_v15 = vmul.f32 %v368_v7, %v2495_v34 }
  0xdd   : > { %v723_v49 = vmul.f32 %v2512_v47, %v2512_v47  ;;  %v698_v53 = vmul.f32 %v697_v46, %v2505_v41  ;;  %v417_v54 = vadd.f32 0.001143296, %v416_v48  ;;  %v381_v57 = vadd.f32 0.112945676, %v380_v51  ;;  %v2016_v48 = vld [vmem:[#allocation7 + $0x28] sm:$0xff] }
  0xde   : > { %v2529_v6 = vpop.f32.mrf.mxu0  ;;  %v687_v10 = vmul.f32 %v686_v2, %v2505_v41  ;;  %v406_v11 = vadd.f32 0.00028619796, %v405_v3  ;;  %v370_v25 = vadd.f32 0.05243302, %v369_v15  ;;  %1077 = vmatpush.bf16.msra.mxu1 %v2016_v48  ;;  %2030 = vmatpush.bf16.msra.mxu3 %v2016_v48 }
  0xdf   : > { %v2519_v52 = vmin.f32 %v723_v49, 16.0  ;;  %v699_v60 = vadd.f32 0.014752088, %v698_v53  ;;  %v418_v61 = vmul.f32 %v417_v54, %v2510_v44  ;;  %v382_v1 = vmul.f32 %v381_v57, %v2495_v34 }
  0xe0   : > { %v443_v13 = vmul.f32 %v2529_v6, %v2529_v6  ;;  %v688_v18 = vadd.f32 0.0036580483, %v687_v10  ;;  %v407_v19 = vmul.f32 %v406_v11, %v2510_v44  ;;  %v371_v38 = vmul.f32 %v370_v25, %v2495_v34 }
  0xe1   : > { %v736_v56 = vmul.f32 3.8918573e-05, %v2519_v52  ;;  %v700_v4 = vmul.f32 %v699_v60, %v2505_v41  ;;  %v419_v5 = vadd.f32 0.014752088, %v418_v61  ;;  %v383_v9 = vadd.f32 0.4994258, %v382_v1 }
  0xe2   : > { %v725_v20 = vmul.f32 2.1237322e-06, %v2519_v52  ;;  %v2541_v22 = vmin.f32 %v443_v13, 16.0  ;;  %v689_v28 = vmul.f32 %v688_v18, %v2505_v41  ;;  %v408_v29 = vadd.f32 0.0036580483, %v407_v19  ;;  %v2015_v60 = vld [vmem:[#allocation7 + $0x20] sm:$0xff] }
  0xe3   : > { %v737_v0 = vadd.f32 0.001143296, %v736_v56  ;;  %v701_v12 = vadd.f32 0.112945676, %v700_v4  ;;  %v420_v14 = vmul.f32 %v419_v5, %v2510_v44  ;;  %v384_v17 = vmul.f32 %v383_v9, %v2495_v34  ;;  %1078 = vmatpush.bf16.msra.mxu1 %v2015_v60  ;;  %2031 = vmatpush.bf16.msra.mxu3 %v2015_v60 }
  0xe4   : > { %v2543_v24 = vpop.f32.mrf.mxu2  ;;  %v726_v30 = vadd.f32 0.00028619796, %v725_v20  ;;  %v456_v33 = vmul.f32 3.8918573e-05, %v2541_v22  ;;  %v690_v43 = vadd.f32 0.05243302, %v689_v28  ;;  %v409_v45 = vmul.f32 %v408_v29, %v2510_v44 }
  0xe5   : > { %v738_v8 = vmul.f32 %v737_v0, %v2519_v52  ;;  %v702_v21 = vmul.f32 %v701_v12, %v2505_v41  ;;  %v421_v23 = vadd.f32 0.112945676, %v420_v14  ;;  %v2546_v27 = vadd.f32 1.0, %v384_v17 }
  0xe6   : > { %v763_v35 = vmul.f32 %v2543_v24, %v2543_v24  ;;  %v457_v42 = vadd.f32 0.001143296, %v456_v33  ;;  %v727_v46 = vmul.f32 %v726_v30, %v2519_v52  ;;  %v372_v54 = vadd.f32 0.18741608, %v371_v38  ;;  %v2563_v59 = vpop.f32.mrf.mxu0  ;;  %v2014_v33 = vld [vmem:[#allocation7 + $0x18] sm:$0xff] }
  0xe7   : > { %v739_v16 = vadd.f32 0.014752088, %v738_v8  ;;  %v703_v31 = vadd.f32 0.4994258, %v702_v21  ;;  %v422_v37 = vmul.f32 %v421_v23, %v2510_v44  ;;  %2109 = vrcp.f32 %v2546_v27  ;;  %1079 = vmatpush.bf16.msra.mxu1 %v2014_v33  ;;  %2032 = vmatpush.bf16.msra.mxu3 %v2014_v33 }
  0xe8   : > { %v458_v50 = vmul.f32 %v457_v42, %v2541_v22  ;;  %v2559_v51 = vmin.f32 %v763_v35, 16.0  ;;  %v691_v56 = vmul.f32 %v690_v43, %v2505_v41  ;;  %v410_v57 = vadd.f32 0.05243302, %v409_v45 }
  0xe9   : > { %v740_v26 = vmul.f32 %v739_v16, %v2519_v52  ;;  %v704_v49 = vmul.f32 %v703_v31, %v2505_v41  ;;  %v423_v53 = vadd.f32 0.4994258, %v422_v37  ;;  %v728_v58 = vadd.f32 0.0036580483, %v727_v46 }
  0xea   : > { %v459_v62 = vadd.f32 0.014752088, %v458_v50  ;;  %v776_v63 = vmul.f32 3.8918573e-05, %v2559_v51  ;;  %v445_v2 = vmul.f32 2.1237322e-06, %v2541_v22  ;;  %v373_v3 = vmul.f32 %v372_v54, %v2495_v34 }
  0xeb   : > { %v741_v40 = vadd.f32 0.112945676, %v740_v26  ;;  %v2565_v61 = vadd.f32 1.0, %v704_v49  ;;  %v424_v1 = vmul.f32 %v423_v53, %v2510_v44  ;;  %v483_v7 = vmul.f32 %v2563_v59, %v2563_v59 }
  0xec   : > { %v777_v5 = vadd.f32 0.001143296, %v776_v63  ;;  %v2575_v8 = vpop.f32.mrf.mxu2  ;;  %v692_v9 = vadd.f32 0.18741608, %v691_v56  ;;  %v411_v10 = vmul.f32 %v410_v57, %v2510_v44  ;;  %v729_v11 = vmul.f32 %v728_v58, %v2519_v52  ;;  %v2013_v57 = vld [vmem:[#allocation7 + $0x10] sm:$0xff] }
  0xed   : > { %v742_v55 = vmul.f32 %v741_v40, %v2519_v52  ;;  %v2568_v0 = vpop.eup %2109  ;;  %2111 = vrcp.f32 %v2565_v61  ;;  %v460_v34 = vmul.f32 %v459_v62, %v2541_v22  ;;  %v2583_v13 = vmin.f32 %v483_v7, 16.0  ;;  %1080 = vmatpush.bf16.msra.mxu1 %v2013_v57  ;;  %2033 = vmatpush.bf16.msra.mxu3 %v2013_v57 }
  0xee   : > { %v387_v12 = vmul.f32 %v2568_v0, %v2546_v27  ;;  %v2585_v14 = vadd.f32 1.0, %v424_v1  ;;  %v446_v15 = vadd.f32 0.00028619796, %v445_v2  ;;  %v778_v16 = vmul.f32 %v777_v5, %v2559_v51 }
  0xef   : > { %v743_v4 = vadd.f32 0.4994258, %v742_v55  ;;  %v803_v17 = vmul.f32 %v2575_v8, %v2575_v8  ;;  %v374_v18 = vadd.f32 1.1283791, %v373_v3  ;;  %v412_v20 = vadd.f32 0.18741608, %v411_v10 }
  0xf0   : > { %v730_v21 = vadd.f32 0.05243302, %v729_v11  ;;  %v388_v23 = vsub.f32 1.0, %v387_v12  ;;  %v693_v25 = vmul.f32 %v692_v9, %v2505_v41  ;;  %v461_v26 = vadd.f32 0.112945676, %v460_v34  ;;  %v2632_v12 = vpop.f32.mrf.mxu0 }
  0xf1   : > { %v744_v19 = vmul.f32 %v743_v4, %v2519_v52  ;;  %v496_v28 = vmul.f32 3.8918573e-05, %v2583_v13  ;;  %2113 = vrcp.f32 %v2585_v14  ;;  %v447_v29 = vmul.f32 %v446_v15, %v2541_v22 }
  0xf2   : > { %v779_v30 = vadd.f32 0.014752088, %v778_v16  ;;  %v2595_v31 = vmin.f32 %v803_v17, 16.0  ;;  %v2600_v37 = vmul.f32 %v374_v18, %v2491_v32  ;;  %v765_v41 = vmul.f32 2.1237322e-06, %v2559_v51 }
  0xf3   : > { %v2597_v35 = vpop.eup %2111  ;;  %v2602_v38 = vadd.f32 1.0, %v744_v19  ;;  %v395_v40 = vand.u32 2147483647, %v2546_v27  ;;  %v397_v42 = vand.u32 2147483648, %v2546_v27  ;;  %v413_v43 = vmul.f32 %v412_v20, %v2510_v44 }
  0xf4   : > { %v816_v45 = vmul.f32 3.8918573e-05, %v2595_v31  ;;  %vm391_vm0 = vweird.f32 %v2546_v27  ;;  %v694_v46 = vadd.f32 1.1283791, %v693_v25  ;;  %v462_v32 = vmul.f32 %v461_v26, %v2541_v22 }
  0xf5   : > { %v497_v48 = vadd.f32 0.001143296, %v496_v28  ;;  %v389_v49 = vmul.f32 %v2568_v0, %v388_v23  ;;  %v731_v50 = vmul.f32 %v730_v21, %v2519_v52  ;;  %v448_v53 = vadd.f32 0.0036580483, %v447_v29 }
  0xf6   : > { %v780_v54 = vmul.f32 %v779_v30, %v2559_v51  ;;  %v707_v44 = vmul.f32 %v2597_v35, %v2565_v61  ;;  %2115 = vrcp.f32 %v2602_v38  ;;  %v766_v55 = vadd.f32 0.00028619796, %v765_v41 }
  0xf7   : > { %v817_v56 = vadd.f32 0.001143296, %v816_v45  ;;  %v2617_v58 = vpop.eup %2113  ;;  %vm392_vm1 = vweird.f32 %v2568_v0  ;;  %vm2620_vm2 = vcmp.eq.f32.partialorder %v395_v40, 8.507059e+37  ;;  %v398_v62 = vor.u32 1.1754944e-38, %v397_v42 }
  0xf8   : > { %v717_v63 = vand.u32 2147483648, %v2565_v61  ;;  %v414_v1 = vadd.f32 1.1283791, %v413_v43  ;;  %v2626_v2 = vmul.f32 %v694_v46, %v2498_v36  ;;  %v715_v3 = vand.u32 2147483647, %v2565_v61  ;;  %vm2651_vm3 = vmor %vm391_vm0, %vm392_vm1 }
  0xf9   : > { %v463_v4 = vadd.f32 0.4994258, %v462_v32  ;;  %v498_v5 = vmul.f32 %v497_v48, %v2583_v13  ;;  %v390_v7 = vadd.f32 %v2568_v0, %v389_v49  ;;  %v732_v9 = vadd.f32 0.18741608, %v731_v50 }
  0xfa   : > { %v449_v10 = vmul.f32 %v448_v53, %v2541_v22  ;;  %v781_v11 = vadd.f32 0.112945676, %v780_v54  ;;  %v708_v34 = vsub.f32 1.0, %v707_v44  ;;  %v427_v36 = vmul.f32 %v2617_v58, %v2585_v14 }
  0xfb   : > { %v767_v15 = vmul.f32 %v766_v55, %v2559_v51  ;;  %v818_v16 = vmul.f32 %v817_v56, %v2595_v31  ;;  %v2638_v17 = vor.u32 1.1754944e-38, %v717_v63  ;;  %v2641_v18 = vmul.f32 %v414_v1, %v2502_v39 }
  0xfc   : > { %v435_v19 = vand.u32 2147483647, %v2585_v14  ;;  %v485_v20 = vmul.f32 2.1237322e-06, %v2583_v13  ;;  %v2645_v21 = vpop.eup %2115  ;;  %vm711_vm4 = vweird.f32 %v2565_v61  ;;  %v437_v25 = vand.u32 2147483648, %v2585_v14 }
  0xfd   : > { %v464_v39 = vmul.f32 %v463_v4, %v2541_v22  ;;  %v499_v26 = vadd.f32 0.014752088, %v498_v5  ;;  %v523_v28 = vmul.f32 %v2632_v12, %v2632_v12  ;;  %v394_v29 = vsel %vm2651_vm3, %v2568_v0, %v390_v7 }
  0xfe   : > { %v733_v27 = vmul.f32 %v732_v9, %v2519_v52  ;;  %v450_v30 = vadd.f32 0.05243302, %v449_v10  ;;  %v782_v33 = vmul.f32 %v781_v11, %v2559_v51  ;;  %v709_v41 = vmul.f32 %v2597_v35, %v708_v34  ;;  %v2696_v9 = vpop.f32.mrf.mxu2 }
  0xff   : > { %v428_v40 = vsub.f32 1.0, %v427_v36  ;;  %v768_v42 = vadd.f32 0.0036580483, %v767_v15  ;;  %v819_v43 = vadd.f32 0.014752088, %v818_v16  ;;  %vm712_vm5 = vweird.f32 %v2597_v35 }
 0x100   : > { %v747_v45 = vmul.f32 %v2645_v21, %v2602_v38  ;;  %v486_v46 = vadd.f32 0.00028619796, %v485_v20  ;;  %v805_v32 = vmul.f32 2.1237322e-06, %v2595_v31  ;;  %v399_v0 = vsel %vm2620_vm2, %v398_v62, %v394_v29  ;;  %vm2702_vm9 = vmor %vm711_vm4, %vm712_vm5 }
 0x101   : > { %vm2672_vm6 = vcmp.eq.f32.partialorder %v715_v3, 8.507059e+37  ;;  %vm431_vm7 = vweird.f32 %v2585_v14  ;;  %v2677_v48 = vadd.f32 1.0, %v464_v39  ;;  %v500_v49 = vmul.f32 %v499_v26, %v2583_v13 }
 0x102   : > { %v2680_v50 = vmin.f32 %v523_v28, 16.0  ;;  %v2682_v53 = vor.u32 1.1754944e-38, %v437_v25  ;;  %v734_v54 = vadd.f32 1.1283791, %v733_v27  ;;  %v451_v44 = vmul.f32 %v450_v30, %v2541_v22 }
 0x103   : > { %v783_v55 = vadd.f32 0.4994258, %v782_v33  ;;  %v710_v56 = vadd.f32 %v2597_v35, %v709_v41  ;;  %v429_v57 = vmul.f32 %v2617_v58, %v428_v40  ;;  %v769_v60 = vmul.f32 %v768_v42, %v2559_v51  ;;  %v2744_v40 = vpop.f32.mrf.mxu0  ;;  %v2012_v42 = vld [vmem:[#allocation7 + $0x8] sm:$0xff] }
 0x104   : > { %v820_v62 = vmul.f32 %v819_v43, %v2595_v31  ;;  %v2690_v63 = vmul.f32 %v399_v0, %v2600_v37  ;;  %v748_v1 = vsub.f32 1.0, %v747_v45  ;;  %v487_v3 = vmul.f32 %v486_v46, %v2583_v13  ;;  %1081 = vmatpush.bf16.msra.mxu1 %v2012_v42  ;;  %2034 = vmatpush.bf16.msra.mxu3 %v2012_v42 }
 0x105   : > { %v806_v4 = vadd.f32 0.00028619796, %v805_v32  ;;  %vm432_vm8 = vweird.f32 %v2617_v58  ;;  %2117 = vrcp.f32 %v2677_v48  ;;  %v501_v5 = vadd.f32 0.112945676, %v500_v49 }
 0x106   : > { %v536_v7 = vmul.f32 3.8918573e-05, %v2680_v50  ;;  %vm2706_vm10 = vcmp.eq.f32.partialorder %v435_v19, 8.507059e+37  ;;  %v2711_v11 = vmul.f32 %v734_v54, %v2512_v47  ;;  %v755_v34 = vand.u32 2147483647, %v2602_v38  ;;  %vm2733_vm12 = vmor %vm431_vm7, %vm432_vm8 }
 0x107   : > { %v452_v36 = vadd.f32 0.18741608, %v451_v44  ;;  %v784_v15 = vmul.f32 %v783_v55, %v2559_v51  ;;  %v714_v61 = vsel %vm2702_vm9, %v2597_v35, %v710_v56  ;;  %v430_v16 = vadd.f32 %v2617_v58, %v429_v57  ;;  %v2011_v57 = vld [vmem:[#allocation7] sm:$0xff] }
 0x108   : > { %v770_v20 = vadd.f32 0.05243302, %v769_v60  ;;  %v821_v23 = vadd.f32 0.112945676, %v820_v62  ;;  %v749_v19 = vmul.f32 %v2645_v21, %v748_v1  ;;  %v488_v25 = vadd.f32 0.0036580483, %v487_v3  ;;  %1082 = vmatpush.bf16.msra.mxu1 %v2011_v57  ;;  %2035 = vmatpush.bf16.msra.mxu3 %v2011_v57 }
 0x109   : > { %v807_v39 = vmul.f32 %v806_v4, %v2595_v31  ;;  %v843_v47 = vmul.f32 %v2696_v9, %v2696_v9  ;;  %vm751_vm11 = vweird.f32 %v2602_v38  ;;  %v757_v26 = vand.u32 2147483648, %v2602_v38 }
 0x10a   : > { %v502_v28 = vmul.f32 %v501_v5, %v2583_v13  ;;  %v537_v29 = vadd.f32 0.001143296, %v536_v7  ;;  %v719_v35 = vsel %vm2672_vm6, %v2638_v17, %v714_v61  ;;  %vm2737_vm13 = vcmp.eq.f32.partialorder %v755_v34, 8.507059e+37  ;;  %v2779_v5 = vpop.f32.mrf.mxu2 }
 0x10b   : > { %v453_v33 = vmul.f32 %v452_v36, %v2541_v22  ;;  %v2742_v41 = vadd.f32 1.0, %v784_v15  ;;  %v2746_v17 = vpop.eup %2117  ;;  %v434_v14 = vsel %vm2733_vm12, %v2617_v58, %v430_v16  ;;  %vm752_vm14 = vweird.f32 %v2645_v21 }
 0x10c   : > { %v771_v43 = vmul.f32 %v770_v20, %v2559_v51  ;;  %v822_v45 = vmul.f32 %v821_v23, %v2595_v31  ;;  %v750_v46 = vadd.f32 %v2645_v21, %v749_v19  ;;  %v489_v22 = vmul.f32 %v488_v25, %v2583_v13  ;;  %vm2775_vm15 = vmor %vm751_vm11, %vm752_vm14 }
 0x10d   : > { %v808_v32 = vadd.f32 0.0036580483, %v807_v39  ;;  %v2756_v0 = vmin.f32 %v843_v47, 16.0  ;;  %v503_v52 = vadd.f32 0.4994258, %v502_v28  ;;  %v538_v58 = vmul.f32 %v537_v29, %v2680_v50 }
 0x10e   : > { %v525_v49 = vmul.f32 2.1237322e-06, %v2680_v50  ;;  %v563_v54 = vmul.f32 %v2744_v40, %v2744_v40  ;;  %v758_v44 = vor.u32 1.1754944e-38, %v757_v26  ;;  %v454_v55 = vadd.f32 1.1283791, %v453_v33 }
 0x10f   : > { %v467_v56 = vmul.f32 %v2746_v17, %v2677_v48  ;;  %2119 = vrcp.f32 %v2742_v41  ;;  %v2766_v60 = vmul.f32 %v719_v35, %v2626_v2  ;;  %v439_v62 = vsel %vm2706_vm10, %v2682_v53, %v434_v14 }
 0x110   : > { %v772_v3 = vadd.f32 0.18741608, %v771_v43  ;;  %v823_v4 = vadd.f32 0.4994258, %v822_v45  ;;  %v754_v2 = vsel %vm2775_vm15, %v2645_v21, %v750_v46  ;;  %v490_v7 = vadd.f32 0.05243302, %v489_v22 }
 0x111   : > { %v809_v37 = vmul.f32 %v808_v32, %v2595_v31  ;;  %v856_v53 = vmul.f32 3.8918573e-05, %v2756_v0  ;;  %v504_v38 = vmul.f32 %v503_v52, %v2583_v13  ;;  %v526_v10 = vadd.f32 0.00028619796, %v525_v49 }
 0x112   : > { %v539_v34 = vadd.f32 0.014752088, %v538_v58  ;;  %v2787_v36 = vmin.f32 %v563_v54, 16.0  ;;  %v2790_v15 = vmul.f32 %v439_v62, %v2641_v18  ;;  %v2793_v61 = vmul.f32 %v454_v55, %v2529_v6 }
 0x113   : > { %v468_v21 = vsub.f32 1.0, %v467_v56  ;;  %v883_v16 = vmul.f32 %v2779_v5, %v2779_v5  ;;  %v759_v20 = vsel %vm2737_vm13, %v758_v44, %v754_v2  ;;  %v475_v23 = vand.u32 2147483647, %v2677_v48 }
 0x114   : > { %v824_v19 = vmul.f32 %v823_v4, %v2595_v31  ;;  %v576_v25 = vmul.f32 3.8918573e-05, %v2787_v36  ;;  %v773_v18 = vmul.f32 %v772_v3, %v2559_v51  ;;  %v491_v6 = vmul.f32 %v490_v7, %v2583_v13 }
 0x115   : > { %v2802_v39 = vpop.eup %2119  ;;  %v810_v47 = vadd.f32 0.05243302, %v809_v37  ;;  %v857_v26 = vadd.f32 0.001143296, %v856_v53  ;;  %vm471_vm0 = vweird.f32 %v2677_v48  ;;  %v2807_v28 = vadd.f32 1.0, %v504_v38 }
 0x116   : > { %v527_v29 = vmul.f32 %v526_v10, %v2680_v50  ;;  %v540_v35 = vmul.f32 %v539_v34, %v2680_v50  ;;  %v469_v27 = vmul.f32 %v2746_v17, %v468_v21  ;;  %v845_v30 = vmul.f32 2.1237322e-06, %v2756_v0 }
 0x117   : > { %v577_v33 = vadd.f32 0.001143296, %v576_v25  ;;  %v2813_v42 = vmin.f32 %v883_v16, 16.0  ;;  %v2816_v51 = vmul.f32 %v759_v20, %v2711_v11  ;;  %v477_v14 = vand.u32 2147483648, %v2677_v48 }
 0x118   : > { %v787_v43 = vmul.f32 %v2802_v39, %v2742_v41  ;;  %v2821_v45 = vadd.f32 1.0, %v824_v19  ;;  %vm2823_vm1 = vcmp.eq.f32.partialorder %v475_v23, 8.507059e+37  ;;  %v774_v22 = vadd.f32 1.1283791, %v773_v18 }
 0x119   : > { %v492_v32 = vadd.f32 0.18741608, %v491_v6  ;;  %v811_v52 = vmul.f32 %v810_v47, %v2595_v31  ;;  %v858_v49 = vmul.f32 %v857_v26, %v2756_v0  ;;  %2121 = vrcp.f32 %v2807_v28  ;;  %v2861_v47 = vpop.f32.mrf.mxu0 }
 0x11a   : > { %v528_v11 = vadd.f32 0.0036580483, %v527_v29  ;;  %v541_v58 = vadd.f32 0.112945676, %v540_v35  ;;  %v578_v54 = vmul.f32 %v577_v33, %v2787_v36  ;;  %v470_v44 = vadd.f32 %v2746_v17, %v469_v27 }
 0x11b   : > { %vm472_vm2 = vweird.f32 %v2746_v17  ;;  %v846_v55 = vadd.f32 0.00028619796, %v845_v30  ;;  %v896_v56 = vmul.f32 3.8918573e-05, %v2813_v42  ;;  %v788_v57 = vsub.f32 1.0, %v787_v43 }
 0x11c   : > { %2123 = vrcp.f32 %v2821_v45  ;;  %v565_v62 = vmul.f32 2.1237322e-06, %v2787_v36  ;;  %v579_v1 = vadd.f32 0.014752088, %v578_v54  ;;  %v797_v3 = vand.u32 2147483648, %v2742_v41  ;;  %vm2840_vm3 = vmor %vm471_vm0, %vm472_vm2 }
 0x11d   : > { %v493_v4 = vmul.f32 %v492_v32, %v2583_v13  ;;  %v812_v2 = vadd.f32 0.18741608, %v811_v52  ;;  %v859_v7 = vadd.f32 0.014752088, %v858_v49  ;;  %v478_v53 = vor.u32 1.1754944e-38, %v477_v14 }
 0x11e   : > { %v529_v38 = vmul.f32 %v528_v11, %v2680_v50  ;;  %v542_v10 = vmul.f32 %v541_v58, %v2680_v50  ;;  %v897_v34 = vadd.f32 0.001143296, %v896_v56  ;;  %v474_v21 = vsel %vm2840_vm3, %v2746_v17, %v470_v44 }
 0x11f   : > { %v2850_v13 = vmul.f32 %v774_v22, %v2543_v24  ;;  %v795_v16 = vand.u32 2147483647, %v2742_v41  ;;  %v847_v48 = vmul.f32 %v846_v55, %v2756_v0  ;;  %v2854_v20 = vpop.eup %2121  ;;  %v789_v23 = vmul.f32 %v2802_v39, %v788_v57 }
 0x120   : > { %vm791_vm4 = vweird.f32 %v2742_v41  ;;  %v566_v19 = vadd.f32 0.00028619796, %v565_v62  ;;  %v580_v25 = vmul.f32 %v579_v1, %v2787_v36  ;;  %v798_v18 = vor.u32 1.1754944e-38, %v797_v3  ;;  %v2890_v62 = vpop.f32.mrf.mxu2 }
 0x121   : > { %v494_v6 = vadd.f32 1.1283791, %v493_v4  ;;  %v813_v17 = vmul.f32 %v812_v2, %v2595_v31  ;;  %v860_v24 = vmul.f32 %v859_v7, %v2756_v0  ;;  %v479_v29 = vsel %vm2823_vm1, %v478_v53, %v474_v21 }
 0x122   : > { %v2863_v26 = vpop.eup %2123  ;;  %v530_v35 = vadd.f32 0.05243302, %v529_v38  ;;  %v543_v27 = vadd.f32 0.4994258, %v542_v10  ;;  %v898_v30 = vmul.f32 %v897_v34, %v2813_v42  ;;  %vm792_vm5 = vweird.f32 %v2802_v39 }
 0x123   : > { %vm2869_vm6 = vcmp.eq.f32.partialorder %v795_v16, 8.507059e+37  ;;  %v507_v31 = vmul.f32 %v2854_v20, %v2807_v28  ;;  %v848_v14 = vadd.f32 0.0036580483, %v847_v48  ;;  %v581_v43 = vadd.f32 0.112945676, %v580_v25  ;;  %vm2896_vm7 = vmor %vm791_vm4, %vm792_vm5 }
 0x124   : > { %v790_v22 = vadd.f32 %v2802_v39, %v789_v23  ;;  %v517_v46 = vand.u32 2147483648, %v2807_v28  ;;  %v567_v32 = vmul.f32 %v566_v19, %v2787_v36  ;;  %v603_v52 = vmul.f32 %v2861_v47, %v2861_v47 }
 0x125   : > { %v2881_v49 = vmul.f32 %v479_v29, %v2793_v61  ;;  %v2884_v11 = vmul.f32 %v494_v6, %v2563_v59  ;;  %v827_v58 = vmul.f32 %v2863_v26, %v2821_v45  ;;  %v861_v54 = vadd.f32 0.112945676, %v860_v24 }
 0x126   : > { %v814_v44 = vadd.f32 1.1283791, %v813_v17  ;;  %v531_v55 = vmul.f32 %v530_v35, %v2680_v50  ;;  %v544_v56 = vmul.f32 %v543_v27, %v2680_v50  ;;  %v899_v57 = vadd.f32 0.014752088, %v898_v30 }
 0x127   : > { %v508_v59 = vsub.f32 1.0, %v507_v31  ;;  %v515_v1 = vand.u32 2147483647, %v2807_v28  ;;  %v849_v3 = vmul.f32 %v848_v14, %v2756_v0  ;;  %v582_v4 = vmul.f32 %v581_v43, %v2787_v36  ;;  %v2933_v14 = vpop.f32.mrf.mxu0 }
 0x128   : > { %v794_v2 = vsel %vm2896_vm7, %v2802_v39, %v790_v22  ;;  %v518_v7 = vor.u32 1.1754944e-38, %v517_v46  ;;  %v568_v37 = vadd.f32 0.0036580483, %v567_v32  ;;  %v2906_v53 = vmin.f32 %v603_v52, 16.0 }
 0x129   : > { %vm511_vm8 = vweird.f32 %v2807_v28  ;;  %v828_v41 = vsub.f32 1.0, %v827_v58  ;;  %v862_v38 = vmul.f32 %v861_v54, %v2756_v0  ;;  %v885_v10 = vmul.f32 2.1237322e-06, %v2813_v42 }
 0x12a   : > { %v923_v34 = vmul.f32 %v2890_v62, %v2890_v62  ;;  %v2914_v21 = vmul.f32 %v814_v44, %v2575_v8  ;;  %v532_v16 = vadd.f32 0.18741608, %v531_v55  ;;  %v2916_v48 = vadd.f32 1.0, %v544_v56 }
 0x12b   : > { %v900_v39 = vmul.f32 %v899_v57, %v2813_v42  ;;  %v509_v23 = vmul.f32 %v2854_v20, %v508_v59  ;;  %vm831_vm9 = vweird.f32 %v2821_v45  ;;  %v850_v19 = vadd.f32 0.05243302, %v849_v3 }
 0x12c   : > { %v583_v25 = vadd.f32 0.4994258, %v582_v4  ;;  %v799_v6 = vsel %vm2869_vm6, %v798_v18, %v794_v2  ;;  %v835_v17 = vand.u32 2147483647, %v2821_v45  ;;  %v569_v24 = vmul.f32 %v568_v37, %v2787_v36 }
 0x12d   : > { %v616_v8 = vmul.f32 3.8918573e-05, %v2906_v53  ;;  %vm2926_vm10 = vcmp.eq.f32.partialorder %v515_v1, 8.507059e+37  ;;  %v829_v35 = vmul.f32 %v2863_v26, %v828_v41  ;;  %v863_v27 = vadd.f32 0.4994258, %v862_v38 }
 0x12e   : > { %v886_v30 = vadd.f32 0.00028619796, %v885_v10  ;;  %v2931_v31 = vmin.f32 %v923_v34, 16.0  ;;  %vm512_vm11 = vweird.f32 %v2854_v20  ;;  %v533_v18 = vmul.f32 %v532_v16, %v2680_v50 }
 0x12f   : > { %2125 = vrcp.f32 %v2916_v48  ;;  %v901_v33 = vadd.f32 0.112945676, %v900_v39  ;;  %v510_v43 = vadd.f32 %v2854_v20, %v509_v23  ;;  %v837_v22 = vand.u32 2147483648, %v2821_v45  ;;  %vm2956_vm13 = vmor %vm511_vm8, %vm512_vm11 }
 0x130   : > { %v851_v46 = vmul.f32 %v850_v19, %v2756_v0  ;;  %v584_v32 = vmul.f32 %v583_v25, %v2787_v36  ;;  %vm832_vm12 = vweird.f32 %v2863_v26  ;;  %v570_v52 = vadd.f32 0.05243302, %v569_v24 }
 0x131   : > { %v617_v58 = vadd.f32 0.001143296, %v616_v8  ;;  %v643_v54 = vmul.f32 %v2933_v14, %v2933_v14  ;;  %v830_v50 = vadd.f32 %v2863_v26, %v829_v35  ;;  %v864_v44 = vmul.f32 %v863_v27, %v2756_v0  ;;  %vm2973_vm14 = vmor %vm831_vm9, %vm832_vm12 }
 0x132   : > { %v887_v55 = vmul.f32 %v886_v30, %v2813_v42  ;;  %v936_v56 = vmul.f32 3.8918573e-05, %v2931_v31  ;;  %v2950_v57 = vmul.f32 %v799_v6, %v2850_v13  ;;  %v534_v59 = vadd.f32 1.1283791, %v533_v18 }
 0x133   : > { %v902_v1 = vmul.f32 %v901_v33, %v2813_v42  ;;  %v618_v3 = vmul.f32 %v617_v58, %v2906_v53  ;;  %v514_v4 = vsel %vm2956_vm13, %v2854_v20, %v510_v43  ;;  %v852_v2 = vadd.f32 0.18741608, %v851_v46 }
 0x134   : > { %v2965_v13 = vadd.f32 1.0, %v584_v32  ;;  %v937_v37 = vadd.f32 0.001143296, %v936_v56  ;;  %vm2977_vm15 = vcmp.eq.f32.partialorder %v835_v17, 8.507059e+37  ;;  %v838_v10 = vor.u32 1.1754944e-38, %v837_v22 }
 0x135   : > { %v2967_v41 = vpop.eup %2125  ;;  %v571_v20 = vmul.f32 %v570_v52, %v2787_v36  ;;  %v2982_v34 = vmin.f32 %v643_v54, 16.0  ;;  %v834_v16 = vsel %vm2973_vm14, %v2863_v26, %v830_v50  ;;  %v2987_v39 = vadd.f32 1.0, %v864_v44 }
 0x136   : > { %v888_v45 = vadd.f32 0.0036580483, %v887_v55  ;;  %v605_v23 = vmul.f32 2.1237322e-06, %v2906_v53  ;;  %v519_v19 = vsel %vm2926_vm10, %v518_v7, %v514_v4  ;;  %v2993_v25 = vmul.f32 %v534_v59, %v2632_v12  ;;  %v3020_v55 = vpop.f32.mrf.mxu2 }
 0x137   : > { %v903_v6 = vadd.f32 0.4994258, %v902_v1  ;;  %v619_v17 = vadd.f32 0.014752088, %v618_v3  ;;  %v547_v24 = vmul.f32 %v2967_v41, %v2916_v48  ;;  %v853_v8 = vmul.f32 %v852_v2, %v2756_v0 }
 0x138   : > { %2127 = vrcp.f32 %v2965_v13  ;;  %v938_v26 = vmul.f32 %v937_v37, %v2931_v31  ;;  %v839_v35 = vsel %vm2977_vm15, %v838_v10, %v834_v16  ;;  %v572_v27 = vadd.f32 0.18741608, %v571_v20 }
 0x139   : > { %v620_v7 = vmul.f32 %v619_v17, %v2906_v53  ;;  %v656_v12 = vmul.f32 3.8918573e-05, %v2982_v34  ;;  %2129 = vrcp.f32 %v2987_v39  ;;  %v889_v29 = vmul.f32 %v888_v45, %v2813_v42 }
 0x13a   : > { %v606_v30 = vadd.f32 0.00028619796, %v605_v23  ;;  %v939_v18 = vadd.f32 0.014752088, %v938_v26  ;;  %v3007_v0 = vmul.f32 %v519_v19, %v2884_v11  ;;  %v904_v33 = vmul.f32 %v903_v6, %v2813_v42 }
 0x13b   : > { %v621_v43 = vadd.f32 0.112945676, %v620_v7  ;;  %v657_v22 = vadd.f32 0.001143296, %v656_v12  ;;  %v3011_v46 = vmul.f32 %v839_v35, %v2914_v21  ;;  %v548_v32 = vsub.f32 1.0, %v547_v24 }
 0x13c   : > { %v555_v52 = vand.u32 2147483647, %v2916_v48  ;;  %v645_v58 = vmul.f32 2.1237322e-06, %v2982_v34  ;;  %v557_v54 = vand.u32 2147483648, %v2916_v48  ;;  %v573_v44 = vmul.f32 %v572_v27, %v2787_v36 }
 0x13d   : > { %v3016_v50 = vadd.f32 1.1283791, %v853_v8  ;;  %v622_v11 = vmul.f32 %v621_v43, %v2906_v53  ;;  %vm551_vm0 = vweird.f32 %v2916_v48  ;;  %v890_v21 = vadd.f32 0.05243302, %v889_v29 }
 0x13e   : > { %v3022_v56 = vpop.eup %2127  ;;  %v607_v61 = vmul.f32 %v606_v30, %v2906_v53  ;;  %v940_v59 = vmul.f32 %v939_v18, %v2931_v31  ;;  %v658_v1 = vmul.f32 %v657_v22, %v2982_v34  ;;  %v3028_v3 = vadd.f32 1.0, %v904_v33 }
 0x13f   : > { %v623_v4 = vadd.f32 0.4994258, %v622_v11  ;;  %v1933_v36 = vclamps-f32 %v2690_v63, 1.0  ;;  %v1934_v2 = vclamps-f32 %v2790_v15, 1.0  ;;  %v3032_v37 = vpop.eup %2129  ;;  %v549_v28 = vmul.f32 %v2967_v41, %v548_v32 }
 0x140   : > { %v646_v38 = vadd.f32 0.00028619796, %v645_v58  ;;  %v659_v10 = vadd.f32 0.014752088, %v658_v1  ;;  %v963_v20 = vmul.f32 %v3020_v55, %v3020_v55  ;;  %v3037_v16 = vor.u32 1.1754944e-38, %v557_v54 }
 0x141   : > { %v574_v45 = vadd.f32 1.1283791, %v573_v44  ;;  %v587_v23 = vmul.f32 %v3022_v56, %v2965_v13  ;;  %v1003_v19 = vpack.c.bf16 %v1934_v2, %v1933_v36  ;;  %v891_v63 = vmul.f32 %v890_v21, %v2813_v42 }
 0x142   : > { %v624_v15 = vmul.f32 %v623_v4, %v2906_v53  ;;  %v941_v6 = vadd.f32 0.112945676, %v940_v59  ;;  %v660_v17 = vmul.f32 %v659_v10, %v2982_v34  ;;  %vm552_vm1 = vweird.f32 %v2967_v41 }
 0x143   : > { %v867_v24 = vmul.f32 %v3032_v37, %v2987_v39  ;;  %2131 = vrcp.f32 %v3028_v3  ;;  %v608_v8 = vadd.f32 0.0036580483, %v607_v61  ;;  %1083 = vmatmul.bf16.vlgmr.msra.gmra.mxu1 %v1003_v19  ;;  %v550_v26 = vadd.f32 %v2967_v41, %v549_v28  ;;  %vm3069_vm3 = vmor %vm551_vm0, %vm552_vm1 }
 0x144   : > { %v647_v35 = vmul.f32 %v646_v38, %v2982_v34  ;;  %v661_v27 = vadd.f32 0.112945676, %v660_v17  ;;  %v3050_v7 = vmin.f32 %v963_v20, 16.0  ;;  %v875_v12 = vand.u32 2147483647, %v2987_v39 }
 0x145   : > { %v877_v29 = vand.u32 2147483648, %v2987_v39  ;;  %v588_v30 = vsub.f32 1.0, %v587_v23  ;;  %v925_v18 = vmul.f32 2.1237322e-06, %v2931_v31  ;;  %vm3055_vm2 = vcmp.eq.f32.partialorder %v555_v52, 8.507059e+37 }
 0x146   : > { %v3060_v43 = vmul.f32 %v574_v45, %v2744_v40  ;;  %v892_v22 = vadd.f32 0.18741608, %v891_v63  ;;  %v3062_v32 = vadd.f32 1.0, %v624_v15  ;;  %v942_v58 = vmul.f32 %v941_v6, %v2931_v31 }
 0x147   : > { %v868_v52 = vsub.f32 1.0, %v867_v24  ;;  %vm591_vm4 = vweird.f32 %v2965_v13  ;;  %v609_v44 = vmul.f32 %v608_v8, %v2906_v53  ;;  %v662_v40 = vmul.f32 %v661_v27, %v2982_v34 }
 0x148   : > { %v554_v11 = vsel %vm3069_vm3, %v2967_v41, %v550_v26  ;;  %v595_v21 = vand.u32 2147483647, %v2965_v13  ;;  %v648_v61 = vadd.f32 0.0036580483, %v647_v35  ;;  %v976_v48 = vmul.f32 3.8918573e-05, %v3050_v7 }
 0x149   : > { %v3081_v59 = vpop.eup %2131  ;;  %vm872_vm5 = vweird.f32 %v3032_v37  ;;  %v589_v1 = vmul.f32 %v3022_v56, %v588_v30  ;;  %v597_v4 = vand.u32 2147483648, %v2965_v13  ;;  %v926_v36 = vadd.f32 0.00028619796, %v925_v18 }
 0x14a   : > { %v663_v2 = vadd.f32 0.4994258, %v662_v40  ;;  %2133 = vrcp.f32 %v3062_v32  ;;  %v943_v28 = vadd.f32 0.4994258, %v942_v58  ;;  %v965_v41 = vmul.f32 2.1237322e-06, %v3050_v7 }
 0x14b   : > { %v1942_v38 = vclamps-f32 %v2816_v51, 1.0  ;;  %v869_v10 = vmul.f32 %v3032_v37, %v868_v52  ;;  %vm871_vm6 = vweird.f32 %v2987_v39  ;;  %v610_v20 = vadd.f32 0.05243302, %v609_v44 }
 0x14c   : > { %v664_v45 = vmul.f32 %v663_v2, %v2982_v34  ;;  %v977_v23 = vadd.f32 0.001143296, %v976_v48  ;;  %vm592_vm7 = vweird.f32 %v3022_v56  ;;  %v907_v19 = vmul.f32 %v3081_v59, %v3028_v3  ;;  %vm3140_vm10 = vmor %vm871_vm6, %vm872_vm5 }
 0x14d   : > { %v649_v63 = vmul.f32 %v648_v61, %v2982_v34  ;;  %v1941_v15 = vclamps-f32 %v2766_v60, 1.0  ;;  %v590_v6 = vadd.f32 %v3022_v56, %v589_v1  ;;  %v927_v51 = vmul.f32 %v926_v36, %v2931_v31  ;;  %vm3116_vm8 = vmor %vm591_vm4, %vm592_vm7 }
 0x14e   : > { %v3099_v17 = vadd.f32 1.0, %v664_v45  ;;  %v978_v24 = vmul.f32 %v977_v23, %v3050_v7  ;;  %v944_v8 = vmul.f32 %v943_v28, %v2931_v31  ;;  %v966_v26 = vadd.f32 0.00028619796, %v965_v41 }
 0x14f   : > { %v1007_v35 = vpack.c.bf16 %v1942_v38, %v1941_v15  ;;  %v1936_v27 = vclamps-f32 %v3007_v0, 1.0  ;;  %v559_v30 = vsel %vm3055_vm2, %v3037_v16, %v554_v11  ;;  %v893_v60 = vmul.f32 %v892_v22, %v2813_v42 }
 0x150   : > { %2135 = vrcp.f32 %v3099_v17  ;;  %v1935_v18 = vclamps-f32 %v2881_v49, 1.0  ;;  %v3110_v58 = vpop.eup %2133  ;;  %v598_v0 = vor.u32 1.1754944e-38, %v597_v4  ;;  %v908_v52 = vsub.f32 1.0, %v907_v19 }
 0x151   : > { %v650_v33 = vadd.f32 0.05243302, %v649_v63  ;;  %v979_v16 = vadd.f32 0.014752088, %v978_v24  ;;  %1103 = vmatmul.bf16.vlgmr.msra.gmra.mxu3 %v1007_v35  ;;  %v3121_v42 = vadd.f32 %v3032_v37, %v869_v10  ;;  %v594_v49 = vsel %vm3116_vm8, %v3022_v56, %v590_v6 }
 0x152   : > { %v611_v22 = vmul.f32 %v610_v20, %v2906_v53  ;;  %v1004_v44 = vpack.c.bf16 %v1936_v27, %v1935_v18  ;;  %v928_v13 = vadd.f32 0.0036580483, %v927_v51  ;;  %v3127_v40 = vadd.f32 1.0, %v944_v8 }
 0x153   : > { %v967_v11 = vmul.f32 %v966_v26, %v3050_v7  ;;  %v980_v61 = vmul.f32 %v979_v16, %v3050_v7  ;;  %v560_v48 = vmul.f32 %v559_v30, %v2993_v25  ;;  %vm596_vm9 = vcmp.eq.f32.partialorder %v595_v21, 8.507059e+37 }
 0x154   : > { %v3132_v1 = vadd.f32 1.1283791, %v893_v60  ;;  %v627_v4 = vmul.f32 %v3110_v58, %v3062_v32  ;;  %1088 = vmatmul.bf16.gmra.mxu1 %v1004_v44  ;;  %v599_v36 = vsel %vm596_vm9, %v598_v0, %v594_v49  ;;  %v909_v2 = vmul.f32 %v3081_v59, %v908_v52 }
 0x155   : > { %v651_v25 = vmul.f32 %v650_v33, %v2982_v34  ;;  %v981_v21 = vadd.f32 0.112945676, %v980_v61  ;;  %v874_v41 = vsel %vm3140_vm10, %v3032_v37, %v3121_v42  ;;  %v915_v38 = vand.u32 2147483647, %v3028_v3 }
 0x156   : > { %v3146_v28 = vpop.eup %2135  ;;  %v917_v10 = vand.u32 2147483648, %v3028_v3  ;;  %v612_v20 = vadd.f32 0.18741608, %v611_v22  ;;  %v929_v45 = vmul.f32 %v928_v13, %v2931_v31  ;;  %2137 = vrcp.f32 %v3127_v40 }
 0x157   : > { %v667_v23 = vmul.f32 %v3146_v28, %v3099_v17  ;;  %v968_v19 = vadd.f32 0.0036580483, %v967_v11  ;;  %v600_v63 = vmul.f32 %v599_v36, %v3060_v43  ;;  %vm912_vm11 = vweird.f32 %v3081_v59 }
 0x158   : > { %v628_v15 = vsub.f32 1.0, %v627_v4  ;;  %v982_v37 = vmul.f32 %v981_v21, %v3050_v7  ;;  %v910_v6 = vadd.f32 %v3081_v59, %v909_v2  ;;  %v652_v51 = vadd.f32 0.18741608, %v651_v25 }
 0x159   : > { %v668_v24 = vsub.f32 1.0, %v667_v23  ;;  %v1944_v8 = vclamps-f32 %v3011_v46, 1.0  ;;  %vm3165_vm12 = vcmp.eq.f32.partialorder %v875_v12, 8.507059e+37  ;;  %vm911_vm13 = vweird.f32 %v3028_v3 }
 0x15a   : > { %vm3170_vm14 = vcmp.eq.f32.partialorder %v915_v38, 8.507059e+37  ;;  %v918_v35 = vor.u32 1.1754944e-38, %v917_v10  ;;  %v983_v27 = vadd.f32 0.4994258, %v982_v37  ;;  %v613_v30 = vmul.f32 %v612_v20, %v2906_v53  ;;  %vm3180_vm15 = vmor %vm911_vm13, %vm912_vm11 }
 0x15b   : > { %v669_v60 = vmul.f32 %v3146_v28, %v668_v24  ;;  %v969_v46 = vmul.f32 %v968_v19, %v3050_v7  ;;  %v1943_v18 = vclamps-f32 %v2950_v57, 1.0  ;;  %v629_v3 = vmul.f32 %v3110_v58, %v628_v15 }
 0x15c   : > { %v930_v54 = vadd.f32 0.05243302, %v929_v45  ;;  %v984_v0 = vmul.f32 %v983_v27, %v3050_v7  ;;  %v1938_v52 = vclamps-f32 %v600_v63, 1.0  ;;  %v3186_v33 = vpop.eup %2137  ;;  %v914_v53 = vsel %vm3180_vm15, %v3081_v59, %v910_v6 }
 0x15d   : > { %vm632_vm0 = vweird.f32 %v3110_v58  ;;  %v653_v57 = vmul.f32 %v652_v51, %v2982_v34  ;;  %v1008_v16 = vpack.c.bf16 %v1944_v8, %v1943_v18  ;;  %v670_v42 = vadd.f32 %v3146_v28, %v669_v60 }
 0x15e   : > { %vm672_vm1 = vweird.f32 %v3146_v28  ;;  %v3195_v49 = vadd.f32 1.0, %v984_v0  ;;  %v1937_v22 = vclamps-f32 %v560_v48, 1.0  ;;  %vm671_vm2 = vweird.f32 %v3099_v17 }
 0x15f   : > { %v675_v44 = vand.u32 2147483647, %v3099_v17  ;;  %v677_v13 = vand.u32 2147483648, %v3099_v17  ;;  %v970_v11 = vadd.f32 0.05243302, %v969_v46  ;;  %v630_v59 = vadd.f32 %v3110_v58, %v629_v3  ;;  %vm3212_vm3 = vmor %vm671_vm2, %vm672_vm1 }
 0x160   : > { %v947_v34 = vmul.f32 %v3186_v33, %v3127_v40  ;;  %2139 = vrcp.f32 %v3195_v49  ;;  %v1005_v61 = vpack.c.bf16 %v1938_v52, %v1937_v22  ;;  %v878_v4 = vor.u32 1.1754944e-38, %v877_v29 }
 0x161   : > { %v919_v48 = vsel %vm3170_vm14, %v918_v35, %v914_v53  ;;  %v637_v56 = vand.u32 2147483648, %v3062_v32  ;;  %v931_v36 = vmul.f32 %v930_v54, %v2931_v31  ;;  %1108 = vmatmul.bf16.gmra.mxu3 %v1008_v16  ;;  %vm631_vm4 = vweird.f32 %v3062_v32 }
 0x162   : > { %v635_v2 = vand.u32 2147483647, %v3062_v32  ;;  %v654_v39 = vadd.f32 1.1283791, %v653_v57  ;;  %v674_v29 = vsel %vm3212_vm3, %v3146_v28, %v670_v42  ;;  %v879_v25 = vsel %vm3165_vm12, %v878_v4, %v874_v41  ;;  %vm3227_vm5 = vmor %vm631_vm4, %vm632_vm0 }
 0x163   : > { %v895_v21 = vmul.f32 %v3132_v1, %v2779_v5  ;;  %v678_v10 = vor.u32 1.1754944e-38, %v677_v13  ;;  %v971_v32 = vmul.f32 %v970_v11, %v3050_v7  ;;  %v614_v20 = vadd.f32 1.1283791, %v613_v30 }
 0x164   : > { %v634_v28 = vsel %vm3227_vm5, %v3110_v58, %v630_v59  ;;  %v948_v45 = vsub.f32 1.0, %v947_v34  ;;  %vm676_vm6 = vcmp.eq.f32.partialorder %v675_v44, 8.507059e+37  ;;  %1093 = vmatmul.bf16.gmra.mxu1 %v1005_v61  ;;  %v855_v5 = vmul.f32 %v3016_v50, %v2696_v9 }
 0x165   : > { %v920_v1 = vmul.f32 %v919_v48, %v895_v21  ;;  %v638_v41 = vor.u32 1.1754944e-38, %v637_v56  ;;  %v679_v23 = vsel %vm676_vm6, %v678_v10, %v674_v29  ;;  %vm636_vm7 = vcmp.eq.f32.partialorder %v635_v2, 8.507059e+37 }
 0x166   : > { %v2140_v19 = vpop.eup %2139  ;;  %v932_v63 = vadd.f32 0.18741608, %v931_v36  ;;  %v655_v15 = vmul.f32 %v654_v39, %v2933_v14  ;;  %v880_v37 = vmul.f32 %v879_v25, %v855_v5  ;;  %v972_v51 = vadd.f32 0.18741608, %v971_v32 }
 0x167   : > { %v639_v6 = vsel %vm636_vm7, %v638_v41, %v634_v28  ;;  %v987_v24 = vmul.f32 %v2140_v19, %v3195_v49  ;;  %v615_v58 = vmul.f32 %v614_v20, %v2861_v47  ;;  %v949_v8 = vmul.f32 %v3186_v33, %v948_v45 }
 0x168   : > { %v680_v26 = vmul.f32 %v679_v23, %v655_v15  ;;  %v1946_v9 = vclamps-f32 %v920_v1, 1.0  ;;  %v933_v35 = vmul.f32 %v932_v63, %v2931_v31  ;;  %v973_v27 = vmul.f32 %v972_v51, %v3050_v7 }
 0x169   : > { %v988_v43 = vsub.f32 1.0, %v987_v24  ;;  %v640_v50 = vmul.f32 %v639_v6, %v615_v58  ;;  %vm992_vm8 = vweird.f32 %v2140_v19  ;;  %v1945_v14 = vclamps-f32 %v880_v37, 1.0 }
 0x16a   : > { %v950_v60 = vadd.f32 %v3186_v33, %v949_v8  ;;  %vm952_vm9 = vweird.f32 %v3186_v33  ;;  %v1940_v46 = vclamps-f32 %v680_v26, 1.0  ;;  %v997_v47 = vand.u32 2147483648, %v3195_v49 }
 0x16b   : > { %v989_v30 = vmul.f32 %v2140_v19, %v988_v43  ;;  %vm991_vm10 = vweird.f32 %v3195_v49  ;;  %v995_v12 = vand.u32 2147483647, %v3195_v49  ;;  %v1009_v3 = vpack.c.bf16 %v1946_v9, %v1945_v14 }
 0x16c   : > { %v957_v31 = vand.u32 2147483648, %v3127_v40  ;;  %vm993_vm11 = vmor %vm991_vm10, %vm992_vm8  ;;  %v1939_v7 = vclamps-f32 %v640_v50, 1.0  ;;  %vm951_vm12 = vweird.f32 %v3127_v40  ;;  %v955_v54 = vand.u32 2147483647, %v3127_v40 }
 0x16d   : > { %v990_v18 = vadd.f32 %v2140_v19, %v989_v30  ;;  %v974_v0 = vadd.f32 1.1283791, %v973_v27  ;;  %vm953_vm13 = vmor %vm951_vm12, %vm952_vm9  ;;  %v998_v53 = vor.u32 1.1754944e-38, %v997_v47  ;;  %v934_v16 = vadd.f32 1.1283791, %v933_v35 }
 0x16e   : > { %v1006_v57 = vpack.c.bf16 %v1940_v46, %v1939_v7  ;;  %v954_v42 = vsel %vm953_vm13, %v3186_v33, %v950_v60  ;;  %vm996_vm14 = vcmp.eq.f32.partialorder %v995_v12, 8.507059e+37  ;;  %v958_v49 = vor.u32 1.1754944e-38, %v957_v31 }
 0x16f   : > { %v994_v52 = vsel %vm993_vm11, %v2140_v19, %v990_v18  ;;  %vm956_vm15 = vcmp.eq.f32.partialorder %v955_v54, 8.507059e+37  ;;  %v975_v44 = vmul.f32 %v974_v0, %v3020_v55  ;;  %v935_v11 = vmul.f32 %v934_v16, %v2890_v62 }
 0x170   : > { %v999_v22 = vsel %vm996_vm14, %v998_v53, %v994_v52  ;;  %v959_v13 = vsel %vm956_vm15, %v958_v49, %v954_v42 }
 0x171   : > { %1113 = vmatmul.bf16.gmra.mxu3 %v1009_v3  ;;  %v1000_v40 = vmul.f32 %v999_v22, %v975_v44  ;;  %v960_v59 = vmul.f32 %v959_v13, %v935_v11 }
 0x173   : > { %v1948_v34 = vclamps-f32 %v1000_v40, 1.0  ;;  %v1947_v61 = vclamps-f32 %v960_v59, 1.0 }
 0x174   : > { %1098 = vmatmul.bf16.gmra.mxu1 %v1006_v57 }
 0x175   : > { %v1010_v4 = vpack.c.bf16 %v1948_v34, %v1947_v61 }
 0x181   : > { %1118 = vmatmul.bf16.gmra.mxu3 %v1010_v4 }
 0x1c0   : > { %v1084_v48 = vpop.f32.mrf.mxu1 }
 0x1c1   : > { %v1124_v56 = vmul.f32 %v1084_v48, %v1084_v48 }
 0x1c3   : > { %v1125_v33 = vmin.f32 %v1124_v56, 16.0 }
 0x1c5   : > { %v1126_v36 = vmul.f32 2.1237322e-06, %v1125_v33  ;;  %v1137_v17 = vmul.f32 3.8918573e-05, %v1125_v33 }
 0x1c7   : > { %v1127_v2 = vadd.f32 0.00028619796, %v1126_v36  ;;  %v1138_v39 = vadd.f32 0.001143296, %v1137_v17 }
 0x1c8   : > { %v3254_v29 = vpop.f32.mrf.mxu1 }
 0x1c9   : > { %v1128_v55 = vmul.f32 %v1127_v2, %v1125_v33  ;;  %v1139_v25 = vmul.f32 %v1138_v39, %v1125_v33  ;;  %v1164_v62 = vmul.f32 %v3254_v29, %v3254_v29 }
 0x1cb   : > { %v1129_v21 = vadd.f32 0.0036580483, %v1128_v55  ;;  %v1140_v38 = vadd.f32 0.014752088, %v1139_v25  ;;  %v1165_v10 = vmin.f32 %v1164_v62, 16.0 }
 0x1cd   : > { %v1130_v32 = vmul.f32 %v1129_v21, %v1125_v33  ;;  %v1141_v20 = vmul.f32 %v1140_v38, %v1125_v33  ;;  %v1166_v28 = vmul.f32 2.1237322e-06, %v1165_v10  ;;  %v1177_v45 = vmul.f32 3.8918573e-05, %v1165_v10 }
 0x1cf   : > { %v1131_v5 = vadd.f32 0.05243302, %v1130_v32  ;;  %v1142_v1 = vadd.f32 0.112945676, %v1141_v20  ;;  %v1167_v41 = vadd.f32 0.00028619796, %v1166_v28 }
 0x1d0   : > { %v1178_v23 = vadd.f32 0.001143296, %v1177_v45 }
 0x1d1   : > { %v3258_v19 = vpop.f32.mrf.mxu1  ;;  %v1132_v63 = vmul.f32 %v1131_v5, %v1125_v33  ;;  %v1143_v15 = vmul.f32 %v1142_v1, %v1125_v33  ;;  %v1168_v37 = vmul.f32 %v1167_v41, %v1165_v10 }
 0x1d2   : > { %v1204_v6 = vmul.f32 %v3258_v19, %v3258_v19  ;;  %v1179_v51 = vmul.f32 %v1178_v23, %v1165_v10 }
 0x1d3   : > { %v1133_v24 = vadd.f32 0.18741608, %v1132_v63  ;;  %v1144_v58 = vadd.f32 0.4994258, %v1143_v15  ;;  %v1169_v8 = vadd.f32 0.0036580483, %v1168_v37 }
 0x1d4   : > { %v3262_v26 = vpop.f32.mrf.mxu3  ;;  %v1180_v43 = vadd.f32 0.014752088, %v1179_v51  ;;  %v3266_v50 = vmin.f32 %v1204_v6, 16.0 }
 0x1d5   : > { %v1444_v9 = vmul.f32 %v3262_v26, %v3262_v26  ;;  %v1145_v35 = vmul.f32 %v1144_v58, %v1125_v33  ;;  %v1170_v27 = vmul.f32 %v1169_v8, %v1165_v10  ;;  %v1134_v30 = vmul.f32 %v1133_v24, %v1125_v33 }
 0x1d6   : > { %v1181_v14 = vmul.f32 %v1180_v43, %v1165_v10  ;;  %v1206_v18 = vmul.f32 2.1237322e-06, %v3266_v50  ;;  %v1217_v7 = vmul.f32 3.8918573e-05, %v3266_v50 }
 0x1d7   : > { %v3268_v60 = vmin.f32 %v1444_v9, 16.0  ;;  %v1146_v46 = vadd.f32 1.0, %v1145_v35  ;;  %v1171_v47 = vadd.f32 0.05243302, %v1170_v27  ;;  %v1135_v54 = vadd.f32 1.1283791, %v1134_v30 }
 0x1d8   : > { %v1182_v12 = vadd.f32 0.112945676, %v1181_v14  ;;  %v1207_v16 = vadd.f32 0.00028619796, %v1206_v18  ;;  %v1218_v40 = vadd.f32 0.001143296, %v1217_v7 }
 0x1d9   : > { %v1446_v3 = vmul.f32 2.1237322e-06, %v3268_v60  ;;  %v1457_v31 = vmul.f32 3.8918573e-05, %v3268_v60  ;;  %2141 = vrcp.f32 %v1146_v46  ;;  %v1172_v0 = vmul.f32 %v1171_v47, %v1165_v10  ;;  %v3282_v55 = vpop.f32.mrf.mxu1 }
 0x1da   : > { %v1183_v52 = vmul.f32 %v1182_v12, %v1165_v10  ;;  %v1208_v11 = vmul.f32 %v1207_v16, %v3266_v50  ;;  %v1136_v34 = vmul.f32 %v1135_v54, %v1084_v48  ;;  %v1156_v61 = vand.u32 2147483647, %v1146_v46 }
 0x1db   : > { %v1447_v53 = vadd.f32 0.00028619796, %v1446_v3  ;;  %v1458_v57 = vadd.f32 0.001143296, %v1457_v31  ;;  %v1173_v49 = vadd.f32 0.18741608, %v1172_v0  ;;  %v1219_v39 = vmul.f32 %v1218_v40, %v3266_v50 }
 0x1dc   : > { %v3274_v42 = vpop.f32.mrf.mxu3  ;;  %v1184_v22 = vadd.f32 0.4994258, %v1183_v52  ;;  %v1209_v2 = vadd.f32 0.0036580483, %v1208_v11  ;;  %v1158_v62 = vand.u32 2147483648, %v1146_v46  ;;  %vm1152_vm0 = vweird.f32 %v1146_v46 }
 0x1dd   : > { %v1448_v44 = vmul.f32 %v1447_v53, %v3268_v60  ;;  %v1459_v13 = vmul.f32 %v1458_v57, %v3268_v60  ;;  %v1484_v59 = vmul.f32 %v3274_v42, %v3274_v42  ;;  %v1174_v36 = vmul.f32 %v1173_v49, %v1165_v10 }
 0x1de   : > { %v1185_v4 = vmul.f32 %v1184_v22, %v1165_v10  ;;  %v1210_v20 = vmul.f32 %v1209_v2, %v3266_v50  ;;  %v1220_v28 = vadd.f32 0.014752088, %v1219_v39  ;;  %v1244_v45 = vmul.f32 %v3282_v55, %v3282_v55 }
 0x1df   : > { %v1449_v56 = vadd.f32 0.0036580483, %v1448_v44  ;;  %v2142_v33 = vpop.eup %2141  ;;  %v1460_v17 = vadd.f32 0.014752088, %v1459_v13  ;;  %v3286_v38 = vmin.f32 %v1484_v59, 16.0  ;;  %vm3296_vm2 = vcmp.eq.f32.partialorder %v1156_v61, 8.507059e+37 }
 0x1e0   : > { %v1148_v25 = vmul.f32 %v2142_v33, %v1146_v46  ;;  %v3284_v21 = vadd.f32 1.0, %v1185_v4  ;;  %vm1153_vm1 = vweird.f32 %v2142_v33  ;;  %v1175_v5 = vadd.f32 1.1283791, %v1174_v36 }
 0x1e1   : > { %v1450_v32 = vmul.f32 %v1449_v56, %v3268_v60  ;;  %v1461_v48 = vmul.f32 %v1460_v17, %v3268_v60  ;;  %v1221_v41 = vmul.f32 %v1220_v28, %v3266_v50  ;;  %v1211_v15 = vadd.f32 0.05243302, %v1210_v20  ;;  %vm1154_vm3 = vmor %vm1152_vm0, %vm1153_vm1 }
 0x1e2   : > { %v1149_v10 = vsub.f32 1.0, %v1148_v25  ;;  %2143 = vrcp.f32 %v3284_v21  ;;  %v1486_v37 = vmul.f32 2.1237322e-06, %v3286_v38  ;;  %v1159_v51 = vor.u32 1.1754944e-38, %v1158_v62 }
 0x1e3   : > { %v1451_v1 = vadd.f32 0.05243302, %v1450_v32  ;;  %v1462_v63 = vadd.f32 0.112945676, %v1461_v48  ;;  %v1222_v58 = vadd.f32 0.112945676, %v1221_v41  ;;  %v1212_v9 = vmul.f32 %v1211_v15, %v3266_v50 }
 0x1e4   : > { %v1150_v23 = vmul.f32 %v2142_v33, %v1149_v10  ;;  %v1487_v35 = vadd.f32 0.00028619796, %v1486_v37  ;;  %v1176_v27 = vmul.f32 %v1175_v5, %v3254_v29  ;;  %v3307_v47 = vmin.f32 %v1244_v45, 16.0 }
 0x1e5   : > { %v1452_v24 = vmul.f32 %v1451_v1, %v3268_v60  ;;  %v1463_v43 = vmul.f32 %v1462_v63, %v3268_v60  ;;  %v1223_v14 = vmul.f32 %v1222_v58, %v3266_v50  ;;  %v1196_v3 = vand.u32 2147483647, %v3284_v21 }
 0x1e6   : > { %v1151_v8 = vadd.f32 %v2142_v33, %v1150_v23  ;;  %v1488_v7 = vmul.f32 %v1487_v35, %v3286_v38  ;;  %v1213_v0 = vadd.f32 0.18741608, %v1212_v9  ;;  %v1497_v29 = vmul.f32 3.8918573e-05, %v3286_v38 }
 0x1e7   : > { %v1453_v30 = vadd.f32 0.18741608, %v1452_v24  ;;  %v1464_v31 = vadd.f32 0.4994258, %v1463_v43  ;;  %v1224_v16 = vadd.f32 0.4994258, %v1223_v14  ;;  %vm1192_vm5 = vweird.f32 %v3284_v21 }
 0x1e8   : > { %v2144_v18 = vpop.eup %2143  ;;  %v1155_v12 = vsel %vm1154_vm3, %v2142_v33, %v1151_v8  ;;  %v1198_v22 = vand.u32 2147483648, %v3284_v21  ;;  %v1489_v44 = vadd.f32 0.0036580483, %v1488_v7  ;;  %v1246_v13 = vmul.f32 2.1237322e-06, %v3307_v47 }
 0x1e9   : > { %v1160_v54 = vsel %vm3296_vm2, %v1159_v51, %v1155_v12  ;;  %v1188_v46 = vmul.f32 %v2144_v18, %v3284_v21  ;;  %v1454_v53 = vmul.f32 %v1453_v30, %v3268_v60  ;;  %v1465_v57 = vmul.f32 %v1464_v31, %v3268_v60  ;;  %v3324_v60 = vpop.f32.mrf.mxu3 }
 0x1ea   : > { %v1161_v52 = vmul.f32 %v1160_v54, %v1136_v34  ;;  %vm1193_vm4 = vweird.f32 %v2144_v18  ;;  %v1225_v59 = vmul.f32 %v1224_v16, %v3266_v50  ;;  %v1214_v34 = vmul.f32 %v1213_v0, %v3266_v50 }
 0x1eb   : > { %v1189_v49 = vsub.f32 1.0, %v1188_v46  ;;  %v3319_v40 = vadd.f32 1.0, %v1465_v57  ;;  %v1490_v4 = vmul.f32 %v1489_v44, %v3286_v38  ;;  %v1498_v56 = vadd.f32 0.001143296, %v1497_v29  ;;  %vm1194_vm7 = vmor %vm1192_vm5, %vm1193_vm4 }
 0x1ec   : > { %v1981_v11 = vclamps-f32 %v1161_v52, 1.0  ;;  %vm3332_vm6 = vcmp.eq.f32.partialorder %v1196_v3, 8.507059e+37  ;;  %v1455_v36 = vadd.f32 1.1283791, %v1454_v53  ;;  %v1199_v17 = vor.u32 1.1754944e-38, %v1198_v22 }
 0x1ed   : > { %v1190_v61 = vmul.f32 %v2144_v18, %v1189_v49  ;;  %2145 = vrcp.f32 %v3319_v40  ;;  %v3337_v2 = vadd.f32 1.0, %v1225_v59  ;;  %v1491_v39 = vadd.f32 0.05243302, %v1490_v4 }
 0x1ee   : > { %1764 = vst [vmem:[%s3328_s18] sm:$0xff] %v1981_v11  ;;  %v1478_v25 = vand.u32 2147483648, %v3319_v40  ;;  %v1499_v62 = vmul.f32 %v1498_v56, %v3286_v38  ;;  %v1247_v32 = vadd.f32 0.00028619796, %v1246_v13  ;;  %v1524_v21 = vmul.f32 %v3324_v60, %v3324_v60 }
 0x1ef   : > { %v1191_v50 = vadd.f32 %v2144_v18, %v1190_v61  ;;  %v1476_v20 = vand.u32 2147483647, %v3319_v40  ;;  %v3345_v28 = vadd.f32 1.1283791, %v1214_v34  ;;  %2147 = vrcp.f32 %v3337_v2 }
 0x1f0   : > { %v1456_v45 = vmul.f32 %v1455_v36, %v3262_v26  ;;  %v1492_v5 = vmul.f32 %v1491_v39, %v3286_v38  ;;  %v1500_v1 = vadd.f32 0.014752088, %v1499_v62  ;;  %vm1472_vm8 = vweird.f32 %v3319_v40 }
 0x1f1   : > { %v1195_v48 = vsel %vm1194_vm7, %v2144_v18, %v1191_v50  ;;  %v1238_v23 = vand.u32 2147483648, %v3337_v2  ;;  %v1248_v63 = vmul.f32 %v1247_v32, %v3307_v47  ;;  %v1257_v15 = vmul.f32 3.8918573e-05, %v3307_v47 }
 0x1f2   : > { %v1200_v10 = vsel %vm3332_vm6, %v1199_v17, %v1195_v48  ;;  %v1479_v6 = vor.u32 1.1754944e-38, %v1478_v25  ;;  %v1236_v51 = vand.u32 2147483647, %v3337_v2  ;;  %v1501_v24 = vmul.f32 %v1500_v1, %v3286_v38 }
 0x1f3   : > { %v1201_v41 = vmul.f32 %v1200_v10, %v1176_v27  ;;  %v2146_v37 = vpop.eup %2145  ;;  %v3358_v26 = vmin.f32 %v1524_v21, 16.0  ;;  %vm3361_vm9 = vcmp.eq.f32.partialorder %v1476_v20, 8.507059e+37  ;;  %v1493_v9 = vadd.f32 0.18741608, %v1492_v5  ;;  %v3365_v27 = vpop.f32.mrf.mxu1 }
 0x1f4   : > { %v1468_v8 = vmul.f32 %v2146_v37, %v3319_v40  ;;  %v1249_v35 = vadd.f32 0.0036580483, %v1248_v63  ;;  %vm1232_vm10 = vweird.f32 %v3337_v2  ;;  %v1502_v30 = vadd.f32 0.112945676, %v1501_v24 }
 0x1f5   : > { %v1982_v58 = vclamps-f32 %v1201_v41, 1.0  ;;  %v1258_v14 = vadd.f32 0.001143296, %v1257_v15  ;;  %v1526_v18 = vmul.f32 2.1237322e-06, %v3358_v26  ;;  %v2148_v12 = vpop.eup %2147  ;;  %v1239_v31 = vor.u32 1.1754944e-38, %v1238_v23  ;;  %v3399_v15 = vpop.f32.mrf.mxu3 }
 0x1f6   : > { %v1469_v3 = vsub.f32 1.0, %v1468_v8  ;;  %v1250_v7 = vmul.f32 %v1249_v35, %v3307_v47  ;;  %v1537_v54 = vmul.f32 3.8918573e-05, %v3358_v26  ;;  %vm1473_vm11 = vweird.f32 %v2146_v37 }
 0x1f7   : > { %1765 = vst [vmem:[%s3328_s18 + $0x8] sm:$0xff] %v1982_v58  ;;  %v1228_v46 = vmul.f32 %v2148_v12, %v3337_v2  ;;  %v1503_v0 = vmul.f32 %v1502_v30, %v3286_v38  ;;  %v1284_v29 = vmul.f32 %v3365_v27, %v3365_v27  ;;  %v1259_v57 = vmul.f32 %v1258_v14, %v3307_v47  ;;  %vm1474_vm12 = vmor %vm1472_vm8, %vm1473_vm11 }
 0x1f8   : > { %v1470_v52 = vmul.f32 %v2146_v37, %v1469_v3  ;;  %v1251_v53 = vadd.f32 0.05243302, %v1250_v7  ;;  %v1527_v16 = vadd.f32 0.00028619796, %v1526_v18  ;;  %v1494_v22 = vmul.f32 %v1493_v9, %v3286_v38 }
 0x1f9   : > { %v1229_v49 = vsub.f32 1.0, %v1228_v46  ;;  %v1504_v44 = vadd.f32 0.4994258, %v1503_v0  ;;  %v1538_v13 = vadd.f32 0.001143296, %v1537_v54  ;;  %vm1233_vm13 = vweird.f32 %v2148_v12 }
 0x1fa   : > { %v1471_v11 = vadd.f32 %v2146_v37, %v1470_v52  ;;  %v1252_v59 = vmul.f32 %v1251_v53, %v3307_v47  ;;  %v1260_v61 = vadd.f32 0.014752088, %v1259_v57  ;;  %v1528_v34 = vmul.f32 %v1527_v16, %v3358_v26  ;;  %vm1234_vm14 = vmor %vm1232_vm10, %vm1233_vm13 }
 0x1fb   : > { %v1230_v4 = vmul.f32 %v2148_v12, %v1229_v49  ;;  %v1505_v56 = vmul.f32 %v1504_v44, %v3286_v38  ;;  %v1539_v33 = vmul.f32 %v1538_v13, %v3358_v26  ;;  %v3386_v39 = vmin.f32 %v1284_v29, 16.0  ;;  %v3407_v8 = vpop.f32.mrf.mxu1 }
 0x1fc   : > { %v1475_v36 = vsel %vm1474_vm12, %v2146_v37, %v1471_v11  ;;  %v1261_v50 = vmul.f32 %v1260_v61, %v3307_v47  ;;  %v1529_v17 = vadd.f32 0.0036580483, %v1528_v34  ;;  %v1253_v40 = vadd.f32 0.18741608, %v1252_v59 }
 0x1fd   : > { %v1480_v25 = vsel %vm3361_vm9, %v1479_v6, %v1475_v36  ;;  %v1231_v62 = vadd.f32 %v2148_v12, %v1230_v4  ;;  %v3390_v32 = vadd.f32 1.0, %v1505_v56  ;;  %v1540_v20 = vadd.f32 0.014752088, %v1539_v33 }
 0x1fe   : > { %v1481_v21 = vmul.f32 %v1480_v25, %v1456_v45  ;;  %v1262_v38 = vadd.f32 0.112945676, %v1261_v50  ;;  %v1530_v48 = vmul.f32 %v1529_v17, %v3358_v26  ;;  %v1216_v10 = vmul.f32 %v3345_v28, %v3258_v19  ;;  %v3442_v25 = vpop.f32.mrf.mxu3 }
 0x1ff   : > { %v1235_v5 = vsel %vm1234_vm14, %v2148_v12, %v1231_v62  ;;  %vm1237_vm15 = vcmp.eq.f32.partialorder %v1236_v51, 8.507059e+37  ;;  %2149 = vrcp.f32 %v3390_v32  ;;  %v1495_v2 = vadd.f32 1.1283791, %v1494_v22 }
 0x200   : > { %v1989_v1 = vclamps-f32 %v1481_v21, 1.0  ;;  %v1240_v41 = vsel %vm1237_vm15, %v1239_v31, %v1235_v5  ;;  %v1263_v63 = vmul.f32 %v1262_v38, %v3307_v47  ;;  %v1531_v45 = vadd.f32 0.05243302, %v1530_v48 }
 0x201   : > { %v1241_v23 = vmul.f32 %v1240_v41, %v1216_v10  ;;  %v1254_v37 = vmul.f32 %v1253_v40, %v3307_v47  ;;  %v1541_v6 = vmul.f32 %v1540_v20, %v3358_v26  ;;  %v1286_v19 = vmul.f32 2.1237322e-06, %v3386_v39 }
 0x202   : > { %1772 = vst [vmem:[%s3328_s18 + $0x40] sm:$0xff] %v1989_v1  ;;  %v1264_v51 = vadd.f32 0.4994258, %v1263_v63  ;;  %v1532_v24 = vmul.f32 %v1531_v45, %v3358_v26  ;;  %v1297_v58 = vmul.f32 3.8918573e-05, %v3386_v39  ;;  %v1564_v30 = vmul.f32 %v3399_v15, %v3399_v15 }
 0x203   : > { %v1983_v28 = vclamps-f32 %v1241_v23, 1.0  ;;  %v1516_v43 = vand.u32 2147483647, %v3390_v32  ;;  %v1542_v9 = vadd.f32 0.112945676, %v1541_v6  ;;  %v1518_v18 = vand.u32 2147483648, %v3390_v32 }
 0x204   : > { %v1287_v35 = vadd.f32 0.00028619796, %v1286_v19  ;;  %v1265_v12 = vmul.f32 %v1264_v51, %v3307_v47  ;;  %v1533_v3 = vadd.f32 0.18741608, %v1532_v24  ;;  %v1298_v31 = vadd.f32 0.001143296, %v1297_v58 }
 0x205   : > { %v2150_v14 = vpop.eup %2149  ;;  %1766 = vst [vmem:[%s3328_s18 + $0x10] sm:$0xff] %v1983_v28  ;;  %v1543_v54 = vmul.f32 %v1542_v9, %v3358_v26  ;;  %v1324_v0 = vmul.f32 %v3407_v8, %v3407_v8  ;;  %v1255_v29 = vadd.f32 1.1283791, %v1254_v37  ;;  %v3423_v57 = vmin.f32 %v1564_v30, 16.0 }
 0x206   : > { %v1508_v7 = vmul.f32 %v2150_v14, %v3390_v32  ;;  %v1288_v46 = vmul.f32 %v1287_v35, %v3386_v39  ;;  %v3420_v52 = vadd.f32 1.0, %v1265_v12  ;;  %v1299_v53 = vmul.f32 %v1298_v31, %v3386_v39 }
 0x207   : > { %v1496_v47 = vmul.f32 %v1495_v2, %v3274_v42  ;;  %v1544_v49 = vadd.f32 0.4994258, %v1543_v54  ;;  %vm1512_vm0 = vweird.f32 %v3390_v32  ;;  %vm3427_vm1 = vcmp.eq.f32.partialorder %v1516_v43, 8.507059e+37 }
 0x208   : > { %v1509_v16 = vsub.f32 1.0, %v1508_v7  ;;  %v1289_v22 = vadd.f32 0.0036580483, %v1288_v46  ;;  %2151 = vrcp.f32 %v3420_v52  ;;  %v1534_v13 = vmul.f32 %v1533_v3, %v3358_v26 }
 0x209   : > { %vm1513_vm2 = vweird.f32 %v2150_v14  ;;  %v1545_v59 = vmul.f32 %v1544_v49, %v3358_v26  ;;  %v3434_v61 = vmin.f32 %v1324_v0, 16.0  ;;  %v1519_v42 = vor.u32 1.1754944e-38, %v1518_v18 }
 0x20a   : > { %v1510_v11 = vmul.f32 %v2150_v14, %v1509_v16  ;;  %v1290_v34 = vmul.f32 %v1289_v22, %v3386_v39  ;;  %v1300_v4 = vadd.f32 0.014752088, %v1299_v53  ;;  %v1566_v56 = vmul.f32 2.1237322e-06, %v3423_v57  ;;  %vm1514_vm3 = vmor %vm1512_vm0, %vm1513_vm2 }
 0x20b   : > { %v1256_v36 = vmul.f32 %v1255_v29, %v3282_v55  ;;  %v1276_v50 = vand.u32 2147483647, %v3420_v52  ;;  %v3440_v17 = vadd.f32 1.0, %v1545_v59  ;;  %v1278_v26 = vand.u32 2147483648, %v3420_v52 }
 0x20c   : > { %v1511_v33 = vadd.f32 %v2150_v14, %v1510_v11  ;;  %v1535_v62 = vadd.f32 1.1283791, %v1534_v13  ;;  %v1301_v40 = vmul.f32 %v1300_v4, %v3386_v39  ;;  %v1567_v21 = vadd.f32 0.00028619796, %v1566_v56 }
 0x20d   : > { %2153 = vrcp.f32 %v3440_v17  ;;  %v1577_v55 = vmul.f32 3.8918573e-05, %v3423_v57  ;;  %v1326_v48 = vmul.f32 2.1237322e-06, %v3434_v61  ;;  %v1291_v5 = vadd.f32 0.05243302, %v1290_v34 }
 0x20e   : > { %v1515_v38 = vsel %vm1514_vm3, %v2150_v14, %v1511_v33  ;;  %v2152_v20 = vpop.eup %2151  ;;  %v1302_v32 = vadd.f32 0.112945676, %v1301_v40  ;;  %v1604_v1 = vmul.f32 %v3442_v25, %v3442_v25  ;;  %vm1272_vm4 = vweird.f32 %v3420_v52 }
 0x20f   : > { %v1520_v10 = vsel %vm3427_vm1, %v1519_v42, %v1515_v38  ;;  %v1268_v23 = vmul.f32 %v2152_v20, %v3420_v52  ;;  %vm3457_vm5 = vcmp.eq.f32.partialorder %v1276_v50, 8.507059e+37  ;;  %v1279_v45 = vor.u32 1.1754944e-38, %v1278_v26 }
 0x210   : > { %v1521_v41 = vmul.f32 %v1520_v10, %v1496_v47  ;;  %v1536_v2 = vmul.f32 %v1535_v62, %v3324_v60  ;;  %v1303_v37 = vmul.f32 %v1302_v32, %v3386_v39  ;;  %v1568_v6 = vmul.f32 %v1567_v21, %v3423_v57 }
 0x211   : > { %v1269_v28 = vsub.f32 1.0, %v1268_v23  ;;  %v1578_v51 = vadd.f32 0.001143296, %v1577_v55  ;;  %v1327_v24 = vadd.f32 0.00028619796, %v1326_v48  ;;  %v1292_v58 = vmul.f32 %v1291_v5, %v3386_v39 }
 0x212   : > { %v1990_v19 = vclamps-f32 %v1521_v41, 1.0  ;;  %v1304_v43 = vadd.f32 0.4994258, %v1303_v37  ;;  %v1569_v9 = vadd.f32 0.0036580483, %v1568_v6  ;;  %vm1273_vm6 = vweird.f32 %v2152_v20  ;;  %v3497_v6 = vpop.f32.mrf.mxu1 }
 0x213   : > { %v1337_v35 = vmul.f32 3.8918573e-05, %v3434_v61  ;;  %v2154_v30 = vpop.eup %2153  ;;  %v1270_v14 = vmul.f32 %v2152_v20, %v1269_v28  ;;  %v1579_v60 = vmul.f32 %v1578_v51, %v3423_v57  ;;  %v1328_v18 = vmul.f32 %v1327_v24, %v3434_v61  ;;  %vm1274_vm7 = vmor %vm1272_vm4, %vm1273_vm6  ;;  %v3501_v24 = vpop.f32.mrf.mxu3 }
 0x214   : > { %1773 = vst [vmem:[%s3328_s18 + $0x48] sm:$0xff] %v1990_v19  ;;  %v1548_v12 = vmul.f32 %v2154_v30, %v3440_v17  ;;  %v1556_v3 = vand.u32 2147483647, %v3440_v17  ;;  %v1558_v31 = vand.u32 2147483648, %v3440_v17  ;;  %v1305_v7 = vmul.f32 %v1304_v43, %v3386_v39 }
 0x215   : > { %v1271_v54 = vadd.f32 %v2152_v20, %v1270_v14  ;;  %v1570_v46 = vmul.f32 %v1569_v9, %v3423_v57  ;;  %v1580_v0 = vadd.f32 0.014752088, %v1579_v60  ;;  %v1329_v29 = vadd.f32 0.0036580483, %v1328_v18 }
 0x216   : > { %v1549_v53 = vsub.f32 1.0, %v1548_v12  ;;  %v1293_v47 = vadd.f32 0.18741608, %v1292_v58  ;;  %v3476_v16 = vadd.f32 1.0, %v1305_v7  ;;  %v1338_v49 = vadd.f32 0.001143296, %v1337_v35 }
 0x217   : > { %v1275_v22 = vsel %vm1274_vm7, %v2152_v20, %v1271_v54  ;;  %v1571_v44 = vadd.f32 0.05243302, %v1570_v46  ;;  %v1581_v13 = vmul.f32 %v1580_v0, %v3423_v57  ;;  %v1330_v11 = vmul.f32 %v1329_v29, %v3434_v61 }
 0x218   : > { %v1280_v59 = vsel %vm3457_vm5, %v1279_v45, %v1275_v22  ;;  %v1550_v42 = vmul.f32 %v2154_v30, %v1549_v53  ;;  %vm1553_vm8 = vweird.f32 %v2154_v30  ;;  %2155 = vrcp.f32 %v3476_v16 }
 0x219   : > { %v1281_v52 = vmul.f32 %v1280_v59, %v1256_v36  ;;  %vm1552_vm9 = vweird.f32 %v3440_v17  ;;  %v1572_v34 = vmul.f32 %v1571_v44, %v3423_v57  ;;  %v3485_v4 = vmin.f32 %v1604_v1, 16.0 }
 0x21a   : > { %v1551_v56 = vadd.f32 %v2154_v30, %v1550_v42  ;;  %v1294_v33 = vmul.f32 %v1293_v47, %v3386_v39  ;;  %v1582_v50 = vadd.f32 0.112945676, %v1581_v13  ;;  %v1339_v26 = vmul.f32 %v1338_v49, %v3434_v61  ;;  %vm1554_vm10 = vmor %vm1552_vm9, %vm1553_vm8 }
 0x21b   : > { %v1984_v62 = vclamps-f32 %v1281_v52, 1.0  ;;  %vm1557_vm11 = vcmp.eq.f32.partialorder %v1556_v3, 8.507059e+37  ;;  %v1559_v40 = vor.u32 1.1754944e-38, %v1558_v31  ;;  %v1331_v21 = vadd.f32 0.05243302, %v1330_v11 }
 0x21c   : > { %v1555_v38 = vsel %vm1554_vm10, %v2154_v30, %v1551_v56  ;;  %v1573_v36 = vadd.f32 0.18741608, %v1572_v34  ;;  %v1583_v17 = vmul.f32 %v1582_v50, %v3423_v57  ;;  %v1340_v55 = vadd.f32 0.014752088, %v1339_v26 }
 0x21d   : > { %1767 = vst [vmem:[%s3328_s18 + $0x18] sm:$0xff] %v1984_v62  ;;  %v1560_v48 = vsel %vm1557_vm11, %v1559_v40, %v1555_v38  ;;  %v1606_v20 = vmul.f32 2.1237322e-06, %v3485_v4  ;;  %v1617_v10 = vmul.f32 3.8918573e-05, %v3485_v4  ;;  %v1318_v45 = vand.u32 2147483648, %v3476_v16 }
 0x21e   : > { %v2156_v39 = vpop.eup %2155  ;;  %v1561_v5 = vmul.f32 %v1560_v48, %v1536_v2  ;;  %v1295_v32 = vadd.f32 1.1283791, %v1294_v33  ;;  %v1584_v1 = vadd.f32 0.4994258, %v1583_v17  ;;  %v1341_v41 = vmul.f32 %v1340_v55, %v3434_v61 }
 0x21f   : > { %v1308_v23 = vmul.f32 %v2156_v39, %v3476_v16  ;;  %v1316_v63 = vand.u32 2147483647, %v3476_v16  ;;  %v1607_v37 = vadd.f32 0.00028619796, %v1606_v20  ;;  %v1332_v51 = vmul.f32 %v1331_v21, %v3434_v61 }
 0x220   : > { %v1991_v19 = vclamps-f32 %v1561_v5, 1.0  ;;  %v1585_v28 = vmul.f32 %v1584_v1, %v3423_v57  ;;  %v1342_v2 = vadd.f32 0.112945676, %v1341_v41  ;;  %v1574_v43 = vmul.f32 %v1573_v36, %v3423_v57 }
 0x221   : > { %v1309_v58 = vsub.f32 1.0, %v1308_v23  ;;  %v1608_v9 = vmul.f32 %v1607_v37, %v3485_v4  ;;  %v1618_v35 = vadd.f32 0.001143296, %v1617_v10  ;;  %vm1313_vm12 = vweird.f32 %v2156_v39 }
 0x222   : > { %1774 = vst [vmem:[%s3328_s18 + $0x50] sm:$0xff] %v1991_v19  ;;  %v3506_v30 = vadd.f32 1.0, %v1585_v28  ;;  %v1343_v14 = vmul.f32 %v1342_v2, %v3434_v61  ;;  %v1364_v60 = vmul.f32 %v3497_v6, %v3497_v6  ;;  %v1644_v31 = vmul.f32 %v3501_v24, %v3501_v24 }
 0x223   : > { %v1310_v18 = vmul.f32 %v2156_v39, %v1309_v58  ;;  %v1609_v12 = vadd.f32 0.0036580483, %v1608_v9  ;;  %v1619_v3 = vmul.f32 %v1618_v35, %v3485_v4  ;;  %v1296_v57 = vmul.f32 %v1295_v32, %v3365_v27  ;;  %v3541_v32 = vpop.f32.mrf.mxu1 }
 0x224   : > { %vm1312_vm13 = vweird.f32 %v3476_v16  ;;  %2157 = vrcp.f32 %v3506_v30  ;;  %vm1317_vm14 = vcmp.eq.f32.partialorder %v1316_v63, 8.507059e+37  ;;  %v1344_v54 = vadd.f32 0.4994258, %v1343_v14 }
 0x225   : > { %v1311_v7 = vadd.f32 %v2156_v39, %v1310_v18  ;;  %v1610_v46 = vmul.f32 %v1609_v12, %v3485_v4  ;;  %vm1314_vm15 = vmor %vm1312_vm13, %vm1313_vm12  ;;  %v1319_v0 = vor.u32 1.1754944e-38, %v1318_v45  ;;  %v1333_v29 = vadd.f32 0.18741608, %v1332_v51 }
 0x226   : > { %v1620_v53 = vadd.f32 0.014752088, %v1619_v3  ;;  %v3519_v47 = vmin.f32 %v1364_v60, 16.0  ;;  %v1575_v22 = vadd.f32 1.1283791, %v1574_v43  ;;  %v1345_v27 = vmul.f32 %v1344_v54, %v3434_v61 }
 0x227   : > { %v1315_v49 = vsel %vm1314_vm15, %v2156_v39, %v1311_v7  ;;  %v3522_v44 = vmin.f32 %v1644_v31, 16.0  ;;  %v1611_v34 = vadd.f32 0.05243302, %v1610_v46  ;;  %v1334_v36 = vmul.f32 %v1333_v29, %v3434_v61 }
 0x228   : > { %v1320_v16 = vsel %vm1317_vm14, %v1319_v0, %v1315_v49  ;;  %v1621_v13 = vmul.f32 %v1620_v53, %v3485_v4  ;;  %v1366_v11 = vmul.f32 2.1237322e-06, %v3519_v47  ;;  %v1377_v59 = vmul.f32 3.8918573e-05, %v3519_v47 }
 0x229   : > { %v1321_v42 = vmul.f32 %v1320_v16, %v1296_v57  ;;  %v3527_v52 = vadd.f32 1.0, %v1345_v27  ;;  %v1646_v21 = vmul.f32 2.1237322e-06, %v3522_v44  ;;  %v1576_v38 = vmul.f32 %v1575_v22, %v3399_v15 }
 0x22a   : > { %v2158_v56 = vpop.eup %2157  ;;  %v1622_v33 = vadd.f32 0.112945676, %v1621_v13  ;;  %v1367_v50 = vadd.f32 0.00028619796, %v1366_v11  ;;  %v1378_v26 = vadd.f32 0.001143296, %v1377_v59  ;;  %v1612_v5 = vmul.f32 %v1611_v34, %v3485_v4 }
 0x22b   : > { %v1985_v62 = vclamps-f32 %v1321_v42, 1.0  ;;  %v1588_v40 = vmul.f32 %v2158_v56, %v3506_v30  ;;  %2159 = vrcp.f32 %v3527_v52  ;;  %vm1593_vm0 = vweird.f32 %v2158_v56 }
 0x22c   : > { %v1623_v55 = vmul.f32 %v1622_v33, %v3485_v4  ;;  %v1368_v48 = vmul.f32 %v1367_v50, %v3519_v47  ;;  %v1379_v20 = vmul.f32 %v1378_v26, %v3519_v47  ;;  %v1596_v10 = vand.u32 2147483647, %v3506_v30  ;;  %v3567_v33 = vpop.f32.mrf.mxu3 }
 0x22d   : > { %1768 = vst [vmem:[%s3328_s18 + $0x20] sm:$0xff] %v1985_v62  ;;  %v1589_v17 = vsub.f32 1.0, %v1588_v40  ;;  %v1598_v39 = vand.u32 2147483648, %v3506_v30  ;;  %v1647_v41 = vadd.f32 0.00028619796, %v1646_v21  ;;  %vm1592_vm1 = vweird.f32 %v3506_v30 }
 0x22e   : > { %v1624_v1 = vadd.f32 0.4994258, %v1623_v55  ;;  %v1380_v61 = vadd.f32 0.014752088, %v1379_v20  ;;  %v1335_v23 = vadd.f32 1.1283791, %v1334_v36  ;;  %v1404_v2 = vmul.f32 %v3541_v32, %v3541_v32  ;;  %vm1594_vm2 = vmor %vm1592_vm1, %vm1593_vm0 }
 0x22f   : > { %v1590_v15 = vmul.f32 %v2158_v56, %v1589_v17  ;;  %v1369_v63 = vadd.f32 0.0036580483, %v1368_v48  ;;  %v1657_v45 = vmul.f32 3.8918573e-05, %v3522_v44  ;;  %vm1597_vm3 = vcmp.eq.f32.partialorder %v1596_v10, 8.507059e+37 }
 0x230   : > { %v1625_v28 = vmul.f32 %v1624_v1, %v3485_v4  ;;  %v1381_v51 = vmul.f32 %v1380_v61, %v3519_v47  ;;  %v1599_v58 = vor.u32 1.1754944e-38, %v1598_v39  ;;  %v1613_v9 = vadd.f32 0.18741608, %v1612_v5 }
 0x231   : > { %v2160_v37 = vpop.eup %2159  ;;  %v1591_v19 = vadd.f32 %v2158_v56, %v1590_v15  ;;  %v1648_v60 = vmul.f32 %v1647_v41, %v3522_v44  ;;  %v1370_v3 = vmul.f32 %v1369_v63, %v3519_v47  ;;  %v1658_v31 = vadd.f32 0.001143296, %v1657_v45 }
 0x232   : > { %v1348_v43 = vmul.f32 %v2160_v37, %v3527_v52  ;;  %v3551_v30 = vadd.f32 1.0, %v1625_v28  ;;  %v1382_v14 = vadd.f32 0.112945676, %v1381_v51  ;;  %v1358_v7 = vand.u32 2147483648, %v3527_v52 }
 0x233   : > { %v1595_v35 = vsel %vm1594_vm2, %v2158_v56, %v1591_v19  ;;  %v3557_v54 = vmin.f32 %v1404_v2, 16.0  ;;  %vm1353_vm4 = vweird.f32 %v2160_v37  ;;  %v1356_v0 = vand.u32 2147483647, %v3527_v52 }
 0x234   : > { %v1600_v18 = vsel %vm1597_vm3, %v1599_v58, %v1595_v35  ;;  %v1349_v12 = vsub.f32 1.0, %v1348_v43  ;;  %2161 = vrcp.f32 %v3551_v30  ;;  %v1383_v29 = vmul.f32 %v1382_v14, %v3519_v47 }
 0x235   : > { %v1601_v57 = vmul.f32 %v1600_v18, %v1576_v38  ;;  %vm1352_vm5 = vweird.f32 %v3527_v52  ;;  %v1649_v49 = vadd.f32 0.0036580483, %v1648_v60  ;;  %v1659_v22 = vmul.f32 %v1658_v31, %v3522_v44 }
 0x236   : > { %v1350_v46 = vmul.f32 %v2160_v37, %v1349_v12  ;;  %v1614_v16 = vmul.f32 %v1613_v9, %v3485_v4  ;;  %v1371_v13 = vadd.f32 0.05243302, %v1370_v3  ;;  %v1384_v11 = vadd.f32 0.4994258, %v1383_v29  ;;  %vm1354_vm6 = vmor %vm1352_vm5, %vm1353_vm4  ;;  %v3593_v12 = vpop.f32.mrf.mxu3 }
 0x237   : > { %v1992_v53 = vclamps-f32 %v1601_v57, 1.0  ;;  %v1336_v59 = vmul.f32 %v1335_v23, %v3407_v8  ;;  %v1359_v42 = vor.u32 1.1754944e-38, %v1358_v7  ;;  %v1660_v34 = vadd.f32 0.014752088, %v1659_v22 }
 0x238   : > { %v1351_v27 = vadd.f32 %v2160_v37, %v1350_v46  ;;  %v1406_v56 = vmul.f32 2.1237322e-06, %v3557_v54  ;;  %vm1357_vm7 = vcmp.eq.f32.partialorder %v1356_v0, 8.507059e+37  ;;  %v1385_v52 = vmul.f32 %v1384_v11, %v3519_v47 }
 0x239   : > { %1775 = vst [vmem:[%s3328_s18 + $0x58] sm:$0xff] %v1992_v53  ;;  %v1417_v26 = vmul.f32 3.8918573e-05, %v3557_v54  ;;  %v1650_v40 = vmul.f32 %v1649_v49, %v3522_v44  ;;  %v1661_v21 = vmul.f32 %v1660_v34, %v3522_v44  ;;  %v1615_v36 = vadd.f32 1.1283791, %v1614_v16 }
 0x23a   : > { %v1355_v50 = vsel %vm1354_vm6, %v2160_v37, %v1351_v27  ;;  %v2162_v62 = vpop.eup %2161  ;;  %v1407_v8 = vadd.f32 0.00028619796, %v1406_v56  ;;  %v1372_v55 = vmul.f32 %v1371_v13, %v3519_v47  ;;  %v1638_v48 = vand.u32 2147483648, %v3551_v30 }
 0x23b   : > { %v1360_v4 = vsel %vm1357_vm7, %v1359_v42, %v1355_v50  ;;  %v1628_v17 = vmul.f32 %v2162_v62, %v3551_v30  ;;  %v3576_v20 = vadd.f32 1.0, %v1385_v52  ;;  %v1662_v10 = vadd.f32 0.112945676, %v1661_v21 }
 0x23c   : > { %v1361_v38 = vmul.f32 %v1360_v4, %v1336_v59  ;;  %v1684_v39 = vmul.f32 %v3567_v33, %v3567_v33  ;;  %v1408_v1 = vmul.f32 %v1407_v8, %v3557_v54  ;;  %v1418_v61 = vadd.f32 0.001143296, %v1417_v26 }
 0x23d   : > { %v1629_v15 = vsub.f32 1.0, %v1628_v17  ;;  %v1636_v41 = vand.u32 2147483647, %v3551_v30  ;;  %2163 = vrcp.f32 %v3576_v20  ;;  %v1651_v23 = vadd.f32 0.05243302, %v1650_v40 }
 0x23e   : > { %v1986_v5 = vclamps-f32 %v1361_v38, 1.0  ;;  %vm1633_vm8 = vweird.f32 %v2162_v62  ;;  %v1373_v45 = vadd.f32 0.18741608, %v1372_v55  ;;  %v1663_v37 = vmul.f32 %v1662_v10, %v3522_v44 }
 0x23f   : > { %v1630_v63 = vmul.f32 %v2162_v62, %v1629_v15  ;;  %v1616_v19 = vmul.f32 %v1615_v36, %v3442_v25  ;;  %vm1632_vm9 = vweird.f32 %v3551_v30  ;;  %v1419_v28 = vmul.f32 %v1418_v61, %v3557_v54 }
 0x240   : > { %1769 = vst [vmem:[%s3328_s18 + $0x28] sm:$0xff] %v1986_v5  ;;  %v3588_v51 = vmin.f32 %v1684_v39, 16.0  ;;  %v1639_v58 = vor.u32 1.1754944e-38, %v1638_v48  ;;  %v1664_v43 = vadd.f32 0.4994258, %v1663_v37  ;;  %vm1634_vm10 = vmor %vm1632_vm9, %vm1633_vm8  ;;  %v1652_v35 = vmul.f32 %v1651_v23, %v3522_v44 }
 0x241   : > { %v1631_v2 = vadd.f32 %v2162_v62, %v1630_v63  ;;  %v1409_v9 = vadd.f32 0.0036580483, %v1408_v1  ;;  %v1420_v14 = vadd.f32 0.014752088, %v1419_v28  ;;  %vm1637_vm11 = vcmp.eq.f32.partialorder %v1636_v41, 8.507059e+37 }
 0x242   : > { %v1686_v60 = vmul.f32 2.1237322e-06, %v3588_v51  ;;  %v1697_v18 = vmul.f32 3.8918573e-05, %v3588_v51  ;;  %v1374_v30 = vmul.f32 %v1373_v45, %v3519_v47  ;;  %v1665_v3 = vmul.f32 %v1664_v43, %v3522_v44 }
 0x243   : > { %v1635_v25 = vsel %vm1634_vm10, %v2162_v62, %v1631_v2  ;;  %v2164_v31 = vpop.eup %2163  ;;  %v1421_v7 = vmul.f32 %v1420_v14, %v3557_v54  ;;  %v1724_v22 = vmul.f32 %v3593_v12, %v3593_v12  ;;  %v1653_v27 = vadd.f32 0.18741608, %v1652_v35 }
 0x244   : > { %v1640_v57 = vsel %vm1637_vm11, %v1639_v58, %v1635_v25  ;;  %v1687_v46 = vadd.f32 0.00028619796, %v1686_v60  ;;  %v1698_v0 = vadd.f32 0.001143296, %v1697_v18  ;;  %v1388_v53 = vmul.f32 %v2164_v31, %v3576_v20 }
 0x245   : > { %v1641_v29 = vmul.f32 %v1640_v57, %v1616_v19  ;;  %v3599_v49 = vadd.f32 1.0, %v1665_v3  ;;  %v1410_v47 = vmul.f32 %v1409_v9, %v3557_v54  ;;  %v1422_v16 = vadd.f32 0.112945676, %v1421_v7 }
 0x246   : > { %v1699_v13 = vmul.f32 %v1698_v0, %v3588_v51  ;;  %v1389_v59 = vsub.f32 1.0, %v1388_v53  ;;  %v1688_v42 = vmul.f32 %v1687_v46, %v3588_v51  ;;  %v1375_v34 = vadd.f32 1.1283791, %v1374_v30 }
 0x247   : > { %v1993_v11 = vclamps-f32 %v1641_v29, 1.0  ;;  %2165 = vrcp.f32 %v3599_v49  ;;  %v1396_v56 = vand.u32 2147483647, %v3576_v20  ;;  %v1398_v50 = vand.u32 2147483648, %v3576_v20 }
 0x248   : > { %v1423_v52 = vmul.f32 %v1422_v16, %v3557_v54  ;;  %v1390_v26 = vmul.f32 %v2164_v31, %v1389_v59  ;;  %vm1393_vm12 = vweird.f32 %v2164_v31  ;;  %v1700_v62 = vadd.f32 0.014752088, %v1699_v13 }
 0x249   : > { %1776 = vst [vmem:[%s3328_s18 + $0x60] sm:$0xff] %v1993_v11  ;;  %v3611_v4 = vmin.f32 %v1724_v22, 16.0  ;;  %v1654_v40 = vmul.f32 %v1653_v27, %v3522_v44  ;;  %v1411_v21 = vadd.f32 0.05243302, %v1410_v47  ;;  %vm1392_vm13 = vweird.f32 %v3576_v20 }
 0x24a   : > { %v1424_v8 = vadd.f32 0.4994258, %v1423_v52  ;;  %v1391_v38 = vadd.f32 %v2164_v31, %v1390_v26  ;;  %v1689_v36 = vadd.f32 0.0036580483, %v1688_v42  ;;  %v1701_v17 = vmul.f32 %v1700_v62, %v3588_v51  ;;  %vm1394_vm14 = vmor %vm1392_vm13, %vm1393_vm12 }
 0x24b   : > { %v1399_v55 = vor.u32 1.1754944e-38, %v1398_v50  ;;  %v1726_v10 = vmul.f32 2.1237322e-06, %v3611_v4  ;;  %v1737_v39 = vmul.f32 3.8918573e-05, %v3611_v4  ;;  %v1376_v15 = vmul.f32 %v1375_v34, %v3497_v6 }
 0x24c   : > { %v1425_v48 = vmul.f32 %v1424_v8, %v3557_v54  ;;  %v1395_v44 = vsel %vm1394_vm14, %v2164_v31, %v1391_v38  ;;  %vm1397_vm15 = vcmp.eq.f32.partialorder %v1396_v56, 8.507059e+37  ;;  %v1702_v1 = vadd.f32 0.112945676, %v1701_v17 }
 0x24d   : > { %v2166_v5 = vpop.eup %2165  ;;  %v1400_v61 = vsel %vm1397_vm15, %v1399_v55, %v1395_v44  ;;  %v1655_v41 = vadd.f32 1.1283791, %v1654_v40  ;;  %v1412_v23 = vmul.f32 %v1411_v21, %v3557_v54  ;;  %v1690_v37 = vmul.f32 %v1689_v36, %v3588_v51 }
 0x24e   : > { %v1668_v20 = vmul.f32 %v2166_v5, %v3599_v49  ;;  %v1401_v63 = vmul.f32 %v1400_v61, %v1376_v15  ;;  %v1426_v45 = vadd.f32 1.0, %v1425_v48  ;;  %v1703_v19 = vmul.f32 %v1702_v1, %v3588_v51 }
 0x24f   : > { %v1727_v2 = vadd.f32 0.00028619796, %v1726_v10  ;;  %v1738_v58 = vadd.f32 0.001143296, %v1737_v39  ;;  %v1676_v43 = vand.u32 2147483647, %v3599_v49  ;;  %vm1673_vm0 = vweird.f32 %v2166_v5 }
 0x250   : > { %v1669_v28 = vsub.f32 1.0, %v1668_v20  ;;  %v1987_v6 = vclamps-f32 %v1401_v63, 1.0  ;;  %v1678_v9 = vand.u32 2147483648, %v3599_v49  ;;  %2167 = vrcp.f32 %v1426_v45 }
 0x251   : > { %v1413_v14 = vadd.f32 0.18741608, %v1412_v23  ;;  %v1704_v60 = vadd.f32 0.4994258, %v1703_v19  ;;  %v1691_v18 = vadd.f32 0.05243302, %v1690_v37  ;;  %v1739_v25 = vmul.f32 %v1738_v58, %v3611_v4 }
 0x252   : > { %v1670_v35 = vmul.f32 %v2166_v5, %v1669_v28  ;;  %1770 = vst [vmem:[%s3328_s18 + $0x30] sm:$0xff] %v1987_v6  ;;  %vm1672_vm1 = vweird.f32 %v3599_v49  ;;  %v1728_v31 = vmul.f32 %v1727_v2, %v3611_v4  ;;  %v1656_v57 = vmul.f32 %v1655_v41, %v3501_v24 }
 0x253   : > { %v1705_v3 = vmul.f32 %v1704_v60, %v3588_v51  ;;  %vm1674_vm2 = vmor %vm1672_vm1, %vm1673_vm0  ;;  %v1679_v7 = vor.u32 1.1754944e-38, %v1678_v9  ;;  %v1740_v46 = vadd.f32 0.014752088, %v1739_v25  ;;  %vm1677_vm3 = vcmp.eq.f32.partialorder %v1676_v43, 8.507059e+37 }
 0x254   : > { %v1671_v30 = vadd.f32 %v2166_v5, %v1670_v35  ;;  %v1414_v29 = vmul.f32 %v1413_v14, %v3557_v54  ;;  %v1692_v47 = vmul.f32 %v1691_v18, %v3588_v51  ;;  %v1729_v11 = vadd.f32 0.0036580483, %v1728_v31 }
 0x255   : > { %v1706_v53 = vadd.f32 1.0, %v1705_v3  ;;  %v1741_v49 = vmul.f32 %v1740_v46, %v3611_v4  ;;  %v1436_v56 = vand.u32 2147483647, %v1426_v45  ;;  %v1438_v50 = vand.u32 2147483648, %v1426_v45 }
 0x256   : > { %v1675_v0 = vsel %vm1674_vm2, %v2166_v5, %v1671_v30  ;;  %v2168_v22 = vpop.eup %2167  ;;  %v1415_v59 = vadd.f32 1.1283791, %v1414_v29  ;;  %v1693_v52 = vadd.f32 0.18741608, %v1692_v47  ;;  %v1730_v26 = vmul.f32 %v1729_v11, %v3611_v4 }
 0x257   : > { %v1680_v27 = vsel %vm1677_vm3, %v1679_v7, %v1675_v0  ;;  %v1428_v13 = vmul.f32 %v2168_v22, %v1426_v45  ;;  %2169 = vrcp.f32 %v1706_v53  ;;  %v1742_v34 = vadd.f32 0.112945676, %v1741_v49 }
 0x258   : > { %v1681_v16 = vmul.f32 %v1680_v27, %v1656_v57  ;;  %vm1433_vm4 = vweird.f32 %v2168_v22  ;;  %vm1432_vm5 = vweird.f32 %v1426_v45  ;;  %v1416_v38 = vmul.f32 %v1415_v59, %v3541_v32 }
 0x259   : > { %v1429_v42 = vsub.f32 1.0, %v1428_v13  ;;  %v1743_v62 = vmul.f32 %v1742_v34, %v3611_v4  ;;  %vm1434_vm6 = vmor %vm1432_vm5, %vm1433_vm4  ;;  %v1439_v36 = vor.u32 1.1754944e-38, %v1438_v50  ;;  %v1694_v17 = vmul.f32 %v1693_v52, %v3588_v51 }
 0x25a   : > { %v1994_v24 = vclamps-f32 %v1681_v16, 1.0  ;;  %vm1437_vm7 = vcmp.eq.f32.partialorder %v1436_v56, 8.507059e+37  ;;  %v1731_v10 = vadd.f32 0.05243302, %v1730_v26  ;;  %v1716_v61 = vand.u32 2147483647, %v1706_v53 }
 0x25b   : > { %v1430_v54 = vmul.f32 %v2168_v22, %v1429_v42  ;;  %v1744_v21 = vadd.f32 0.4994258, %v1743_v62  ;;  %v1695_v1 = vadd.f32 1.1283791, %v1694_v17  ;;  %v1718_v41 = vand.u32 2147483648, %v1706_v53 }
 0x25c   : > { %1777 = vst [vmem:[%s3328_s18 + $0x68] sm:$0xff] %v1994_v24  ;;  %v1732_v63 = vmul.f32 %v1731_v10, %v3611_v4  ;;  %vm1712_vm9 = vweird.f32 %v1706_v53  ;;  %vm1717_vm11 = vcmp.eq.f32.partialorder %v1716_v61, 8.507059e+37 }
 0x25d   : > { %v1431_v40 = vadd.f32 %v2168_v22, %v1430_v54  ;;  %v2170_v8 = vpop.eup %2169  ;;  %v1745_v5 = vmul.f32 %v1744_v21, %v3611_v4  ;;  %v1719_v45 = vor.u32 1.1754944e-38, %v1718_v41  ;;  %v1696_v37 = vmul.f32 %v1695_v1, %v3567_v33 }
 0x25e   : > { %v1708_v48 = vmul.f32 %v2170_v8, %v1706_v53  ;;  %vm1713_vm8 = vweird.f32 %v2170_v8  ;;  %v1733_v28 = vadd.f32 0.18741608, %v1732_v63 }
 0x25f   : > { %v1435_v55 = vsel %vm1434_vm6, %v2168_v22, %v1431_v40  ;;  %v1746_v20 = vadd.f32 1.0, %v1745_v5  ;;  %vm1714_vm10 = vmor %vm1712_vm9, %vm1713_vm8 }
 0x260   : > { %v1440_v39 = vsel %vm1437_vm7, %v1439_v36, %v1435_v55  ;;  %v1709_v44 = vsub.f32 1.0, %v1708_v48  ;;  %v1734_v9 = vmul.f32 %v1733_v28, %v3611_v4 }
 0x261   : > { %v1441_v15 = vmul.f32 %v1440_v39, %v1416_v38  ;;  %2171 = vrcp.f32 %v1746_v20  ;;  %v1758_v60 = vand.u32 2147483648, %v1746_v20  ;;  %v1756_v30 = vand.u32 2147483647, %v1746_v20 }
 0x262   : > { %v1710_v32 = vmul.f32 %v2170_v8, %v1709_v44  ;;  %v1735_v18 = vadd.f32 1.1283791, %v1734_v9  ;;  %vm1752_vm13 = vweird.f32 %v1746_v20 }
 0x263   : > { %v1988_v23 = vclamps-f32 %v1441_v15, 1.0  ;;  %v1759_v4 = vor.u32 1.1754944e-38, %v1758_v60  ;;  %vm1757_vm15 = vcmp.eq.f32.partialorder %v1756_v30, 8.507059e+37 }
 0x264   : > { %v1711_v51 = vadd.f32 %v2170_v8, %v1710_v32  ;;  %v1736_v3 = vmul.f32 %v1735_v18, %v3593_v12 }
 0x265   : > { %1771 = vst [vmem:[%s3328_s18 + $0x38] sm:$0xff] %v1988_v23 }
 0x266   : > { %v1715_v19 = vsel %vm1714_vm10, %v2170_v8, %v1711_v51 }
 0x267   : > { %v1720_v2 = vsel %vm1717_vm11, %v1719_v45, %v1715_v19  ;;  %v2172_v6 = vpop.eup %2171 }
 0x268   : > { %v1721_v58 = vmul.f32 %v1720_v2, %v1696_v37  ;;  %v1748_v35 = vmul.f32 %v2172_v6, %v1746_v20  ;;  %vm1753_vm12 = vweird.f32 %v2172_v6 }
 0x269   : > { %vm1754_vm14 = vmor %vm1752_vm13, %vm1753_vm12 }
 0x26a   : > { %v1995_v43 = vclamps-f32 %v1721_v58, 1.0  ;;  %v1749_v14 = vsub.f32 1.0, %v1748_v35 }
 0x26c   : > { %1778 = vst [vmem:[%s3328_s18 + $0x70] sm:$0xff] %v1995_v43  ;;  %v1750_v25 = vmul.f32 %v2172_v6, %v1749_v14 }
 0x26e   : > { %v1751_v33 = vadd.f32 %v2172_v6, %v1750_v25 }
 0x270   : > { %v1755_v31 = vsel %vm1754_vm14, %v2172_v6, %v1751_v33 }
 0x271   : > { %v1760_v57 = vsel %vm1757_vm15, %v1759_v4, %v1755_v31 }
 0x272   : > { %v1761_v7 = vmul.f32 %v1760_v57, %v1736_v3 }
 0x274   : > { %v1996_v46 = vclamps-f32 %v1761_v7, 1.0 }
 0x276   : > { %1779 = vst [vmem:[%s3328_s18 + $0x78] sm:$0xff] %v1996_v46 }
 0x277   : > { %2290 = shalt.err (!%p2287_p10)
}
 0x278   : > { %s2341_s22 = smov 128   ;;  %s2342_s24 = smov 8  }
 0x279   : > { %2046 = dma.vmem_to_hbm [thread:$0]  (%p2429_p3), %s1794_s16, 2048, %s1796_s29, %s1781_s4, %s2341_s22, %s2341_s22, %s2342_s24  }
 0x27a PF: > { %s1810_s25 = sand.u32 1, %s2321_s12   ;;  %p3751_p12 = scmp.ge.s32.totalorder %s2333_s15, 2 }
 0x27b   : > { %s1811_s30 = scalar_lea.sflag [#allocation4], %s1810_s25 }
 0x27c   : > { %p2060_p13 = pnand %p3751_p12, %p2398_p6 }
 0x27e   : > { %p2061_p0 = pneg %p2060_p13 }
 0x280   : > { %2316 = dma.done.wait (%p2061_p0), %s1811_s30, 2048  }
 0x281   : > { %2318 = vsyncadd (%p2061_p0), %s1811_s30, 4294965248  ;;  %p17_p5 = scmp.ge.s32.totalorder %s2419_s6, 4   ;;  %s3752_s12 = smov %s2325_s13 }
 0x282   : > { %s3753_s13 = smov %s2329_s14  ;;  %s3754_s14 = smov %s2435_s10 }
 0x283   : > { %s3755_s15 = smov %s2419_s6  ;;  %19 = sbr.rel (!%p17_p5) target bundleno = 6 (0x6), region = 85 }
 0x288   :  { %1817 = vsyncpa [#allocation3], 1 }
 0x289   :  { %1819 = vsyncpa [#allocation3 + $0x1], 1 }
 0x28a   :  { %1820 = vsyncpa [#allocation6], 1 }
 0x28b   :  { %1821 = vsyncpa [#allocation4], 1 }
 0x28c   :  { %1823 = vsyncpa [#allocation4 + $0x1], 1 }

// kernel: tpu_custom_call.1
= control target key start
LH: loop header
LB: loop body
LE: loop exit
PB: predicated region body
PF: predicated region fallthrough
CT: control target
= control target key end

     0   :  { %8 = vsyncpa [#allocation3], 0  ;;  %s3682_s0 = inlined_call_operand.hbm [shape: f32[256,128], index: 0, kind: input, shape index: {}]   ;;  %s3683_s1 = inlined_call_operand.hbm [shape: bf16[128,128], index: 1, kind: input, shape index: {}]   ;;  %s3684_s2 = inlined_call_operand.hbm [shape: bf16[128,128], index: 2, kind: input, shape index: {}]   ;;  %s3685_s3 = inlined_call_operand.hbm [shape: f32[256,128], index: 3, kind: output, shape index: {}]  }
   0x1   :  { %10 = vsyncpa [#allocation3 + $0x1], 0 }
   0x2   :  { %11 = vsyncpa [#allocation6], 0 }
   0x3   :  { %12 = vsyncpa [#allocation4], 0 }
   0x4   :  { %14 = vsyncpa [#allocation4 + $0x1], 0  ;;  %s2363_s12 = smov 0   ;;  %s2365_s13 = smov 0  }
   0x5   :  { %s2367_s14 = smov 0   ;;  %s2369_s15 = smov 0  }
   0x6 LB: > { %s2384_s16 = sadd.s32 4294967295, %s2333_s15   ;;  %s1888_s17 = sadd.s32 4294967294, %s2333_s15   ;;  %s2333_s15 = sphi %s2369_s15, %s3755_s15   ;;  %s2329_s14 = sphi %s2367_s14, %s3754_s14   ;;  %s2325_s13 = sphi %s2365_s13, %s3753_s13   ;;  %s2321_s12 = sphi %s2363_s12, %s3752_s12  }
   0x7   : > { %p40_p0 = scmp.ne.s32.totalorder %s2325_s13, %s2321_s12  ;;  %p41_p1 = scmp.eq.s32.totalorder %s2384_s16, 0 }
   0x8   : > { %p106_p2 = scmp.eq.s32.totalorder %s2384_s16, 1  ;;  %p112_p3 = scmp.eq.s32.totalorder %s1888_s17, 1 }
   0x9   : > { %p2393_p4 = por %p41_p1, %p40_p0  ;;  %p1889_p5 = scmp.ge.s32.totalorder %s2333_s15, 1 }
   0xa   : > { %p2398_p6 = por %p112_p3, %p40_p0  ;;  %p119_p7 = scmp.lt.s32.totalorder %s2333_s15, 3 }
   0xb   : > { %s130_s22 = sshll.u32 %s3683_s1, 4  ;;  %s2335_s24 = smov [#allocation5]   ;;  %s131_s22 = int_to_ptr.hbm [resolvable:$true] %s130_s22 }
   0xc   : > { %p2406_p8 = pnand %p1889_p5, %p119_p7  ;;  %s132_s25 = sshll.u32 %s2335_s24, 4  ;;  %s133_s25 = int_to_ptr.vmem [resolvable:$true] %s132_s25 }
   0xd   : > { %s144_s28 = sshll.u32 %s3684_s2, 4  ;;  %s2336_s29 = smov 64   ;;  %s145_s28 = int_to_ptr.hbm [resolvable:$true] %s144_s28 }
   0xe   : > { %p2048_p9 = pneg %p2406_p8  ;;  %s2337_s30 = smov 4  }
   0xf   : > { %s2338_s4 = smov [#allocation7]   ;;  %s2419_s6 = sadd.s32 1, %s2333_s15  }
  0x10   : > { %p2049_p10 = pnand %p2048_p9, %p41_p1  ;;  %s146_s5 = sshll.u32 %s2338_s4, 4  ;;  %s147_s5 = int_to_ptr.vmem [resolvable:$true] %s146_s5 }
  0x11   : > { %s27_s7 = sadd.s32 1, %s2329_s14  ;;  %s24_s8 = ssub.s32 %s2333_s15, %s2419_s6 }
  0x12   : > { %2051 = dma.hbm_to_vmem [thread:$0]  (!%p2049_p10), %s131_s22, 1024, %s133_s25, [#allocation6], %s2336_s29, %s2336_s29, %s2337_s30  }
  0x13   : > { %2054 = dma.hbm_to_vmem [thread:$0]  (!%p2049_p10), %s145_s28, 1024, %s147_s5, [#allocation6], %s2336_s29, %s2336_s29, %s2337_s30  }
  0x14   : > { %p34_p12 = scmp.ne.s32.totalorder %s2329_s14, %s2325_s13  ;;  %p25_p13 = scmp.eq.s32.totalorder %s24_s8, 0 }
  0x15   : > { %p35_p0 = scmp.eq.s32.totalorder %s2333_s15, 0  ;;  %p2065_p5 = scmp.lt.s32.totalorder %s2333_s15, 2 }
  0x16   : > { %p2429_p3 = por %p106_p2, %p34_p12  ;;  %s160_s11 = sand.u32 1, %s2329_s14  }
  0x17   : > { %s2435_s10 = scalar_select %p25_p13, %s2329_s14, %s27_s7  }
  0x18   : > { %p36_p7 = por %p35_p0, %p34_p12  ;;  %s1893_s17 = sshll.u32 %s160_s11, 7 }
  0x19   : > { %s2002_s20 = sshll.u32 %s2333_s15, 7  ;;  %s164_s25 = scalar_lea.vmem [#allocation2], %s1893_s17 }
  0x1a   : > { %s169_s24 = scalar_lea.hbm %s3682_s0, %s2002_s20  ;;  %s172_s26 = sshll.u32 %s164_s25, 4  ;;  %s173_s26 = int_to_ptr.vmem [resolvable:$true] %s172_s26 }
  0x1b   : > { %s170_s27 = sshll.u32 %s169_s24, 4  ;;  %p2442_p2 = pnand %p2065_p5, %p36_p7  ;;  %s171_s27 = int_to_ptr.hbm [resolvable:$true] %s170_s27 }
  0x1c   : > { %s161_s29 = scalar_lea.sflag [#allocation3], %s160_s11  ;;  %s2233_s30 = sshra.s32 %s171_s27, 4  ;;  %s2234_s30 = int_to_ptr.hbm [resolvable:$true] %s2233_s30 }
  0x1d   : > { %s2235_s4 = scalar_lea.hbm %s2234_s30, 128  ;;  %p2237_p10 = pneg %p2442_p2 }
  0x1e   : > { %p2236_p9 = scmp.ne.s32.totalorder %s2234_s30, %s2235_s4  ;;  %s2240_s8 = scalar_lea.hbm %s3682_s0, 256 }
  0x1f   : > { %p2241_p0 = scmp.lt.s32.totalorder %s2234_s30, %s3682_s0  ;;  %p2242_p5 = scmp.lt.s32.totalorder %s2240_s8, %s2235_s4 }
  0x20   : > { %p2238_p12 = pnand %p2237_p10, %p2236_p9 }
  0x21   : > { %p2243_p7 = por %p2242_p5, %p2241_p0 }
  0x22   : > { %p2239_p13 = pneg %p2238_p12 }
  0x24   : > { %p2244_p11 = pnand %p2243_p7, %p2239_p13 }
  0x26   : > { %2247 = shalt.err (!%p2244_p11)
}
  0x27   : > { %s2339_s11 = smov 128   ;;  %s2340_s21 = smov 8  }
  0x28   : > { %2058 = dma.hbm_to_vmem [thread:$0]  (!%p2442_p2), %s171_s27, 2048, %s173_s26, %s161_s29, %s2339_s11, %s2339_s11, %s2340_s21  }
  0x29   : > { %184 = sbr.rel (%p2406_p8) target bundleno = 634 (0x27a), region = 32  ;;  %s2459_s22 = sand.u32 (!%p2406_p8), 1, %s2325_s13  }
  0x2a   : > { %s1897_s24 = sshll.u32 (!%p2406_p8), %s2459_s22, 7  ;;  %s187_s25 = scalar_lea.sflag (!%p2406_p8), [#allocation3], %s2459_s22 }
  0x2b   : > { %s2465_s30 = scalar_lea.vmem (!%p2406_p8), [#allocation2], %s1897_s24 }
  0x2e   : > { %2308 = dma.done.wait (%p2393_p4), %s187_s25, 2048  }
  0x2f   : > { %2310 = vsyncadd (%p2393_p4), %s187_s25, 4294965248 }
  0x30   : > { %2312 = dma.done.wait (%p41_p1), [#allocation6], 2048  }
  0x31   : > { %2314 = vsyncadd (%p41_p1), [#allocation6], 4294965248  ;;  %v2010_v0 = vld [vmem:[#allocation5 + $0x38] sm:$0xff]  ;;  %v2009_v1 = vld [vmem:[#allocation5 + $0x30] sm:$0xff]  ;;  %s3328_s18 = scalar_lea.vmem [#allocation8], %s1897_s24  ;;  %s2019_s23 = sshll.u32 %s2384_s16, 7 }
  0x32   : > { %314 = vmatpush.bf16.msra.mxu0 %v2010_v0  ;;  %2020 = vmatpush.bf16.msra.mxu2 %v2010_v0  ;;  %v2008_v2 = vld [vmem:[#allocation5 + $0x28] sm:$0xff]  ;;  %v2007_v3 = vld [vmem:[#allocation5 + $0x20] sm:$0xff]  ;;  %v2006_v4 = vld [vmem:[#allocation5 + $0x18] sm:$0xff]  ;;  %s1792_s28 = scalar_lea.hbm %s3685_s3, %s2019_s23  ;;  %s1793_s16 = sshll.u32 %s3328_s18, 4  ;;  %s1794_s16 = int_to_ptr.vmem [resolvable:$true] %s1793_s16 }
  0x33   : > { %v2005_v5 = vld [vmem:[#allocation5 + $0x10] sm:$0xff]  ;;  %v2004_v6 = vld [vmem:[#allocation5 + $0x8] sm:$0xff]  ;;  %v2003_v7 = vld [vmem:[#allocation5] sm:$0xff]  ;;  %s1795_s29 = sshll.u32 %s1792_s28, 4  ;;  %s1781_s4 = scalar_lea.sflag [#allocation4], %s2459_s22  ;;  %s1796_s29 = int_to_ptr.hbm [resolvable:$true] %s1795_s29 }
  0x34   : > { %v226_v8 = vld [vmem:[%s2465_s30] sm:$0xff]  ;;  %v227_v9 = vld [vmem:[%s2465_s30 + $0x8] sm:$0xff]  ;;  %v228_v14 = vld [vmem:[%s2465_s30 + $0x10] sm:$0xff]  ;;  %s2277_s5 = sshra.s32 %s1796_s29, 4  ;;  %s2283_s20 = scalar_lea.hbm %s3685_s3, 256  ;;  %s2278_s5 = int_to_ptr.hbm [resolvable:$true] %s2277_s5 }
  0x35   : > { %v234_v10 = vld [vmem:[%s2465_s30 + $0x40] sm:$0xff]  ;;  %v235_v11 = vld [vmem:[%s2465_s30 + $0x48] sm:$0xff]  ;;  %v242_v12 = vpack.c.bf16 %v227_v9, %v226_v8  ;;  %v229_v15 = vld [vmem:[%s2465_s30 + $0x18] sm:$0xff]  ;;  %s2279_s7 = scalar_lea.hbm %s2278_s5, 128  ;;  %p2284_p11 = scmp.lt.s32.totalorder %s2278_s5, %s3685_s3 }
  0x36   : > { %315 = vmatpush.bf16.msra.mxu0 %v2009_v1  ;;  %2021 = vmatpush.bf16.msra.mxu2 %v2009_v1  ;;  %v246_v13 = vpack.c.bf16 %v235_v11, %v234_v10  ;;  %v236_v16 = vld [vmem:[%s2465_s30 + $0x50] sm:$0xff]  ;;  %v237_v17 = vld [vmem:[%s2465_s30 + $0x58] sm:$0xff]  ;;  %v243_v18 = vpack.c.bf16 %v229_v15, %v228_v14  ;;  %v230_v20 = vld [vmem:[%s2465_s30 + $0x20] sm:$0xff]  ;;  %p2280_p1 = scmp.ne.s32.totalorder %s2278_s5, %s2279_s7  ;;  %p2285_p2 = scmp.lt.s32.totalorder %s2283_s20, %s2279_s7 }
  0x37   : > { %v247_v19 = vpack.c.bf16 %v237_v17, %v236_v16  ;;  %v231_v21 = vld [vmem:[%s2465_s30 + $0x28] sm:$0xff]  ;;  %v238_v22 = vld [vmem:[%s2465_s30 + $0x60] sm:$0xff]  ;;  %v232_v26 = vld [vmem:[%s2465_s30 + $0x30] sm:$0xff] }
  0x38   : > { %v239_v23 = vld [vmem:[%s2465_s30 + $0x68] sm:$0xff]  ;;  %v244_v24 = vpack.c.bf16 %v231_v21, %v230_v20  ;;  %v233_v27 = vld [vmem:[%s2465_s30 + $0x38] sm:$0xff]  ;;  %v240_v28 = vld [vmem:[%s2465_s30 + $0x70] sm:$0xff]  ;;  %p2281_p4 = pnand %p2280_p1, %p2429_p3  ;;  %p2286_p9 = por %p2285_p2, %p2284_p11 }
  0x39   : > { %v248_v25 = vpack.c.bf16 %v239_v23, %v238_v22  ;;  %v241_v29 = vld [vmem:[%s2465_s30 + $0x78] sm:$0xff]  ;;  %v245_v30 = vpack.c.bf16 %v233_v27, %v232_v26  ;;  %v2017_v62 = vld [vmem:[#allocation7 + $0x30] sm:$0xff] }
  0x3a   : > { %316 = vmatpush.bf16.msra.mxu0 %v2008_v2  ;;  %2022 = vmatpush.bf16.msra.mxu2 %v2008_v2  ;;  %v249_v31 = vpack.c.bf16 %v241_v29, %v240_v28  ;;  %v2018_v59 = vld [vmem:[#allocation7 + $0x38] sm:$0xff]  ;;  %p2282_p8 = pneg %p2281_p4 }
  0x3b   : > { %1075 = vmatpush.bf16.msra.mxu1 %v2018_v59  ;;  %2028 = vmatpush.bf16.msra.mxu3 %v2018_v59 }
  0x3c   : > { %p2287_p10 = pnand %p2286_p9, %p2282_p8 }
  0x3e   : > { %317 = vmatpush.bf16.msra.mxu0 %v2007_v3  ;;  %2023 = vmatpush.bf16.msra.mxu2 %v2007_v3 }
  0x3f   : > { %1076 = vmatpush.bf16.msra.mxu1 %v2017_v62  ;;  %2029 = vmatpush.bf16.msra.mxu3 %v2017_v62 }
  0x42   : > { %318 = vmatpush.bf16.msra.mxu0 %v2006_v4  ;;  %2024 = vmatpush.bf16.msra.mxu2 %v2006_v4 }
  0x46   : > { %319 = vmatpush.bf16.msra.mxu0 %v2005_v5  ;;  %2025 = vmatpush.bf16.msra.mxu2 %v2005_v5 }
  0x4a   : > { %320 = vmatpush.bf16.msra.mxu0 %v2004_v6  ;;  %2026 = vmatpush.bf16.msra.mxu2 %v2004_v6 }
  0x4e   : > { %321 = vmatpush.bf16.msra.mxu0 %v2003_v7  ;;  %2027 = vmatpush.bf16.msra.mxu2 %v2003_v7 }
  0x51   : > { %322 = vmatmul.bf16.vlgmr.msra.gmra.mxu0 %v242_v12  ;;  %342 = vmatmul.bf16.vlgmr.msra.gmra.mxu2 %v246_v13 }
  0x61   : > { %327 = vmatmul.bf16.gmra.mxu0 %v243_v18  ;;  %347 = vmatmul.bf16.gmra.mxu2 %v247_v19 }
  0x71   : > { %332 = vmatmul.bf16.gmra.mxu0 %v244_v24  ;;  %352 = vmatmul.bf16.gmra.mxu2 %v248_v25 }
  0x81   : > { %337 = vmatmul.bf16.gmra.mxu0 %v245_v30  ;;  %357 = vmatmul.bf16.gmra.mxu2 %v249_v31 }
  0xce   : > { %v2491_v32 = vpop.f32.mrf.mxu0 }
  0xcf   : > { %v363_v33 = vmul.f32 %v2491_v32, %v2491_v32 }
  0xd1   : > { %v2495_v34 = vmin.f32 %v363_v33, 16.0 }
  0xd3   : > { %v376_v35 = vmul.f32 3.8918573e-05, %v2495_v34  ;;  %v365_v50 = vmul.f32 2.1237322e-06, %v2495_v34 }
  0xd4   : > { %v2498_v36 = vpop.f32.mrf.mxu2 }
  0xd5   : > { %v377_v37 = vadd.f32 0.001143296, %v376_v35  ;;  %v683_v38 = vmul.f32 %v2498_v36, %v2498_v36  ;;  %v366_v55 = vadd.f32 0.00028619796, %v365_v50 }
  0xd6   : > { %v2502_v39 = vpop.f32.mrf.mxu0 }
  0xd7   : > { %v378_v40 = vmul.f32 %v377_v37, %v2495_v34  ;;  %v2505_v41 = vmin.f32 %v683_v38, 16.0  ;;  %v403_v42 = vmul.f32 %v2502_v39, %v2502_v39  ;;  %v367_v63 = vmul.f32 %v366_v55, %v2495_v34 }
  0xd9   : > { %v696_v43 = vmul.f32 3.8918573e-05, %v2505_v41  ;;  %v2510_v44 = vmin.f32 %v403_v42, 16.0  ;;  %v379_v45 = vadd.f32 0.014752088, %v378_v40 }
  0xda   : > { %v685_v58 = vmul.f32 2.1237322e-06, %v2505_v41  ;;  %v368_v7 = vadd.f32 0.0036580483, %v367_v63 }
  0xdb   : > { %v697_v46 = vadd.f32 0.001143296, %v696_v43  ;;  %v416_v48 = vmul.f32 3.8918573e-05, %v2510_v44  ;;  %v380_v51 = vmul.f32 %v379_v45, %v2495_v34  ;;  %v405_v3 = vmul.f32 2.1237322e-06, %v2510_v44 }
  0xdc   : > { %v2512_v47 = vpop.f32.mrf.mxu2  ;;  %v686_v2 = vadd.f32 0.00028619796, %v685_v58  ;;  %v369_v15 = vmul.f32 %v368_v7, %v2495_v34 }
  0xdd   : > { %v723_v49 = vmul.f32 %v2512_v47, %v2512_v47  ;;  %v698_v53 = vmul.f32 %v697_v46, %v2505_v41  ;;  %v417_v54 = vadd.f32 0.001143296, %v416_v48  ;;  %v381_v57 = vadd.f32 0.112945676, %v380_v51  ;;  %v2016_v48 = vld [vmem:[#allocation7 + $0x28] sm:$0xff] }
  0xde   : > { %v2529_v6 = vpop.f32.mrf.mxu0  ;;  %v687_v10 = vmul.f32 %v686_v2, %v2505_v41  ;;  %v406_v11 = vadd.f32 0.00028619796, %v405_v3  ;;  %v370_v25 = vadd.f32 0.05243302, %v369_v15  ;;  %1077 = vmatpush.bf16.msra.mxu1 %v2016_v48  ;;  %2030 = vmatpush.bf16.msra.mxu3 %v2016_v48 }
  0xdf   : > { %v2519_v52 = vmin.f32 %v723_v49, 16.0  ;;  %v699_v60 = vadd.f32 0.014752088, %v698_v53  ;;  %v418_v61 = vmul.f32 %v417_v54, %v2510_v44  ;;  %v382_v1 = vmul.f32 %v381_v57, %v2495_v34 }
  0xe0   : > { %v443_v13 = vmul.f32 %v2529_v6, %v2529_v6  ;;  %v688_v18 = vadd.f32 0.0036580483, %v687_v10  ;;  %v407_v19 = vmul.f32 %v406_v11, %v2510_v44  ;;  %v371_v38 = vmul.f32 %v370_v25, %v2495_v34 }
  0xe1   : > { %v736_v56 = vmul.f32 3.8918573e-05, %v2519_v52  ;;  %v700_v4 = vmul.f32 %v699_v60, %v2505_v41  ;;  %v419_v5 = vadd.f32 0.014752088, %v418_v61  ;;  %v383_v9 = vadd.f32 0.4994258, %v382_v1 }
  0xe2   : > { %v725_v20 = vmul.f32 2.1237322e-06, %v2519_v52  ;;  %v2541_v22 = vmin.f32 %v443_v13, 16.0  ;;  %v689_v28 = vmul.f32 %v688_v18, %v2505_v41  ;;  %v408_v29 = vadd.f32 0.0036580483, %v407_v19  ;;  %v2015_v60 = vld [vmem:[#allocation7 + $0x20] sm:$0xff] }
  0xe3   : > { %v737_v0 = vadd.f32 0.001143296, %v736_v56  ;;  %v701_v12 = vadd.f32 0.112945676, %v700_v4  ;;  %v420_v14 = vmul.f32 %v419_v5, %v2510_v44  ;;  %v384_v17 = vmul.f32 %v383_v9, %v2495_v34  ;;  %1078 = vmatpush.bf16.msra.mxu1 %v2015_v60  ;;  %2031 = vmatpush.bf16.msra.mxu3 %v2015_v60 }
  0xe4   : > { %v2543_v24 = vpop.f32.mrf.mxu2  ;;  %v726_v30 = vadd.f32 0.00028619796, %v725_v20  ;;  %v456_v33 = vmul.f32 3.8918573e-05, %v2541_v22  ;;  %v690_v43 = vadd.f32 0.05243302, %v689_v28  ;;  %v409_v45 = vmul.f32 %v408_v29, %v2510_v44 }
  0xe5   : > { %v738_v8 = vmul.f32 %v737_v0, %v2519_v52  ;;  %v702_v21 = vmul.f32 %v701_v12, %v2505_v41  ;;  %v421_v23 = vadd.f32 0.112945676, %v420_v14  ;;  %v2546_v27 = vadd.f32 1.0, %v384_v17 }
  0xe6   : > { %v763_v35 = vmul.f32 %v2543_v24, %v2543_v24  ;;  %v457_v42 = vadd.f32 0.001143296, %v456_v33  ;;  %v727_v46 = vmul.f32 %v726_v30, %v2519_v52  ;;  %v372_v54 = vadd.f32 0.18741608, %v371_v38  ;;  %v2563_v59 = vpop.f32.mrf.mxu0  ;;  %v2014_v33 = vld [vmem:[#allocation7 + $0x18] sm:$0xff] }
  0xe7   : > { %v739_v16 = vadd.f32 0.014752088, %v738_v8  ;;  %v703_v31 = vadd.f32 0.4994258, %v702_v21  ;;  %v422_v37 = vmul.f32 %v421_v23, %v2510_v44  ;;  %2109 = vrcp.f32 %v2546_v27  ;;  %1079 = vmatpush.bf16.msra.mxu1 %v2014_v33  ;;  %2032 = vmatpush.bf16.msra.mxu3 %v2014_v33 }
  0xe8   : > { %v458_v50 = vmul.f32 %v457_v42, %v2541_v22  ;;  %v2559_v51 = vmin.f32 %v763_v35, 16.0  ;;  %v691_v56 = vmul.f32 %v690_v43, %v2505_v41  ;;  %v410_v57 = vadd.f32 0.05243302, %v409_v45 }
  0xe9   : > { %v740_v26 = vmul.f32 %v739_v16, %v2519_v52  ;;  %v704_v49 = vmul.f32 %v703_v31, %v2505_v41  ;;  %v423_v53 = vadd.f32 0.4994258, %v422_v37  ;;  %v728_v58 = vadd.f32 0.0036580483, %v727_v46 }
  0xea   : > { %v459_v62 = vadd.f32 0.014752088, %v458_v50  ;;  %v776_v63 = vmul.f32 3.8918573e-05, %v2559_v51  ;;  %v445_v2 = vmul.f32 2.1237322e-06, %v2541_v22  ;;  %v373_v3 = vmul.f32 %v372_v54, %v2495_v34 }
  0xeb   : > { %v741_v40 = vadd.f32 0.112945676, %v740_v26  ;;  %v2565_v61 = vadd.f32 1.0, %v704_v49  ;;  %v424_v1 = vmul.f32 %v423_v53, %v2510_v44  ;;  %v483_v7 = vmul.f32 %v2563_v59, %v2563_v59 }
  0xec   : > { %v777_v5 = vadd.f32 0.001143296, %v776_v63  ;;  %v2575_v8 = vpop.f32.mrf.mxu2  ;;  %v692_v9 = vadd.f32 0.18741608, %v691_v56  ;;  %v411_v10 = vmul.f32 %v410_v57, %v2510_v44  ;;  %v729_v11 = vmul.f32 %v728_v58, %v2519_v52  ;;  %v2013_v57 = vld [vmem:[#allocation7 + $0x10] sm:$0xff] }
  0xed   : > { %v742_v55 = vmul.f32 %v741_v40, %v2519_v52  ;;  %v2568_v0 = vpop.eup %2109  ;;  %2111 = vrcp.f32 %v2565_v61  ;;  %v460_v34 = vmul.f32 %v459_v62, %v2541_v22  ;;  %v2583_v13 = vmin.f32 %v483_v7, 16.0  ;;  %1080 = vmatpush.bf16.msra.mxu1 %v2013_v57  ;;  %2033 = vmatpush.bf16.msra.mxu3 %v2013_v57 }
  0xee   : > { %v387_v12 = vmul.f32 %v2568_v0, %v2546_v27  ;;  %v2585_v14 = vadd.f32 1.0, %v424_v1  ;;  %v446_v15 = vadd.f32 0.00028619796, %v445_v2  ;;  %v778_v16 = vmul.f32 %v777_v5, %v2559_v51 }
  0xef   : > { %v743_v4 = vadd.f32 0.4994258, %v742_v55  ;;  %v803_v17 = vmul.f32 %v2575_v8, %v2575_v8  ;;  %v374_v18 = vadd.f32 1.1283791, %v373_v3  ;;  %v412_v20 = vadd.f32 0.18741608, %v411_v10 }
  0xf0   : > { %v730_v21 = vadd.f32 0.05243302, %v729_v11  ;;  %v388_v23 = vsub.f32 1.0, %v387_v12  ;;  %v693_v25 = vmul.f32 %v692_v9, %v2505_v41  ;;  %v461_v26 = vadd.f32 0.112945676, %v460_v34  ;;  %v2632_v12 = vpop.f32.mrf.mxu0 }
  0xf1   : > { %v744_v19 = vmul.f32 %v743_v4, %v2519_v52  ;;  %v496_v28 = vmul.f32 3.8918573e-05, %v2583_v13  ;;  %2113 = vrcp.f32 %v2585_v14  ;;  %v447_v29 = vmul.f32 %v446_v15, %v2541_v22 }
  0xf2   : > { %v779_v30 = vadd.f32 0.014752088, %v778_v16  ;;  %v2595_v31 = vmin.f32 %v803_v17, 16.0  ;;  %v2600_v37 = vmul.f32 %v374_v18, %v2491_v32  ;;  %v765_v41 = vmul.f32 2.1237322e-06, %v2559_v51 }
  0xf3   : > { %v2597_v35 = vpop.eup %2111  ;;  %v2602_v38 = vadd.f32 1.0, %v744_v19  ;;  %v395_v40 = vand.u32 2147483647, %v2546_v27  ;;  %v397_v42 = vand.u32 2147483648, %v2546_v27  ;;  %v413_v43 = vmul.f32 %v412_v20, %v2510_v44 }
  0xf4   : > { %v816_v45 = vmul.f32 3.8918573e-05, %v2595_v31  ;;  %vm391_vm0 = vweird.f32 %v2546_v27  ;;  %v694_v46 = vadd.f32 1.1283791, %v693_v25  ;;  %v462_v32 = vmul.f32 %v461_v26, %v2541_v22 }
  0xf5   : > { %v497_v48 = vadd.f32 0.001143296, %v496_v28  ;;  %v389_v49 = vmul.f32 %v2568_v0, %v388_v23  ;;  %v731_v50 = vmul.f32 %v730_v21, %v2519_v52  ;;  %v448_v53 = vadd.f32 0.0036580483, %v447_v29 }
  0xf6   : > { %v780_v54 = vmul.f32 %v779_v30, %v2559_v51  ;;  %v707_v44 = vmul.f32 %v2597_v35, %v2565_v61  ;;  %2115 = vrcp.f32 %v2602_v38  ;;  %v766_v55 = vadd.f32 0.00028619796, %v765_v41 }
  0xf7   : > { %v817_v56 = vadd.f32 0.001143296, %v816_v45  ;;  %v2617_v58 = vpop.eup %2113  ;;  %vm392_vm1 = vweird.f32 %v2568_v0  ;;  %vm2620_vm2 = vcmp.eq.f32.partialorder %v395_v40, 8.507059e+37  ;;  %v398_v62 = vor.u32 1.1754944e-38, %v397_v42 }
  0xf8   : > { %v717_v63 = vand.u32 2147483648, %v2565_v61  ;;  %v414_v1 = vadd.f32 1.1283791, %v413_v43  ;;  %v2626_v2 = vmul.f32 %v694_v46, %v2498_v36  ;;  %v715_v3 = vand.u32 2147483647, %v2565_v61  ;;  %vm2651_vm3 = vmor %vm391_vm0, %vm392_vm1 }
  0xf9   : > { %v463_v4 = vadd.f32 0.4994258, %v462_v32  ;;  %v498_v5 = vmul.f32 %v497_v48, %v2583_v13  ;;  %v390_v7 = vadd.f32 %v2568_v0, %v389_v49  ;;  %v732_v9 = vadd.f32 0.18741608, %v731_v50 }
  0xfa   : > { %v449_v10 = vmul.f32 %v448_v53, %v2541_v22  ;;  %v781_v11 = vadd.f32 0.112945676, %v780_v54  ;;  %v708_v34 = vsub.f32 1.0, %v707_v44  ;;  %v427_v36 = vmul.f32 %v2617_v58, %v2585_v14 }
  0xfb   : > { %v767_v15 = vmul.f32 %v766_v55, %v2559_v51  ;;  %v818_v16 = vmul.f32 %v817_v56, %v2595_v31  ;;  %v2638_v17 = vor.u32 1.1754944e-38, %v717_v63  ;;  %v2641_v18 = vmul.f32 %v414_v1, %v2502_v39 }
  0xfc   : > { %v435_v19 = vand.u32 2147483647, %v2585_v14  ;;  %v485_v20 = vmul.f32 2.1237322e-06, %v2583_v13  ;;  %v2645_v21 = vpop.eup %2115  ;;  %vm711_vm4 = vweird.f32 %v2565_v61  ;;  %v437_v25 = vand.u32 2147483648, %v2585_v14 }
  0xfd   : > { %v464_v39 = vmul.f32 %v463_v4, %v2541_v22  ;;  %v499_v26 = vadd.f32 0.014752088, %v498_v5  ;;  %v523_v28 = vmul.f32 %v2632_v12, %v2632_v12  ;;  %v394_v29 = vsel %vm2651_vm3, %v2568_v0, %v390_v7 }
  0xfe   : > { %v733_v27 = vmul.f32 %v732_v9, %v2519_v52  ;;  %v450_v30 = vadd.f32 0.05243302, %v449_v10  ;;  %v782_v33 = vmul.f32 %v781_v11, %v2559_v51  ;;  %v709_v41 = vmul.f32 %v2597_v35, %v708_v34  ;;  %v2696_v9 = vpop.f32.mrf.mxu2 }
  0xff   : > { %v428_v40 = vsub.f32 1.0, %v427_v36  ;;  %v768_v42 = vadd.f32 0.0036580483, %v767_v15  ;;  %v819_v43 = vadd.f32 0.014752088, %v818_v16  ;;  %vm712_vm5 = vweird.f32 %v2597_v35 }
 0x100   : > { %v747_v45 = vmul.f32 %v2645_v21, %v2602_v38  ;;  %v486_v46 = vadd.f32 0.00028619796, %v485_v20  ;;  %v805_v32 = vmul.f32 2.1237322e-06, %v2595_v31  ;;  %v399_v0 = vsel %vm2620_vm2, %v398_v62, %v394_v29  ;;  %vm2702_vm9 = vmor %vm711_vm4, %vm712_vm5 }
 0x101   : > { %vm2672_vm6 = vcmp.eq.f32.partialorder %v715_v3, 8.507059e+37  ;;  %vm431_vm7 = vweird.f32 %v2585_v14  ;;  %v2677_v48 = vadd.f32 1.0, %v464_v39  ;;  %v500_v49 = vmul.f32 %v499_v26, %v2583_v13 }
 0x102   : > { %v2680_v50 = vmin.f32 %v523_v28, 16.0  ;;  %v2682_v53 = vor.u32 1.1754944e-38, %v437_v25  ;;  %v734_v54 = vadd.f32 1.1283791, %v733_v27  ;;  %v451_v44 = vmul.f32 %v450_v30, %v2541_v22 }
 0x103   : > { %v783_v55 = vadd.f32 0.4994258, %v782_v33  ;;  %v710_v56 = vadd.f32 %v2597_v35, %v709_v41  ;;  %v429_v57 = vmul.f32 %v2617_v58, %v428_v40  ;;  %v769_v60 = vmul.f32 %v768_v42, %v2559_v51  ;;  %v2744_v40 = vpop.f32.mrf.mxu0  ;;  %v2012_v42 = vld [vmem:[#allocation7 + $0x8] sm:$0xff] }
 0x104   : > { %v820_v62 = vmul.f32 %v819_v43, %v2595_v31  ;;  %v2690_v63 = vmul.f32 %v399_v0, %v2600_v37  ;;  %v748_v1 = vsub.f32 1.0, %v747_v45  ;;  %v487_v3 = vmul.f32 %v486_v46, %v2583_v13  ;;  %1081 = vmatpush.bf16.msra.mxu1 %v2012_v42  ;;  %2034 = vmatpush.bf16.msra.mxu3 %v2012_v42 }
 0x105   : > { %v806_v4 = vadd.f32 0.00028619796, %v805_v32  ;;  %vm432_vm8 = vweird.f32 %v2617_v58  ;;  %2117 = vrcp.f32 %v2677_v48  ;;  %v501_v5 = vadd.f32 0.112945676, %v500_v49 }
 0x106   : > { %v536_v7 = vmul.f32 3.8918573e-05, %v2680_v50  ;;  %vm2706_vm10 = vcmp.eq.f32.partialorder %v435_v19, 8.507059e+37  ;;  %v2711_v11 = vmul.f32 %v734_v54, %v2512_v47  ;;  %v755_v34 = vand.u32 2147483647, %v2602_v38  ;;  %vm2733_vm12 = vmor %vm431_vm7, %vm432_vm8 }
 0x107   : > { %v452_v36 = vadd.f32 0.18741608, %v451_v44  ;;  %v784_v15 = vmul.f32 %v783_v55, %v2559_v51  ;;  %v714_v61 = vsel %vm2702_vm9, %v2597_v35, %v710_v56  ;;  %v430_v16 = vadd.f32 %v2617_v58, %v429_v57  ;;  %v2011_v57 = vld [vmem:[#allocation7] sm:$0xff] }
 0x108   : > { %v770_v20 = vadd.f32 0.05243302, %v769_v60  ;;  %v821_v23 = vadd.f32 0.112945676, %v820_v62  ;;  %v749_v19 = vmul.f32 %v2645_v21, %v748_v1  ;;  %v488_v25 = vadd.f32 0.0036580483, %v487_v3  ;;  %1082 = vmatpush.bf16.msra.mxu1 %v2011_v57  ;;  %2035 = vmatpush.bf16.msra.mxu3 %v2011_v57 }
 0x109   : > { %v807_v39 = vmul.f32 %v806_v4, %v2595_v31  ;;  %v843_v47 = vmul.f32 %v2696_v9, %v2696_v9  ;;  %vm751_vm11 = vweird.f32 %v2602_v38  ;;  %v757_v26 = vand.u32 2147483648, %v2602_v38 }
 0x10a   : > { %v502_v28 = vmul.f32 %v501_v5, %v2583_v13  ;;  %v537_v29 = vadd.f32 0.001143296, %v536_v7  ;;  %v719_v35 = vsel %vm2672_vm6, %v2638_v17, %v714_v61  ;;  %vm2737_vm13 = vcmp.eq.f32.partialorder %v755_v34, 8.507059e+37  ;;  %v2779_v5 = vpop.f32.mrf.mxu2 }
 0x10b   : > { %v453_v33 = vmul.f32 %v452_v36, %v2541_v22  ;;  %v2742_v41 = vadd.f32 1.0, %v784_v15  ;;  %v2746_v17 = vpop.eup %2117  ;;  %v434_v14 = vsel %vm2733_vm12, %v2617_v58, %v430_v16  ;;  %vm752_vm14 = vweird.f32 %v2645_v21 }
 0x10c   : > { %v771_v43 = vmul.f32 %v770_v20, %v2559_v51  ;;  %v822_v45 = vmul.f32 %v821_v23, %v2595_v31  ;;  %v750_v46 = vadd.f32 %v2645_v21, %v749_v19  ;;  %v489_v22 = vmul.f32 %v488_v25, %v2583_v13  ;;  %vm2775_vm15 = vmor %vm751_vm11, %vm752_vm14 }
 0x10d   : > { %v808_v32 = vadd.f32 0.0036580483, %v807_v39  ;;  %v2756_v0 = vmin.f32 %v843_v47, 16.0  ;;  %v503_v52 = vadd.f32 0.4994258, %v502_v28  ;;  %v538_v58 = vmul.f32 %v537_v29, %v2680_v50 }
 0x10e   : > { %v525_v49 = vmul.f32 2.1237322e-06, %v2680_v50  ;;  %v563_v54 = vmul.f32 %v2744_v40, %v2744_v40  ;;  %v758_v44 = vor.u32 1.1754944e-38, %v757_v26  ;;  %v454_v55 = vadd.f32 1.1283791, %v453_v33 }
 0x10f   : > { %v467_v56 = vmul.f32 %v2746_v17, %v2677_v48  ;;  %2119 = vrcp.f32 %v2742_v41  ;;  %v2766_v60 = vmul.f32 %v719_v35, %v2626_v2  ;;  %v439_v62 = vsel %vm2706_vm10, %v2682_v53, %v434_v14 }
 0x110   : > { %v772_v3 = vadd.f32 0.18741608, %v771_v43  ;;  %v823_v4 = vadd.f32 0.4994258, %v822_v45  ;;  %v754_v2 = vsel %vm2775_vm15, %v2645_v21, %v750_v46  ;;  %v490_v7 = vadd.f32 0.05243302, %v489_v22 }
 0x111   : > { %v809_v37 = vmul.f32 %v808_v32, %v2595_v31  ;;  %v856_v53 = vmul.f32 3.8918573e-05, %v2756_v0  ;;  %v504_v38 = vmul.f32 %v503_v52, %v2583_v13  ;;  %v526_v10 = vadd.f32 0.00028619796, %v525_v49 }
 0x112   : > { %v539_v34 = vadd.f32 0.014752088, %v538_v58  ;;  %v2787_v36 = vmin.f32 %v563_v54, 16.0  ;;  %v2790_v15 = vmul.f32 %v439_v62, %v2641_v18  ;;  %v2793_v61 = vmul.f32 %v454_v55, %v2529_v6 }
 0x113   : > { %v468_v21 = vsub.f32 1.0, %v467_v56  ;;  %v883_v16 = vmul.f32 %v2779_v5, %v2779_v5  ;;  %v759_v20 = vsel %vm2737_vm13, %v758_v44, %v754_v2  ;;  %v475_v23 = vand.u32 2147483647, %v2677_v48 }
 0x114   : > { %v824_v19 = vmul.f32 %v823_v4, %v2595_v31  ;;  %v576_v25 = vmul.f32 3.8918573e-05, %v2787_v36  ;;  %v773_v18 = vmul.f32 %v772_v3, %v2559_v51  ;;  %v491_v6 = vmul.f32 %v490_v7, %v2583_v13 }
 0x115   : > { %v2802_v39 = vpop.eup %2119  ;;  %v810_v47 = vadd.f32 0.05243302, %v809_v37  ;;  %v857_v26 = vadd.f32 0.001143296, %v856_v53  ;;  %vm471_vm0 = vweird.f32 %v2677_v48  ;;  %v2807_v28 = vadd.f32 1.0, %v504_v38 }
 0x116   : > { %v527_v29 = vmul.f32 %v526_v10, %v2680_v50  ;;  %v540_v35 = vmul.f32 %v539_v34, %v2680_v50  ;;  %v469_v27 = vmul.f32 %v2746_v17, %v468_v21  ;;  %v845_v30 = vmul.f32 2.1237322e-06, %v2756_v0 }
 0x117   : > { %v577_v33 = vadd.f32 0.001143296, %v576_v25  ;;  %v2813_v42 = vmin.f32 %v883_v16, 16.0  ;;  %v2816_v51 = vmul.f32 %v759_v20, %v2711_v11  ;;  %v477_v14 = vand.u32 2147483648, %v2677_v48 }
 0x118   : > { %v787_v43 = vmul.f32 %v2802_v39, %v2742_v41  ;;  %v2821_v45 = vadd.f32 1.0, %v824_v19  ;;  %vm2823_vm1 = vcmp.eq.f32.partialorder %v475_v23, 8.507059e+37  ;;  %v774_v22 = vadd.f32 1.1283791, %v773_v18 }
 0x119   : > { %v492_v32 = vadd.f32 0.18741608, %v491_v6  ;;  %v811_v52 = vmul.f32 %v810_v47, %v2595_v31  ;;  %v858_v49 = vmul.f32 %v857_v26, %v2756_v0  ;;  %2121 = vrcp.f32 %v2807_v28  ;;  %v2861_v47 = vpop.f32.mrf.mxu0 }
 0x11a   : > { %v528_v11 = vadd.f32 0.0036580483, %v527_v29  ;;  %v541_v58 = vadd.f32 0.112945676, %v540_v35  ;;  %v578_v54 = vmul.f32 %v577_v33, %v2787_v36  ;;  %v470_v44 = vadd.f32 %v2746_v17, %v469_v27 }
 0x11b   : > { %vm472_vm2 = vweird.f32 %v2746_v17  ;;  %v846_v55 = vadd.f32 0.00028619796, %v845_v30  ;;  %v896_v56 = vmul.f32 3.8918573e-05, %v2813_v42  ;;  %v788_v57 = vsub.f32 1.0, %v787_v43 }
 0x11c   : > { %2123 = vrcp.f32 %v2821_v45  ;;  %v565_v62 = vmul.f32 2.1237322e-06, %v2787_v36  ;;  %v579_v1 = vadd.f32 0.014752088, %v578_v54  ;;  %v797_v3 = vand.u32 2147483648, %v2742_v41  ;;  %vm2840_vm3 = vmor %vm471_vm0, %vm472_vm2 }
 0x11d   : > { %v493_v4 = vmul.f32 %v492_v32, %v2583_v13  ;;  %v812_v2 = vadd.f32 0.18741608, %v811_v52  ;;  %v859_v7 = vadd.f32 0.014752088, %v858_v49  ;;  %v478_v53 = vor.u32 1.1754944e-38, %v477_v14 }
 0x11e   : > { %v529_v38 = vmul.f32 %v528_v11, %v2680_v50  ;;  %v542_v10 = vmul.f32 %v541_v58, %v2680_v50  ;;  %v897_v34 = vadd.f32 0.001143296, %v896_v56  ;;  %v474_v21 = vsel %vm2840_vm3, %v2746_v17, %v470_v44 }
 0x11f   : > { %v2850_v13 = vmul.f32 %v774_v22, %v2543_v24  ;;  %v795_v16 = vand.u32 2147483647, %v2742_v41  ;;  %v847_v48 = vmul.f32 %v846_v55, %v2756_v0  ;;  %v2854_v20 = vpop.eup %2121  ;;  %v789_v23 = vmul.f32 %v2802_v39, %v788_v57 }
 0x120   : > { %vm791_vm4 = vweird.f32 %v2742_v41  ;;  %v566_v19 = vadd.f32 0.00028619796, %v565_v62  ;;  %v580_v25 = vmul.f32 %v579_v1, %v2787_v36  ;;  %v798_v18 = vor.u32 1.1754944e-38, %v797_v3  ;;  %v2890_v62 = vpop.f32.mrf.mxu2 }
 0x121   : > { %v494_v6 = vadd.f32 1.1283791, %v493_v4  ;;  %v813_v17 = vmul.f32 %v812_v2, %v2595_v31  ;;  %v860_v24 = vmul.f32 %v859_v7, %v2756_v0  ;;  %v479_v29 = vsel %vm2823_vm1, %v478_v53, %v474_v21 }
 0x122   : > { %v2863_v26 = vpop.eup %2123  ;;  %v530_v35 = vadd.f32 0.05243302, %v529_v38  ;;  %v543_v27 = vadd.f32 0.4994258, %v542_v10  ;;  %v898_v30 = vmul.f32 %v897_v34, %v2813_v42  ;;  %vm792_vm5 = vweird.f32 %v2802_v39 }
 0x123   : > { %vm2869_vm6 = vcmp.eq.f32.partialorder %v795_v16, 8.507059e+37  ;;  %v507_v31 = vmul.f32 %v2854_v20, %v2807_v28  ;;  %v848_v14 = vadd.f32 0.0036580483, %v847_v48  ;;  %v581_v43 = vadd.f32 0.112945676, %v580_v25  ;;  %vm2896_vm7 = vmor %vm791_vm4, %vm792_vm5 }
 0x124   : > { %v790_v22 = vadd.f32 %v2802_v39, %v789_v23  ;;  %v517_v46 = vand.u32 2147483648, %v2807_v28  ;;  %v567_v32 = vmul.f32 %v566_v19, %v2787_v36  ;;  %v603_v52 = vmul.f32 %v2861_v47, %v2861_v47 }
 0x125   : > { %v2881_v49 = vmul.f32 %v479_v29, %v2793_v61  ;;  %v2884_v11 = vmul.f32 %v494_v6, %v2563_v59  ;;  %v827_v58 = vmul.f32 %v2863_v26, %v2821_v45  ;;  %v861_v54 = vadd.f32 0.112945676, %v860_v24 }
 0x126   : > { %v814_v44 = vadd.f32 1.1283791, %v813_v17  ;;  %v531_v55 = vmul.f32 %v530_v35, %v2680_v50  ;;  %v544_v56 = vmul.f32 %v543_v27, %v2680_v50  ;;  %v899_v57 = vadd.f32 0.014752088, %v898_v30 }
 0x127   : > { %v508_v59 = vsub.f32 1.0, %v507_v31  ;;  %v515_v1 = vand.u32 2147483647, %v2807_v28  ;;  %v849_v3 = vmul.f32 %v848_v14, %v2756_v0  ;;  %v582_v4 = vmul.f32 %v581_v43, %v2787_v36  ;;  %v2933_v14 = vpop.f32.mrf.mxu0 }
 0x128   : > { %v794_v2 = vsel %vm2896_vm7, %v2802_v39, %v790_v22  ;;  %v518_v7 = vor.u32 1.1754944e-38, %v517_v46  ;;  %v568_v37 = vadd.f32 0.0036580483, %v567_v32  ;;  %v2906_v53 = vmin.f32 %v603_v52, 16.0 }
 0x129   : > { %vm511_vm8 = vweird.f32 %v2807_v28  ;;  %v828_v41 = vsub.f32 1.0, %v827_v58  ;;  %v862_v38 = vmul.f32 %v861_v54, %v2756_v0  ;;  %v885_v10 = vmul.f32 2.1237322e-06, %v2813_v42 }
 0x12a   : > { %v923_v34 = vmul.f32 %v2890_v62, %v2890_v62  ;;  %v2914_v21 = vmul.f32 %v814_v44, %v2575_v8  ;;  %v532_v16 = vadd.f32 0.18741608, %v531_v55  ;;  %v2916_v48 = vadd.f32 1.0, %v544_v56 }
 0x12b   : > { %v900_v39 = vmul.f32 %v899_v57, %v2813_v42  ;;  %v509_v23 = vmul.f32 %v2854_v20, %v508_v59  ;;  %vm831_vm9 = vweird.f32 %v2821_v45  ;;  %v850_v19 = vadd.f32 0.05243302, %v849_v3 }
 0x12c   : > { %v583_v25 = vadd.f32 0.4994258, %v582_v4  ;;  %v799_v6 = vsel %vm2869_vm6, %v798_v18, %v794_v2  ;;  %v835_v17 = vand.u32 2147483647, %v2821_v45  ;;  %v569_v24 = vmul.f32 %v568_v37, %v2787_v36 }
 0x12d   : > { %v616_v8 = vmul.f32 3.8918573e-05, %v2906_v53  ;;  %vm2926_vm10 = vcmp.eq.f32.partialorder %v515_v1, 8.507059e+37  ;;  %v829_v35 = vmul.f32 %v2863_v26, %v828_v41  ;;  %v863_v27 = vadd.f32 0.4994258, %v862_v38 }
 0x12e   : > { %v886_v30 = vadd.f32 0.00028619796, %v885_v10  ;;  %v2931_v31 = vmin.f32 %v923_v34, 16.0  ;;  %vm512_vm11 = vweird.f32 %v2854_v20  ;;  %v533_v18 = vmul.f32 %v532_v16, %v2680_v50 }
 0x12f   : > { %2125 = vrcp.f32 %v2916_v48  ;;  %v901_v33 = vadd.f32 0.112945676, %v900_v39  ;;  %v510_v43 = vadd.f32 %v2854_v20, %v509_v23  ;;  %v837_v22 = vand.u32 2147483648, %v2821_v45  ;;  %vm2956_vm13 = vmor %vm511_vm8, %vm512_vm11 }
 0x130   : > { %v851_v46 = vmul.f32 %v850_v19, %v2756_v0  ;;  %v584_v32 = vmul.f32 %v583_v25, %v2787_v36  ;;  %vm832_vm12 = vweird.f32 %v2863_v26  ;;  %v570_v52 = vadd.f32 0.05243302, %v569_v24 }
 0x131   : > { %v617_v58 = vadd.f32 0.001143296, %v616_v8  ;;  %v643_v54 = vmul.f32 %v2933_v14, %v2933_v14  ;;  %v830_v50 = vadd.f32 %v2863_v26, %v829_v35  ;;  %v864_v44 = vmul.f32 %v863_v27, %v2756_v0  ;;  %vm2973_vm14 = vmor %vm831_vm9, %vm832_vm12 }
 0x132   : > { %v887_v55 = vmul.f32 %v886_v30, %v2813_v42  ;;  %v936_v56 = vmul.f32 3.8918573e-05, %v2931_v31  ;;  %v2950_v57 = vmul.f32 %v799_v6, %v2850_v13  ;;  %v534_v59 = vadd.f32 1.1283791, %v533_v18 }
 0x133   : > { %v902_v1 = vmul.f32 %v901_v33, %v2813_v42  ;;  %v618_v3 = vmul.f32 %v617_v58, %v2906_v53  ;;  %v514_v4 = vsel %vm2956_vm13, %v2854_v20, %v510_v43  ;;  %v852_v2 = vadd.f32 0.18741608, %v851_v46 }
 0x134   : > { %v2965_v13 = vadd.f32 1.0, %v584_v32  ;;  %v937_v37 = vadd.f32 0.001143296, %v936_v56  ;;  %vm2977_vm15 = vcmp.eq.f32.partialorder %v835_v17, 8.507059e+37  ;;  %v838_v10 = vor.u32 1.1754944e-38, %v837_v22 }
 0x135   : > { %v2967_v41 = vpop.eup %2125  ;;  %v571_v20 = vmul.f32 %v570_v52, %v2787_v36  ;;  %v2982_v34 = vmin.f32 %v643_v54, 16.0  ;;  %v834_v16 = vsel %vm2973_vm14, %v2863_v26, %v830_v50  ;;  %v2987_v39 = vadd.f32 1.0, %v864_v44 }
 0x136   : > { %v888_v45 = vadd.f32 0.0036580483, %v887_v55  ;;  %v605_v23 = vmul.f32 2.1237322e-06, %v2906_v53  ;;  %v519_v19 = vsel %vm2926_vm10, %v518_v7, %v514_v4  ;;  %v2993_v25 = vmul.f32 %v534_v59, %v2632_v12  ;;  %v3020_v55 = vpop.f32.mrf.mxu2 }
 0x137   : > { %v903_v6 = vadd.f32 0.4994258, %v902_v1  ;;  %v619_v17 = vadd.f32 0.014752088, %v618_v3  ;;  %v547_v24 = vmul.f32 %v2967_v41, %v2916_v48  ;;  %v853_v8 = vmul.f32 %v852_v2, %v2756_v0 }
 0x138   : > { %2127 = vrcp.f32 %v2965_v13  ;;  %v938_v26 = vmul.f32 %v937_v37, %v2931_v31  ;;  %v839_v35 = vsel %vm2977_vm15, %v838_v10, %v834_v16  ;;  %v572_v27 = vadd.f32 0.18741608, %v571_v20 }
 0x139   : > { %v620_v7 = vmul.f32 %v619_v17, %v2906_v53  ;;  %v656_v12 = vmul.f32 3.8918573e-05, %v2982_v34  ;;  %2129 = vrcp.f32 %v2987_v39  ;;  %v889_v29 = vmul.f32 %v888_v45, %v2813_v42 }
 0x13a   : > { %v606_v30 = vadd.f32 0.00028619796, %v605_v23  ;;  %v939_v18 = vadd.f32 0.014752088, %v938_v26  ;;  %v3007_v0 = vmul.f32 %v519_v19, %v2884_v11  ;;  %v904_v33 = vmul.f32 %v903_v6, %v2813_v42 }
 0x13b   : > { %v621_v43 = vadd.f32 0.112945676, %v620_v7  ;;  %v657_v22 = vadd.f32 0.001143296, %v656_v12  ;;  %v3011_v46 = vmul.f32 %v839_v35, %v2914_v21  ;;  %v548_v32 = vsub.f32 1.0, %v547_v24 }
 0x13c   : > { %v555_v52 = vand.u32 2147483647, %v2916_v48  ;;  %v645_v58 = vmul.f32 2.1237322e-06, %v2982_v34  ;;  %v557_v54 = vand.u32 2147483648, %v2916_v48  ;;  %v573_v44 = vmul.f32 %v572_v27, %v2787_v36 }
 0x13d   : > { %v3016_v50 = vadd.f32 1.1283791, %v853_v8  ;;  %v622_v11 = vmul.f32 %v621_v43, %v2906_v53  ;;  %vm551_vm0 = vweird.f32 %v2916_v48  ;;  %v890_v21 = vadd.f32 0.05243302, %v889_v29 }
 0x13e   : > { %v3022_v56 = vpop.eup %2127  ;;  %v607_v61 = vmul.f32 %v606_v30, %v2906_v53  ;;  %v940_v59 = vmul.f32 %v939_v18, %v2931_v31  ;;  %v658_v1 = vmul.f32 %v657_v22, %v2982_v34  ;;  %v3028_v3 = vadd.f32 1.0, %v904_v33 }
 0x13f   : > { %v623_v4 = vadd.f32 0.4994258, %v622_v11  ;;  %v1933_v36 = vclamps-f32 %v2690_v63, 1.0  ;;  %v1934_v2 = vclamps-f32 %v2790_v15, 1.0  ;;  %v3032_v37 = vpop.eup %2129  ;;  %v549_v28 = vmul.f32 %v2967_v41, %v548_v32 }
 0x140   : > { %v646_v38 = vadd.f32 0.00028619796, %v645_v58  ;;  %v659_v10 = vadd.f32 0.014752088, %v658_v1  ;;  %v963_v20 = vmul.f32 %v3020_v55, %v3020_v55  ;;  %v3037_v16 = vor.u32 1.1754944e-38, %v557_v54 }
 0x141   : > { %v574_v45 = vadd.f32 1.1283791, %v573_v44  ;;  %v587_v23 = vmul.f32 %v3022_v56, %v2965_v13  ;;  %v1003_v19 = vpack.c.bf16 %v1934_v2, %v1933_v36  ;;  %v891_v63 = vmul.f32 %v890_v21, %v2813_v42 }
 0x142   : > { %v624_v15 = vmul.f32 %v623_v4, %v2906_v53  ;;  %v941_v6 = vadd.f32 0.112945676, %v940_v59  ;;  %v660_v17 = vmul.f32 %v659_v10, %v2982_v34  ;;  %vm552_vm1 = vweird.f32 %v2967_v41 }
 0x143   : > { %v867_v24 = vmul.f32 %v3032_v37, %v2987_v39  ;;  %2131 = vrcp.f32 %v3028_v3  ;;  %v608_v8 = vadd.f32 0.0036580483, %v607_v61  ;;  %1083 = vmatmul.bf16.vlgmr.msra.gmra.mxu1 %v1003_v19  ;;  %v550_v26 = vadd.f32 %v2967_v41, %v549_v28  ;;  %vm3069_vm3 = vmor %vm551_vm0, %vm552_vm1 }
 0x144   : > { %v647_v35 = vmul.f32 %v646_v38, %v2982_v34  ;;  %v661_v27 = vadd.f32 0.112945676, %v660_v17  ;;  %v3050_v7 = vmin.f32 %v963_v20, 16.0  ;;  %v875_v12 = vand.u32 2147483647, %v2987_v39 }
 0x145   : > { %v877_v29 = vand.u32 2147483648, %v2987_v39  ;;  %v588_v30 = vsub.f32 1.0, %v587_v23  ;;  %v925_v18 = vmul.f32 2.1237322e-06, %v2931_v31  ;;  %vm3055_vm2 = vcmp.eq.f32.partialorder %v555_v52, 8.507059e+37 }
 0x146   : > { %v3060_v43 = vmul.f32 %v574_v45, %v2744_v40  ;;  %v892_v22 = vadd.f32 0.18741608, %v891_v63  ;;  %v3062_v32 = vadd.f32 1.0, %v624_v15  ;;  %v942_v58 = vmul.f32 %v941_v6, %v2931_v31 }
 0x147   : > { %v868_v52 = vsub.f32 1.0, %v867_v24  ;;  %vm591_vm4 = vweird.f32 %v2965_v13  ;;  %v609_v44 = vmul.f32 %v608_v8, %v2906_v53  ;;  %v662_v40 = vmul.f32 %v661_v27, %v2982_v34 }
 0x148   : > { %v554_v11 = vsel %vm3069_vm3, %v2967_v41, %v550_v26  ;;  %v595_v21 = vand.u32 2147483647, %v2965_v13  ;;  %v648_v61 = vadd.f32 0.0036580483, %v647_v35  ;;  %v976_v48 = vmul.f32 3.8918573e-05, %v3050_v7 }
 0x149   : > { %v3081_v59 = vpop.eup %2131  ;;  %vm872_vm5 = vweird.f32 %v3032_v37  ;;  %v589_v1 = vmul.f32 %v3022_v56, %v588_v30  ;;  %v597_v4 = vand.u32 2147483648, %v2965_v13  ;;  %v926_v36 = vadd.f32 0.00028619796, %v925_v18 }
 0x14a   : > { %v663_v2 = vadd.f32 0.4994258, %v662_v40  ;;  %2133 = vrcp.f32 %v3062_v32  ;;  %v943_v28 = vadd.f32 0.4994258, %v942_v58  ;;  %v965_v41 = vmul.f32 2.1237322e-06, %v3050_v7 }
 0x14b   : > { %v1942_v38 = vclamps-f32 %v2816_v51, 1.0  ;;  %v869_v10 = vmul.f32 %v3032_v37, %v868_v52  ;;  %vm871_vm6 = vweird.f32 %v2987_v39  ;;  %v610_v20 = vadd.f32 0.05243302, %v609_v44 }
 0x14c   : > { %v664_v45 = vmul.f32 %v663_v2, %v2982_v34  ;;  %v977_v23 = vadd.f32 0.001143296, %v976_v48  ;;  %vm592_vm7 = vweird.f32 %v3022_v56  ;;  %v907_v19 = vmul.f32 %v3081_v59, %v3028_v3  ;;  %vm3140_vm10 = vmor %vm871_vm6, %vm872_vm5 }
 0x14d   : > { %v649_v63 = vmul.f32 %v648_v61, %v2982_v34  ;;  %v1941_v15 = vclamps-f32 %v2766_v60, 1.0  ;;  %v590_v6 = vadd.f32 %v3022_v56, %v589_v1  ;;  %v927_v51 = vmul.f32 %v926_v36, %v2931_v31  ;;  %vm3116_vm8 = vmor %vm591_vm4, %vm592_vm7 }
 0x14e   : > { %v3099_v17 = vadd.f32 1.0, %v664_v45  ;;  %v978_v24 = vmul.f32 %v977_v23, %v3050_v7  ;;  %v944_v8 = vmul.f32 %v943_v28, %v2931_v31  ;;  %v966_v26 = vadd.f32 0.00028619796, %v965_v41 }
 0x14f   : > { %v1007_v35 = vpack.c.bf16 %v1942_v38, %v1941_v15  ;;  %v1936_v27 = vclamps-f32 %v3007_v0, 1.0  ;;  %v559_v30 = vsel %vm3055_vm2, %v3037_v16, %v554_v11  ;;  %v893_v60 = vmul.f32 %v892_v22, %v2813_v42 }
 0x150   : > { %2135 = vrcp.f32 %v3099_v17  ;;  %v1935_v18 = vclamps-f32 %v2881_v49, 1.0  ;;  %v3110_v58 = vpop.eup %2133  ;;  %v598_v0 = vor.u32 1.1754944e-38, %v597_v4  ;;  %v908_v52 = vsub.f32 1.0, %v907_v19 }
 0x151   : > { %v650_v33 = vadd.f32 0.05243302, %v649_v63  ;;  %v979_v16 = vadd.f32 0.014752088, %v978_v24  ;;  %1103 = vmatmul.bf16.vlgmr.msra.gmra.mxu3 %v1007_v35  ;;  %v3121_v42 = vadd.f32 %v3032_v37, %v869_v10  ;;  %v594_v49 = vsel %vm3116_vm8, %v3022_v56, %v590_v6 }
 0x152   : > { %v611_v22 = vmul.f32 %v610_v20, %v2906_v53  ;;  %v1004_v44 = vpack.c.bf16 %v1936_v27, %v1935_v18  ;;  %v928_v13 = vadd.f32 0.0036580483, %v927_v51  ;;  %v3127_v40 = vadd.f32 1.0, %v944_v8 }
 0x153   : > { %v967_v11 = vmul.f32 %v966_v26, %v3050_v7  ;;  %v980_v61 = vmul.f32 %v979_v16, %v3050_v7  ;;  %v560_v48 = vmul.f32 %v559_v30, %v2993_v25  ;;  %vm596_vm9 = vcmp.eq.f32.partialorder %v595_v21, 8.507059e+37 }
 0x154   : > { %v3132_v1 = vadd.f32 1.1283791, %v893_v60  ;;  %v627_v4 = vmul.f32 %v3110_v58, %v3062_v32  ;;  %1088 = vmatmul.bf16.gmra.mxu1 %v1004_v44  ;;  %v599_v36 = vsel %vm596_vm9, %v598_v0, %v594_v49  ;;  %v909_v2 = vmul.f32 %v3081_v59, %v908_v52 }
 0x155   : > { %v651_v25 = vmul.f32 %v650_v33, %v2982_v34  ;;  %v981_v21 = vadd.f32 0.112945676, %v980_v61  ;;  %v874_v41 = vsel %vm3140_vm10, %v3032_v37, %v3121_v42  ;;  %v915_v38 = vand.u32 2147483647, %v3028_v3 }
 0x156   : > { %v3146_v28 = vpop.eup %2135  ;;  %v917_v10 = vand.u32 2147483648, %v3028_v3  ;;  %v612_v20 = vadd.f32 0.18741608, %v611_v22  ;;  %v929_v45 = vmul.f32 %v928_v13, %v2931_v31  ;;  %2137 = vrcp.f32 %v3127_v40 }
 0x157   : > { %v667_v23 = vmul.f32 %v3146_v28, %v3099_v17  ;;  %v968_v19 = vadd.f32 0.0036580483, %v967_v11  ;;  %v600_v63 = vmul.f32 %v599_v36, %v3060_v43  ;;  %vm912_vm11 = vweird.f32 %v3081_v59 }
 0x158   : > { %v628_v15 = vsub.f32 1.0, %v627_v4  ;;  %v982_v37 = vmul.f32 %v981_v21, %v3050_v7  ;;  %v910_v6 = vadd.f32 %v3081_v59, %v909_v2  ;;  %v652_v51 = vadd.f32 0.18741608, %v651_v25 }
 0x159   : > { %v668_v24 = vsub.f32 1.0, %v667_v23  ;;  %v1944_v8 = vclamps-f32 %v3011_v46, 1.0  ;;  %vm3165_vm12 = vcmp.eq.f32.partialorder %v875_v12, 8.507059e+37  ;;  %vm911_vm13 = vweird.f32 %v3028_v3 }
 0x15a   : > { %vm3170_vm14 = vcmp.eq.f32.partialorder %v915_v38, 8.507059e+37  ;;  %v918_v35 = vor.u32 1.1754944e-38, %v917_v10  ;;  %v983_v27 = vadd.f32 0.4994258, %v982_v37  ;;  %v613_v30 = vmul.f32 %v612_v20, %v2906_v53  ;;  %vm3180_vm15 = vmor %vm911_vm13, %vm912_vm11 }
 0x15b   : > { %v669_v60 = vmul.f32 %v3146_v28, %v668_v24  ;;  %v969_v46 = vmul.f32 %v968_v19, %v3050_v7  ;;  %v1943_v18 = vclamps-f32 %v2950_v57, 1.0  ;;  %v629_v3 = vmul.f32 %v3110_v58, %v628_v15 }
 0x15c   : > { %v930_v54 = vadd.f32 0.05243302, %v929_v45  ;;  %v984_v0 = vmul.f32 %v983_v27, %v3050_v7  ;;  %v1938_v52 = vclamps-f32 %v600_v63, 1.0  ;;  %v3186_v33 = vpop.eup %2137  ;;  %v914_v53 = vsel %vm3180_vm15, %v3081_v59, %v910_v6 }
 0x15d   : > { %vm632_vm0 = vweird.f32 %v3110_v58  ;;  %v653_v57 = vmul.f32 %v652_v51, %v2982_v34  ;;  %v1008_v16 = vpack.c.bf16 %v1944_v8, %v1943_v18  ;;  %v670_v42 = vadd.f32 %v3146_v28, %v669_v60 }
 0x15e   : > { %vm672_vm1 = vweird.f32 %v3146_v28  ;;  %v3195_v49 = vadd.f32 1.0, %v984_v0  ;;  %v1937_v22 = vclamps-f32 %v560_v48, 1.0  ;;  %vm671_vm2 = vweird.f32 %v3099_v17 }
 0x15f   : > { %v675_v44 = vand.u32 2147483647, %v3099_v17  ;;  %v677_v13 = vand.u32 2147483648, %v3099_v17  ;;  %v970_v11 = vadd.f32 0.05243302, %v969_v46  ;;  %v630_v59 = vadd.f32 %v3110_v58, %v629_v3  ;;  %vm3212_vm3 = vmor %vm671_vm2, %vm672_vm1 }
 0x160   : > { %v947_v34 = vmul.f32 %v3186_v33, %v3127_v40  ;;  %2139 = vrcp.f32 %v3195_v49  ;;  %v1005_v61 = vpack.c.bf16 %v1938_v52, %v1937_v22  ;;  %v878_v4 = vor.u32 1.1754944e-38, %v877_v29 }
 0x161   : > { %v919_v48 = vsel %vm3170_vm14, %v918_v35, %v914_v53  ;;  %v637_v56 = vand.u32 2147483648, %v3062_v32  ;;  %v931_v36 = vmul.f32 %v930_v54, %v2931_v31  ;;  %1108 = vmatmul.bf16.gmra.mxu3 %v1008_v16  ;;  %vm631_vm4 = vweird.f32 %v3062_v32 }
 0x162   : > { %v635_v2 = vand.u32 2147483647, %v3062_v32  ;;  %v654_v39 = vadd.f32 1.1283791, %v653_v57  ;;  %v674_v29 = vsel %vm3212_vm3, %v3146_v28, %v670_v42  ;;  %v879_v25 = vsel %vm3165_vm12, %v878_v4, %v874_v41  ;;  %vm3227_vm5 = vmor %vm631_vm4, %vm632_vm0 }
 0x163   : > { %v895_v21 = vmul.f32 %v3132_v1, %v2779_v5  ;;  %v678_v10 = vor.u32 1.1754944e-38, %v677_v13  ;;  %v971_v32 = vmul.f32 %v970_v11, %v3050_v7  ;;  %v614_v20 = vadd.f32 1.1283791, %v613_v30 }
 0x164   : > { %v634_v28 = vsel %vm3227_vm5, %v3110_v58, %v630_v59  ;;  %v948_v45 = vsub.f32 1.0, %v947_v34  ;;  %vm676_vm6 = vcmp.eq.f32.partialorder %v675_v44, 8.507059e+37  ;;  %1093 = vmatmul.bf16.gmra.mxu1 %v1005_v61  ;;  %v855_v5 = vmul.f32 %v3016_v50, %v2696_v9 }
 0x165   : > { %v920_v1 = vmul.f32 %v919_v48, %v895_v21  ;;  %v638_v41 = vor.u32 1.1754944e-38, %v637_v56  ;;  %v679_v23 = vsel %vm676_vm6, %v678_v10, %v674_v29  ;;  %vm636_vm7 = vcmp.eq.f32.partialorder %v635_v2, 8.507059e+37 }
 0x166   : > { %v2140_v19 = vpop.eup %2139  ;;  %v932_v63 = vadd.f32 0.18741608, %v931_v36  ;;  %v655_v15 = vmul.f32 %v654_v39, %v2933_v14  ;;  %v880_v37 = vmul.f32 %v879_v25, %v855_v5  ;;  %v972_v51 = vadd.f32 0.18741608, %v971_v32 }
 0x167   : > { %v639_v6 = vsel %vm636_vm7, %v638_v41, %v634_v28  ;;  %v987_v24 = vmul.f32 %v2140_v19, %v3195_v49  ;;  %v615_v58 = vmul.f32 %v614_v20, %v2861_v47  ;;  %v949_v8 = vmul.f32 %v3186_v33, %v948_v45 }
 0x168   : > { %v680_v26 = vmul.f32 %v679_v23, %v655_v15  ;;  %v1946_v9 = vclamps-f32 %v920_v1, 1.0  ;;  %v933_v35 = vmul.f32 %v932_v63, %v2931_v31  ;;  %v973_v27 = vmul.f32 %v972_v51, %v3050_v7 }
 0x169   : > { %v988_v43 = vsub.f32 1.0, %v987_v24  ;;  %v640_v50 = vmul.f32 %v639_v6, %v615_v58  ;;  %vm992_vm8 = vweird.f32 %v2140_v19  ;;  %v1945_v14 = vclamps-f32 %v880_v37, 1.0 }
 0x16a   : > { %v950_v60 = vadd.f32 %v3186_v33, %v949_v8  ;;  %vm952_vm9 = vweird.f32 %v3186_v33  ;;  %v1940_v46 = vclamps-f32 %v680_v26, 1.0  ;;  %v997_v47 = vand.u32 2147483648, %v3195_v49 }
 0x16b   : > { %v989_v30 = vmul.f32 %v2140_v19, %v988_v43  ;;  %vm991_vm10 = vweird.f32 %v3195_v49  ;;  %v995_v12 = vand.u32 2147483647, %v3195_v49  ;;  %v1009_v3 = vpack.c.bf16 %v1946_v9, %v1945_v14 }
 0x16c   : > { %v957_v31 = vand.u32 2147483648, %v3127_v40  ;;  %vm993_vm11 = vmor %vm991_vm10, %vm992_vm8  ;;  %v1939_v7 = vclamps-f32 %v640_v50, 1.0  ;;  %vm951_vm12 = vweird.f32 %v3127_v40  ;;  %v955_v54 = vand.u32 2147483647, %v3127_v40 }
 0x16d   : > { %v990_v18 = vadd.f32 %v2140_v19, %v989_v30  ;;  %v974_v0 = vadd.f32 1.1283791, %v973_v27  ;;  %vm953_vm13 = vmor %vm951_vm12, %vm952_vm9  ;;  %v998_v53 = vor.u32 1.1754944e-38, %v997_v47  ;;  %v934_v16 = vadd.f32 1.1283791, %v933_v35 }
 0x16e   : > { %v1006_v57 = vpack.c.bf16 %v1940_v46, %v1939_v7  ;;  %v954_v42 = vsel %vm953_vm13, %v3186_v33, %v950_v60  ;;  %vm996_vm14 = vcmp.eq.f32.partialorder %v995_v12, 8.507059e+37  ;;  %v958_v49 = vor.u32 1.1754944e-38, %v957_v31 }
 0x16f   : > { %v994_v52 = vsel %vm993_vm11, %v2140_v19, %v990_v18  ;;  %vm956_vm15 = vcmp.eq.f32.partialorder %v955_v54, 8.507059e+37  ;;  %v975_v44 = vmul.f32 %v974_v0, %v3020_v55  ;;  %v935_v11 = vmul.f32 %v934_v16, %v2890_v62 }
 0x170   : > { %v999_v22 = vsel %vm996_vm14, %v998_v53, %v994_v52  ;;  %v959_v13 = vsel %vm956_vm15, %v958_v49, %v954_v42 }
 0x171   : > { %1113 = vmatmul.bf16.gmra.mxu3 %v1009_v3  ;;  %v1000_v40 = vmul.f32 %v999_v22, %v975_v44  ;;  %v960_v59 = vmul.f32 %v959_v13, %v935_v11 }
 0x173   : > { %v1948_v34 = vclamps-f32 %v1000_v40, 1.0  ;;  %v1947_v61 = vclamps-f32 %v960_v59, 1.0 }
 0x174   : > { %1098 = vmatmul.bf16.gmra.mxu1 %v1006_v57 }
 0x175   : > { %v1010_v4 = vpack.c.bf16 %v1948_v34, %v1947_v61 }
 0x181   : > { %1118 = vmatmul.bf16.gmra.mxu3 %v1010_v4 }
 0x1c0   : > { %v1084_v48 = vpop.f32.mrf.mxu1 }
 0x1c1   : > { %v1124_v56 = vmul.f32 %v1084_v48, %v1084_v48 }
 0x1c3   : > { %v1125_v33 = vmin.f32 %v1124_v56, 16.0 }
 0x1c5   : > { %v1126_v36 = vmul.f32 2.1237322e-06, %v1125_v33  ;;  %v1137_v17 = vmul.f32 3.8918573e-05, %v1125_v33 }
 0x1c7   : > { %v1127_v2 = vadd.f32 0.00028619796, %v1126_v36  ;;  %v1138_v39 = vadd.f32 0.001143296, %v1137_v17 }
 0x1c8   : > { %v3254_v29 = vpop.f32.mrf.mxu1 }
 0x1c9   : > { %v1128_v55 = vmul.f32 %v1127_v2, %v1125_v33  ;;  %v1139_v25 = vmul.f32 %v1138_v39, %v1125_v33  ;;  %v1164_v62 = vmul.f32 %v3254_v29, %v3254_v29 }
 0x1cb   : > { %v1129_v21 = vadd.f32 0.0036580483, %v1128_v55  ;;  %v1140_v38 = vadd.f32 0.014752088, %v1139_v25  ;;  %v1165_v10 = vmin.f32 %v1164_v62, 16.0 }
 0x1cd   : > { %v1130_v32 = vmul.f32 %v1129_v21, %v1125_v33  ;;  %v1141_v20 = vmul.f32 %v1140_v38, %v1125_v33  ;;  %v1166_v28 = vmul.f32 2.1237322e-06, %v1165_v10  ;;  %v1177_v45 = vmul.f32 3.8918573e-05, %v1165_v10 }
 0x1cf   : > { %v1131_v5 = vadd.f32 0.05243302, %v1130_v32  ;;  %v1142_v1 = vadd.f32 0.112945676, %v1141_v20  ;;  %v1167_v41 = vadd.f32 0.00028619796, %v1166_v28 }
 0x1d0   : > { %v1178_v23 = vadd.f32 0.001143296, %v1177_v45 }
 0x1d1   : > { %v3258_v19 = vpop.f32.mrf.mxu1  ;;  %v1132_v63 = vmul.f32 %v1131_v5, %v1125_v33  ;;  %v1143_v15 = vmul.f32 %v1142_v1, %v1125_v33  ;;  %v1168_v37 = vmul.f32 %v1167_v41, %v1165_v10 }
 0x1d2   : > { %v1204_v6 = vmul.f32 %v3258_v19, %v3258_v19  ;;  %v1179_v51 = vmul.f32 %v1178_v23, %v1165_v10 }
 0x1d3   : > { %v1133_v24 = vadd.f32 0.18741608, %v1132_v63  ;;  %v1144_v58 = vadd.f32 0.4994258, %v1143_v15  ;;  %v1169_v8 = vadd.f32 0.0036580483, %v1168_v37 }
 0x1d4   : > { %v3262_v26 = vpop.f32.mrf.mxu3  ;;  %v1180_v43 = vadd.f32 0.014752088, %v1179_v51  ;;  %v3266_v50 = vmin.f32 %v1204_v6, 16.0 }
 0x1d5   : > { %v1444_v9 = vmul.f32 %v3262_v26, %v3262_v26  ;;  %v1145_v35 = vmul.f32 %v1144_v58, %v1125_v33  ;;  %v1170_v27 = vmul.f32 %v1169_v8, %v1165_v10  ;;  %v1134_v30 = vmul.f32 %v1133_v24, %v1125_v33 }
 0x1d6   : > { %v1181_v14 = vmul.f32 %v1180_v43, %v1165_v10  ;;  %v1206_v18 = vmul.f32 2.1237322e-06, %v3266_v50  ;;  %v1217_v7 = vmul.f32 3.8918573e-05, %v3266_v50 }
 0x1d7   : > { %v3268_v60 = vmin.f32 %v1444_v9, 16.0  ;;  %v1146_v46 = vadd.f32 1.0, %v1145_v35  ;;  %v1171_v47 = vadd.f32 0.05243302, %v1170_v27  ;;  %v1135_v54 = vadd.f32 1.1283791, %v1134_v30 }
 0x1d8   : > { %v1182_v12 = vadd.f32 0.112945676, %v1181_v14  ;;  %v1207_v16 = vadd.f32 0.00028619796, %v1206_v18  ;;  %v1218_v40 = vadd.f32 0.001143296, %v1217_v7 }
 0x1d9   : > { %v1446_v3 = vmul.f32 2.1237322e-06, %v3268_v60  ;;  %v1457_v31 = vmul.f32 3.8918573e-05, %v3268_v60  ;;  %2141 = vrcp.f32 %v1146_v46  ;;  %v1172_v0 = vmul.f32 %v1171_v47, %v1165_v10  ;;  %v3282_v55 = vpop.f32.mrf.mxu1 }
 0x1da   : > { %v1183_v52 = vmul.f32 %v1182_v12, %v1165_v10  ;;  %v1208_v11 = vmul.f32 %v1207_v16, %v3266_v50  ;;  %v1136_v34 = vmul.f32 %v1135_v54, %v1084_v48  ;;  %v1156_v61 = vand.u32 2147483647, %v1146_v46 }
 0x1db   : > { %v1447_v53 = vadd.f32 0.00028619796, %v1446_v3  ;;  %v1458_v57 = vadd.f32 0.001143296, %v1457_v31  ;;  %v1173_v49 = vadd.f32 0.18741608, %v1172_v0  ;;  %v1219_v39 = vmul.f32 %v1218_v40, %v3266_v50 }
 0x1dc   : > { %v3274_v42 = vpop.f32.mrf.mxu3  ;;  %v1184_v22 = vadd.f32 0.4994258, %v1183_v52  ;;  %v1209_v2 = vadd.f32 0.0036580483, %v1208_v11  ;;  %v1158_v62 = vand.u32 2147483648, %v1146_v46  ;;  %vm1152_vm0 = vweird.f32 %v1146_v46 }
 0x1dd   : > { %v1448_v44 = vmul.f32 %v1447_v53, %v3268_v60  ;;  %v1459_v13 = vmul.f32 %v1458_v57, %v3268_v60  ;;  %v1484_v59 = vmul.f32 %v3274_v42, %v3274_v42  ;;  %v1174_v36 = vmul.f32 %v1173_v49, %v1165_v10 }
 0x1de   : > { %v1185_v4 = vmul.f32 %v1184_v22, %v1165_v10  ;;  %v1210_v20 = vmul.f32 %v1209_v2, %v3266_v50  ;;  %v1220_v28 = vadd.f32 0.014752088, %v1219_v39  ;;  %v1244_v45 = vmul.f32 %v3282_v55, %v3282_v55 }
 0x1df   : > { %v1449_v56 = vadd.f32 0.0036580483, %v1448_v44  ;;  %v2142_v33 = vpop.eup %2141  ;;  %v1460_v17 = vadd.f32 0.014752088, %v1459_v13  ;;  %v3286_v38 = vmin.f32 %v1484_v59, 16.0  ;;  %vm3296_vm2 = vcmp.eq.f32.partialorder %v1156_v61, 8.507059e+37 }
 0x1e0   : > { %v1148_v25 = vmul.f32 %v2142_v33, %v1146_v46  ;;  %v3284_v21 = vadd.f32 1.0, %v1185_v4  ;;  %vm1153_vm1 = vweird.f32 %v2142_v33  ;;  %v1175_v5 = vadd.f32 1.1283791, %v1174_v36 }
 0x1e1   : > { %v1450_v32 = vmul.f32 %v1449_v56, %v3268_v60  ;;  %v1461_v48 = vmul.f32 %v1460_v17, %v3268_v60  ;;  %v1221_v41 = vmul.f32 %v1220_v28, %v3266_v50  ;;  %v1211_v15 = vadd.f32 0.05243302, %v1210_v20  ;;  %vm1154_vm3 = vmor %vm1152_vm0, %vm1153_vm1 }
 0x1e2   : > { %v1149_v10 = vsub.f32 1.0, %v1148_v25  ;;  %2143 = vrcp.f32 %v3284_v21  ;;  %v1486_v37 = vmul.f32 2.1237322e-06, %v3286_v38  ;;  %v1159_v51 = vor.u32 1.1754944e-38, %v1158_v62 }
 0x1e3   : > { %v1451_v1 = vadd.f32 0.05243302, %v1450_v32  ;;  %v1462_v63 = vadd.f32 0.112945676, %v1461_v48  ;;  %v1222_v58 = vadd.f32 0.112945676, %v1221_v41  ;;  %v1212_v9 = vmul.f32 %v1211_v15, %v3266_v50 }
 0x1e4   : > { %v1150_v23 = vmul.f32 %v2142_v33, %v1149_v10  ;;  %v1487_v35 = vadd.f32 0.00028619796, %v1486_v37  ;;  %v1176_v27 = vmul.f32 %v1175_v5, %v3254_v29  ;;  %v3307_v47 = vmin.f32 %v1244_v45, 16.0 }
 0x1e5   : > { %v1452_v24 = vmul.f32 %v1451_v1, %v3268_v60  ;;  %v1463_v43 = vmul.f32 %v1462_v63, %v3268_v60  ;;  %v1223_v14 = vmul.f32 %v1222_v58, %v3266_v50  ;;  %v1196_v3 = vand.u32 2147483647, %v3284_v21 }
 0x1e6   : > { %v1151_v8 = vadd.f32 %v2142_v33, %v1150_v23  ;;  %v1488_v7 = vmul.f32 %v1487_v35, %v3286_v38  ;;  %v1213_v0 = vadd.f32 0.18741608, %v1212_v9  ;;  %v1497_v29 = vmul.f32 3.8918573e-05, %v3286_v38 }
 0x1e7   : > { %v1453_v30 = vadd.f32 0.18741608, %v1452_v24  ;;  %v1464_v31 = vadd.f32 0.4994258, %v1463_v43  ;;  %v1224_v16 = vadd.f32 0.4994258, %v1223_v14  ;;  %vm1192_vm5 = vweird.f32 %v3284_v21 }
 0x1e8   : > { %v2144_v18 = vpop.eup %2143  ;;  %v1155_v12 = vsel %vm1154_vm3, %v2142_v33, %v1151_v8  ;;  %v1198_v22 = vand.u32 2147483648, %v3284_v21  ;;  %v1489_v44 = vadd.f32 0.0036580483, %v1488_v7  ;;  %v1246_v13 = vmul.f32 2.1237322e-06, %v3307_v47 }
 0x1e9   : > { %v1160_v54 = vsel %vm3296_vm2, %v1159_v51, %v1155_v12  ;;  %v1188_v46 = vmul.f32 %v2144_v18, %v3284_v21  ;;  %v1454_v53 = vmul.f32 %v1453_v30, %v3268_v60  ;;  %v1465_v57 = vmul.f32 %v1464_v31, %v3268_v60  ;;  %v3324_v60 = vpop.f32.mrf.mxu3 }
 0x1ea   : > { %v1161_v52 = vmul.f32 %v1160_v54, %v1136_v34  ;;  %vm1193_vm4 = vweird.f32 %v2144_v18  ;;  %v1225_v59 = vmul.f32 %v1224_v16, %v3266_v50  ;;  %v1214_v34 = vmul.f32 %v1213_v0, %v3266_v50 }
 0x1eb   : > { %v1189_v49 = vsub.f32 1.0, %v1188_v46  ;;  %v3319_v40 = vadd.f32 1.0, %v1465_v57  ;;  %v1490_v4 = vmul.f32 %v1489_v44, %v3286_v38  ;;  %v1498_v56 = vadd.f32 0.001143296, %v1497_v29  ;;  %vm1194_vm7 = vmor %vm1192_vm5, %vm1193_vm4 }
 0x1ec   : > { %v1981_v11 = vclamps-f32 %v1161_v52, 1.0  ;;  %vm3332_vm6 = vcmp.eq.f32.partialorder %v1196_v3, 8.507059e+37  ;;  %v1455_v36 = vadd.f32 1.1283791, %v1454_v53  ;;  %v1199_v17 = vor.u32 1.1754944e-38, %v1198_v22 }
 0x1ed   : > { %v1190_v61 = vmul.f32 %v2144_v18, %v1189_v49  ;;  %2145 = vrcp.f32 %v3319_v40  ;;  %v3337_v2 = vadd.f32 1.0, %v1225_v59  ;;  %v1491_v39 = vadd.f32 0.05243302, %v1490_v4 }
 0x1ee   : > { %1764 = vst [vmem:[%s3328_s18] sm:$0xff] %v1981_v11  ;;  %v1478_v25 = vand.u32 2147483648, %v3319_v40  ;;  %v1499_v62 = vmul.f32 %v1498_v56, %v3286_v38  ;;  %v1247_v32 = vadd.f32 0.00028619796, %v1246_v13  ;;  %v1524_v21 = vmul.f32 %v3324_v60, %v3324_v60 }
 0x1ef   : > { %v1191_v50 = vadd.f32 %v2144_v18, %v1190_v61  ;;  %v1476_v20 = vand.u32 2147483647, %v3319_v40  ;;  %v3345_v28 = vadd.f32 1.1283791, %v1214_v34  ;;  %2147 = vrcp.f32 %v3337_v2 }
 0x1f0   : > { %v1456_v45 = vmul.f32 %v1455_v36, %v3262_v26  ;;  %v1492_v5 = vmul.f32 %v1491_v39, %v3286_v38  ;;  %v1500_v1 = vadd.f32 0.014752088, %v1499_v62  ;;  %vm1472_vm8 = vweird.f32 %v3319_v40 }
 0x1f1   : > { %v1195_v48 = vsel %vm1194_vm7, %v2144_v18, %v1191_v50  ;;  %v1238_v23 = vand.u32 2147483648, %v3337_v2  ;;  %v1248_v63 = vmul.f32 %v1247_v32, %v3307_v47  ;;  %v1257_v15 = vmul.f32 3.8918573e-05, %v3307_v47 }
 0x1f2   : > { %v1200_v10 = vsel %vm3332_vm6, %v1199_v17, %v1195_v48  ;;  %v1479_v6 = vor.u32 1.1754944e-38, %v1478_v25  ;;  %v1236_v51 = vand.u32 2147483647, %v3337_v2  ;;  %v1501_v24 = vmul.f32 %v1500_v1, %v3286_v38 }
 0x1f3   : > { %v1201_v41 = vmul.f32 %v1200_v10, %v1176_v27  ;;  %v2146_v37 = vpop.eup %2145  ;;  %v3358_v26 = vmin.f32 %v1524_v21, 16.0  ;;  %vm3361_vm9 = vcmp.eq.f32.partialorder %v1476_v20, 8.507059e+37  ;;  %v1493_v9 = vadd.f32 0.18741608, %v1492_v5  ;;  %v3365_v27 = vpop.f32.mrf.mxu1 }
 0x1f4   : > { %v1468_v8 = vmul.f32 %v2146_v37, %v3319_v40  ;;  %v1249_v35 = vadd.f32 0.0036580483, %v1248_v63  ;;  %vm1232_vm10 = vweird.f32 %v3337_v2  ;;  %v1502_v30 = vadd.f32 0.112945676, %v1501_v24 }
 0x1f5   : > { %v1982_v58 = vclamps-f32 %v1201_v41, 1.0  ;;  %v1258_v14 = vadd.f32 0.001143296, %v1257_v15  ;;  %v1526_v18 = vmul.f32 2.1237322e-06, %v3358_v26  ;;  %v2148_v12 = vpop.eup %2147  ;;  %v1239_v31 = vor.u32 1.1754944e-38, %v1238_v23  ;;  %v3399_v15 = vpop.f32.mrf.mxu3 }
 0x1f6   : > { %v1469_v3 = vsub.f32 1.0, %v1468_v8  ;;  %v1250_v7 = vmul.f32 %v1249_v35, %v3307_v47  ;;  %v1537_v54 = vmul.f32 3.8918573e-05, %v3358_v26  ;;  %vm1473_vm11 = vweird.f32 %v2146_v37 }
 0x1f7   : > { %1765 = vst [vmem:[%s3328_s18 + $0x8] sm:$0xff] %v1982_v58  ;;  %v1228_v46 = vmul.f32 %v2148_v12, %v3337_v2  ;;  %v1503_v0 = vmul.f32 %v1502_v30, %v3286_v38  ;;  %v1284_v29 = vmul.f32 %v3365_v27, %v3365_v27  ;;  %v1259_v57 = vmul.f32 %v1258_v14, %v3307_v47  ;;  %vm1474_vm12 = vmor %vm1472_vm8, %vm1473_vm11 }
 0x1f8   : > { %v1470_v52 = vmul.f32 %v2146_v37, %v1469_v3  ;;  %v1251_v53 = vadd.f32 0.05243302, %v1250_v7  ;;  %v1527_v16 = vadd.f32 0.00028619796, %v1526_v18  ;;  %v1494_v22 = vmul.f32 %v1493_v9, %v3286_v38 }
 0x1f9   : > { %v1229_v49 = vsub.f32 1.0, %v1228_v46  ;;  %v1504_v44 = vadd.f32 0.4994258, %v1503_v0  ;;  %v1538_v13 = vadd.f32 0.001143296, %v1537_v54  ;;  %vm1233_vm13 = vweird.f32 %v2148_v12 }
 0x1fa   : > { %v1471_v11 = vadd.f32 %v2146_v37, %v1470_v52  ;;  %v1252_v59 = vmul.f32 %v1251_v53, %v3307_v47  ;;  %v1260_v61 = vadd.f32 0.014752088, %v1259_v57  ;;  %v1528_v34 = vmul.f32 %v1527_v16, %v3358_v26  ;;  %vm1234_vm14 = vmor %vm1232_vm10, %vm1233_vm13 }
 0x1fb   : > { %v1230_v4 = vmul.f32 %v2148_v12, %v1229_v49  ;;  %v1505_v56 = vmul.f32 %v1504_v44, %v3286_v38  ;;  %v1539_v33 = vmul.f32 %v1538_v13, %v3358_v26  ;;  %v3386_v39 = vmin.f32 %v1284_v29, 16.0  ;;  %v3407_v8 = vpop.f32.mrf.mxu1 }
 0x1fc   : > { %v1475_v36 = vsel %vm1474_vm12, %v2146_v37, %v1471_v11  ;;  %v1261_v50 = vmul.f32 %v1260_v61, %v3307_v47  ;;  %v1529_v17 = vadd.f32 0.0036580483, %v1528_v34  ;;  %v1253_v40 = vadd.f32 0.18741608, %v1252_v59 }
 0x1fd   : > { %v1480_v25 = vsel %vm3361_vm9, %v1479_v6, %v1475_v36  ;;  %v1231_v62 = vadd.f32 %v2148_v12, %v1230_v4  ;;  %v3390_v32 = vadd.f32 1.0, %v1505_v56  ;;  %v1540_v20 = vadd.f32 0.014752088, %v1539_v33 }
 0x1fe   : > { %v1481_v21 = vmul.f32 %v1480_v25, %v1456_v45  ;;  %v1262_v38 = vadd.f32 0.112945676, %v1261_v50  ;;  %v1530_v48 = vmul.f32 %v1529_v17, %v3358_v26  ;;  %v1216_v10 = vmul.f32 %v3345_v28, %v3258_v19  ;;  %v3442_v25 = vpop.f32.mrf.mxu3 }
 0x1ff   : > { %v1235_v5 = vsel %vm1234_vm14, %v2148_v12, %v1231_v62  ;;  %vm1237_vm15 = vcmp.eq.f32.partialorder %v1236_v51, 8.507059e+37  ;;  %2149 = vrcp.f32 %v3390_v32  ;;  %v1495_v2 = vadd.f32 1.1283791, %v1494_v22 }
 0x200   : > { %v1989_v1 = vclamps-f32 %v1481_v21, 1.0  ;;  %v1240_v41 = vsel %vm1237_vm15, %v1239_v31, %v1235_v5  ;;  %v1263_v63 = vmul.f32 %v1262_v38, %v3307_v47  ;;  %v1531_v45 = vadd.f32 0.05243302, %v1530_v48 }
 0x201   : > { %v1241_v23 = vmul.f32 %v1240_v41, %v1216_v10  ;;  %v1254_v37 = vmul.f32 %v1253_v40, %v3307_v47  ;;  %v1541_v6 = vmul.f32 %v1540_v20, %v3358_v26  ;;  %v1286_v19 = vmul.f32 2.1237322e-06, %v3386_v39 }
 0x202   : > { %1772 = vst [vmem:[%s3328_s18 + $0x40] sm:$0xff] %v1989_v1  ;;  %v1264_v51 = vadd.f32 0.4994258, %v1263_v63  ;;  %v1532_v24 = vmul.f32 %v1531_v45, %v3358_v26  ;;  %v1297_v58 = vmul.f32 3.8918573e-05, %v3386_v39  ;;  %v1564_v30 = vmul.f32 %v3399_v15, %v3399_v15 }
 0x203   : > { %v1983_v28 = vclamps-f32 %v1241_v23, 1.0  ;;  %v1516_v43 = vand.u32 2147483647, %v3390_v32  ;;  %v1542_v9 = vadd.f32 0.112945676, %v1541_v6  ;;  %v1518_v18 = vand.u32 2147483648, %v3390_v32 }
 0x204   : > { %v1287_v35 = vadd.f32 0.00028619796, %v1286_v19  ;;  %v1265_v12 = vmul.f32 %v1264_v51, %v3307_v47  ;;  %v1533_v3 = vadd.f32 0.18741608, %v1532_v24  ;;  %v1298_v31 = vadd.f32 0.001143296, %v1297_v58 }
 0x205   : > { %v2150_v14 = vpop.eup %2149  ;;  %1766 = vst [vmem:[%s3328_s18 + $0x10] sm:$0xff] %v1983_v28  ;;  %v1543_v54 = vmul.f32 %v1542_v9, %v3358_v26  ;;  %v1324_v0 = vmul.f32 %v3407_v8, %v3407_v8  ;;  %v1255_v29 = vadd.f32 1.1283791, %v1254_v37  ;;  %v3423_v57 = vmin.f32 %v1564_v30, 16.0 }
 0x206   : > { %v1508_v7 = vmul.f32 %v2150_v14, %v3390_v32  ;;  %v1288_v46 = vmul.f32 %v1287_v35, %v3386_v39  ;;  %v3420_v52 = vadd.f32 1.0, %v1265_v12  ;;  %v1299_v53 = vmul.f32 %v1298_v31, %v3386_v39 }
 0x207   : > { %v1496_v47 = vmul.f32 %v1495_v2, %v3274_v42  ;;  %v1544_v49 = vadd.f32 0.4994258, %v1543_v54  ;;  %vm1512_vm0 = vweird.f32 %v3390_v32  ;;  %vm3427_vm1 = vcmp.eq.f32.partialorder %v1516_v43, 8.507059e+37 }
 0x208   : > { %v1509_v16 = vsub.f32 1.0, %v1508_v7  ;;  %v1289_v22 = vadd.f32 0.0036580483, %v1288_v46  ;;  %2151 = vrcp.f32 %v3420_v52  ;;  %v1534_v13 = vmul.f32 %v1533_v3, %v3358_v26 }
 0x209   : > { %vm1513_vm2 = vweird.f32 %v2150_v14  ;;  %v1545_v59 = vmul.f32 %v1544_v49, %v3358_v26  ;;  %v3434_v61 = vmin.f32 %v1324_v0, 16.0  ;;  %v1519_v42 = vor.u32 1.1754944e-38, %v1518_v18 }
 0x20a   : > { %v1510_v11 = vmul.f32 %v2150_v14, %v1509_v16  ;;  %v1290_v34 = vmul.f32 %v1289_v22, %v3386_v39  ;;  %v1300_v4 = vadd.f32 0.014752088, %v1299_v53  ;;  %v1566_v56 = vmul.f32 2.1237322e-06, %v3423_v57  ;;  %vm1514_vm3 = vmor %vm1512_vm0, %vm1513_vm2 }
 0x20b   : > { %v1256_v36 = vmul.f32 %v1255_v29, %v3282_v55  ;;  %v1276_v50 = vand.u32 2147483647, %v3420_v52  ;;  %v3440_v17 = vadd.f32 1.0, %v1545_v59  ;;  %v1278_v26 = vand.u32 2147483648, %v3420_v52 }
 0x20c   : > { %v1511_v33 = vadd.f32 %v2150_v14, %v1510_v11  ;;  %v1535_v62 = vadd.f32 1.1283791, %v1534_v13  ;;  %v1301_v40 = vmul.f32 %v1300_v4, %v3386_v39  ;;  %v1567_v21 = vadd.f32 0.00028619796, %v1566_v56 }
 0x20d   : > { %2153 = vrcp.f32 %v3440_v17  ;;  %v1577_v55 = vmul.f32 3.8918573e-05, %v3423_v57  ;;  %v1326_v48 = vmul.f32 2.1237322e-06, %v3434_v61  ;;  %v1291_v5 = vadd.f32 0.05243302, %v1290_v34 }
 0x20e   : > { %v1515_v38 = vsel %vm1514_vm3, %v2150_v14, %v1511_v33  ;;  %v2152_v20 = vpop.eup %2151  ;;  %v1302_v32 = vadd.f32 0.112945676, %v1301_v40  ;;  %v1604_v1 = vmul.f32 %v3442_v25, %v3442_v25  ;;  %vm1272_vm4 = vweird.f32 %v3420_v52 }
 0x20f   : > { %v1520_v10 = vsel %vm3427_vm1, %v1519_v42, %v1515_v38  ;;  %v1268_v23 = vmul.f32 %v2152_v20, %v3420_v52  ;;  %vm3457_vm5 = vcmp.eq.f32.partialorder %v1276_v50, 8.507059e+37  ;;  %v1279_v45 = vor.u32 1.1754944e-38, %v1278_v26 }
 0x210   : > { %v1521_v41 = vmul.f32 %v1520_v10, %v1496_v47  ;;  %v1536_v2 = vmul.f32 %v1535_v62, %v3324_v60  ;;  %v1303_v37 = vmul.f32 %v1302_v32, %v3386_v39  ;;  %v1568_v6 = vmul.f32 %v1567_v21, %v3423_v57 }
 0x211   : > { %v1269_v28 = vsub.f32 1.0, %v1268_v23  ;;  %v1578_v51 = vadd.f32 0.001143296, %v1577_v55  ;;  %v1327_v24 = vadd.f32 0.00028619796, %v1326_v48  ;;  %v1292_v58 = vmul.f32 %v1291_v5, %v3386_v39 }
 0x212   : > { %v1990_v19 = vclamps-f32 %v1521_v41, 1.0  ;;  %v1304_v43 = vadd.f32 0.4994258, %v1303_v37  ;;  %v1569_v9 = vadd.f32 0.0036580483, %v1568_v6  ;;  %vm1273_vm6 = vweird.f32 %v2152_v20  ;;  %v3497_v6 = vpop.f32.mrf.mxu1 }
 0x213   : > { %v1337_v35 = vmul.f32 3.8918573e-05, %v3434_v61  ;;  %v2154_v30 = vpop.eup %2153  ;;  %v1270_v14 = vmul.f32 %v2152_v20, %v1269_v28  ;;  %v1579_v60 = vmul.f32 %v1578_v51, %v3423_v57  ;;  %v1328_v18 = vmul.f32 %v1327_v24, %v3434_v61  ;;  %vm1274_vm7 = vmor %vm1272_vm4, %vm1273_vm6  ;;  %v3501_v24 = vpop.f32.mrf.mxu3 }
 0x214   : > { %1773 = vst [vmem:[%s3328_s18 + $0x48] sm:$0xff] %v1990_v19  ;;  %v1548_v12 = vmul.f32 %v2154_v30, %v3440_v17  ;;  %v1556_v3 = vand.u32 2147483647, %v3440_v17  ;;  %v1558_v31 = vand.u32 2147483648, %v3440_v17  ;;  %v1305_v7 = vmul.f32 %v1304_v43, %v3386_v39 }
 0x215   : > { %v1271_v54 = vadd.f32 %v2152_v20, %v1270_v14  ;;  %v1570_v46 = vmul.f32 %v1569_v9, %v3423_v57  ;;  %v1580_v0 = vadd.f32 0.014752088, %v1579_v60  ;;  %v1329_v29 = vadd.f32 0.0036580483, %v1328_v18 }
 0x216   : > { %v1549_v53 = vsub.f32 1.0, %v1548_v12  ;;  %v1293_v47 = vadd.f32 0.18741608, %v1292_v58  ;;  %v3476_v16 = vadd.f32 1.0, %v1305_v7  ;;  %v1338_v49 = vadd.f32 0.001143296, %v1337_v35 }
 0x217   : > { %v1275_v22 = vsel %vm1274_vm7, %v2152_v20, %v1271_v54  ;;  %v1571_v44 = vadd.f32 0.05243302, %v1570_v46  ;;  %v1581_v13 = vmul.f32 %v1580_v0, %v3423_v57  ;;  %v1330_v11 = vmul.f32 %v1329_v29, %v3434_v61 }
 0x218   : > { %v1280_v59 = vsel %vm3457_vm5, %v1279_v45, %v1275_v22  ;;  %v1550_v42 = vmul.f32 %v2154_v30, %v1549_v53  ;;  %vm1553_vm8 = vweird.f32 %v2154_v30  ;;  %2155 = vrcp.f32 %v3476_v16 }
 0x219   : > { %v1281_v52 = vmul.f32 %v1280_v59, %v1256_v36  ;;  %vm1552_vm9 = vweird.f32 %v3440_v17  ;;  %v1572_v34 = vmul.f32 %v1571_v44, %v3423_v57  ;;  %v3485_v4 = vmin.f32 %v1604_v1, 16.0 }
 0x21a   : > { %v1551_v56 = vadd.f32 %v2154_v30, %v1550_v42  ;;  %v1294_v33 = vmul.f32 %v1293_v47, %v3386_v39  ;;  %v1582_v50 = vadd.f32 0.112945676, %v1581_v13  ;;  %v1339_v26 = vmul.f32 %v1338_v49, %v3434_v61  ;;  %vm1554_vm10 = vmor %vm1552_vm9, %vm1553_vm8 }
 0x21b   : > { %v1984_v62 = vclamps-f32 %v1281_v52, 1.0  ;;  %vm1557_vm11 = vcmp.eq.f32.partialorder %v1556_v3, 8.507059e+37  ;;  %v1559_v40 = vor.u32 1.1754944e-38, %v1558_v31  ;;  %v1331_v21 = vadd.f32 0.05243302, %v1330_v11 }
 0x21c   : > { %v1555_v38 = vsel %vm1554_vm10, %v2154_v30, %v1551_v56  ;;  %v1573_v36 = vadd.f32 0.18741608, %v1572_v34  ;;  %v1583_v17 = vmul.f32 %v1582_v50, %v3423_v57  ;;  %v1340_v55 = vadd.f32 0.014752088, %v1339_v26 }
 0x21d   : > { %1767 = vst [vmem:[%s3328_s18 + $0x18] sm:$0xff] %v1984_v62  ;;  %v1560_v48 = vsel %vm1557_vm11, %v1559_v40, %v1555_v38  ;;  %v1606_v20 = vmul.f32 2.1237322e-06, %v3485_v4  ;;  %v1617_v10 = vmul.f32 3.8918573e-05, %v3485_v4  ;;  %v1318_v45 = vand.u32 2147483648, %v3476_v16 }
 0x21e   : > { %v2156_v39 = vpop.eup %2155  ;;  %v1561_v5 = vmul.f32 %v1560_v48, %v1536_v2  ;;  %v1295_v32 = vadd.f32 1.1283791, %v1294_v33  ;;  %v1584_v1 = vadd.f32 0.4994258, %v1583_v17  ;;  %v1341_v41 = vmul.f32 %v1340_v55, %v3434_v61 }
 0x21f   : > { %v1308_v23 = vmul.f32 %v2156_v39, %v3476_v16  ;;  %v1316_v63 = vand.u32 2147483647, %v3476_v16  ;;  %v1607_v37 = vadd.f32 0.00028619796, %v1606_v20  ;;  %v1332_v51 = vmul.f32 %v1331_v21, %v3434_v61 }
 0x220   : > { %v1991_v19 = vclamps-f32 %v1561_v5, 1.0  ;;  %v1585_v28 = vmul.f32 %v1584_v1, %v3423_v57  ;;  %v1342_v2 = vadd.f32 0.112945676, %v1341_v41  ;;  %v1574_v43 = vmul.f32 %v1573_v36, %v3423_v57 }
 0x221   : > { %v1309_v58 = vsub.f32 1.0, %v1308_v23  ;;  %v1608_v9 = vmul.f32 %v1607_v37, %v3485_v4  ;;  %v1618_v35 = vadd.f32 0.001143296, %v1617_v10  ;;  %vm1313_vm12 = vweird.f32 %v2156_v39 }
 0x222   : > { %1774 = vst [vmem:[%s3328_s18 + $0x50] sm:$0xff] %v1991_v19  ;;  %v3506_v30 = vadd.f32 1.0, %v1585_v28  ;;  %v1343_v14 = vmul.f32 %v1342_v2, %v3434_v61  ;;  %v1364_v60 = vmul.f32 %v3497_v6, %v3497_v6  ;;  %v1644_v31 = vmul.f32 %v3501_v24, %v3501_v24 }
 0x223   : > { %v1310_v18 = vmul.f32 %v2156_v39, %v1309_v58  ;;  %v1609_v12 = vadd.f32 0.0036580483, %v1608_v9  ;;  %v1619_v3 = vmul.f32 %v1618_v35, %v3485_v4  ;;  %v1296_v57 = vmul.f32 %v1295_v32, %v3365_v27  ;;  %v3541_v32 = vpop.f32.mrf.mxu1 }
 0x224   : > { %vm1312_vm13 = vweird.f32 %v3476_v16  ;;  %2157 = vrcp.f32 %v3506_v30  ;;  %vm1317_vm14 = vcmp.eq.f32.partialorder %v1316_v63, 8.507059e+37  ;;  %v1344_v54 = vadd.f32 0.4994258, %v1343_v14 }
 0x225   : > { %v1311_v7 = vadd.f32 %v2156_v39, %v1310_v18  ;;  %v1610_v46 = vmul.f32 %v1609_v12, %v3485_v4  ;;  %vm1314_vm15 = vmor %vm1312_vm13, %vm1313_vm12  ;;  %v1319_v0 = vor.u32 1.1754944e-38, %v1318_v45  ;;  %v1333_v29 = vadd.f32 0.18741608, %v1332_v51 }
 0x226   : > { %v1620_v53 = vadd.f32 0.014752088, %v1619_v3  ;;  %v3519_v47 = vmin.f32 %v1364_v60, 16.0  ;;  %v1575_v22 = vadd.f32 1.1283791, %v1574_v43  ;;  %v1345_v27 = vmul.f32 %v1344_v54, %v3434_v61 }
 0x227   : > { %v1315_v49 = vsel %vm1314_vm15, %v2156_v39, %v1311_v7  ;;  %v3522_v44 = vmin.f32 %v1644_v31, 16.0  ;;  %v1611_v34 = vadd.f32 0.05243302, %v1610_v46  ;;  %v1334_v36 = vmul.f32 %v1333_v29, %v3434_v61 }
 0x228   : > { %v1320_v16 = vsel %vm1317_vm14, %v1319_v0, %v1315_v49  ;;  %v1621_v13 = vmul.f32 %v1620_v53, %v3485_v4  ;;  %v1366_v11 = vmul.f32 2.1237322e-06, %v3519_v47  ;;  %v1377_v59 = vmul.f32 3.8918573e-05, %v3519_v47 }
 0x229   : > { %v1321_v42 = vmul.f32 %v1320_v16, %v1296_v57  ;;  %v3527_v52 = vadd.f32 1.0, %v1345_v27  ;;  %v1646_v21 = vmul.f32 2.1237322e-06, %v3522_v44  ;;  %v1576_v38 = vmul.f32 %v1575_v22, %v3399_v15 }
 0x22a   : > { %v2158_v56 = vpop.eup %2157  ;;  %v1622_v33 = vadd.f32 0.112945676, %v1621_v13  ;;  %v1367_v50 = vadd.f32 0.00028619796, %v1366_v11  ;;  %v1378_v26 = vadd.f32 0.001143296, %v1377_v59  ;;  %v1612_v5 = vmul.f32 %v1611_v34, %v3485_v4 }
 0x22b   : > { %v1985_v62 = vclamps-f32 %v1321_v42, 1.0  ;;  %v1588_v40 = vmul.f32 %v2158_v56, %v3506_v30  ;;  %2159 = vrcp.f32 %v3527_v52  ;;  %vm1593_vm0 = vweird.f32 %v2158_v56 }
 0x22c   : > { %v1623_v55 = vmul.f32 %v1622_v33, %v3485_v4  ;;  %v1368_v48 = vmul.f32 %v1367_v50, %v3519_v47  ;;  %v1379_v20 = vmul.f32 %v1378_v26, %v3519_v47  ;;  %v1596_v10 = vand.u32 2147483647, %v3506_v30  ;;  %v3567_v33 = vpop.f32.mrf.mxu3 }
 0x22d   : > { %1768 = vst [vmem:[%s3328_s18 + $0x20] sm:$0xff] %v1985_v62  ;;  %v1589_v17 = vsub.f32 1.0, %v1588_v40  ;;  %v1598_v39 = vand.u32 2147483648, %v3506_v30  ;;  %v1647_v41 = vadd.f32 0.00028619796, %v1646_v21  ;;  %vm1592_vm1 = vweird.f32 %v3506_v30 }
 0x22e   : > { %v1624_v1 = vadd.f32 0.4994258, %v1623_v55  ;;  %v1380_v61 = vadd.f32 0.014752088, %v1379_v20  ;;  %v1335_v23 = vadd.f32 1.1283791, %v1334_v36  ;;  %v1404_v2 = vmul.f32 %v3541_v32, %v3541_v32  ;;  %vm1594_vm2 = vmor %vm1592_vm1, %vm1593_vm0 }
 0x22f   : > { %v1590_v15 = vmul.f32 %v2158_v56, %v1589_v17  ;;  %v1369_v63 = vadd.f32 0.0036580483, %v1368_v48  ;;  %v1657_v45 = vmul.f32 3.8918573e-05, %v3522_v44  ;;  %vm1597_vm3 = vcmp.eq.f32.partialorder %v1596_v10, 8.507059e+37 }
 0x230   : > { %v1625_v28 = vmul.f32 %v1624_v1, %v3485_v4  ;;  %v1381_v51 = vmul.f32 %v1380_v61, %v3519_v47  ;;  %v1599_v58 = vor.u32 1.1754944e-38, %v1598_v39  ;;  %v1613_v9 = vadd.f32 0.18741608, %v1612_v5 }
 0x231   : > { %v2160_v37 = vpop.eup %2159  ;;  %v1591_v19 = vadd.f32 %v2158_v56, %v1590_v15  ;;  %v1648_v60 = vmul.f32 %v1647_v41, %v3522_v44  ;;  %v1370_v3 = vmul.f32 %v1369_v63, %v3519_v47  ;;  %v1658_v31 = vadd.f32 0.001143296, %v1657_v45 }
 0x232   : > { %v1348_v43 = vmul.f32 %v2160_v37, %v3527_v52  ;;  %v3551_v30 = vadd.f32 1.0, %v1625_v28  ;;  %v1382_v14 = vadd.f32 0.112945676, %v1381_v51  ;;  %v1358_v7 = vand.u32 2147483648, %v3527_v52 }
 0x233   : > { %v1595_v35 = vsel %vm1594_vm2, %v2158_v56, %v1591_v19  ;;  %v3557_v54 = vmin.f32 %v1404_v2, 16.0  ;;  %vm1353_vm4 = vweird.f32 %v2160_v37  ;;  %v1356_v0 = vand.u32 2147483647, %v3527_v52 }
 0x234   : > { %v1600_v18 = vsel %vm1597_vm3, %v1599_v58, %v1595_v35  ;;  %v1349_v12 = vsub.f32 1.0, %v1348_v43  ;;  %2161 = vrcp.f32 %v3551_v30  ;;  %v1383_v29 = vmul.f32 %v1382_v14, %v3519_v47 }
 0x235   : > { %v1601_v57 = vmul.f32 %v1600_v18, %v1576_v38  ;;  %vm1352_vm5 = vweird.f32 %v3527_v52  ;;  %v1649_v49 = vadd.f32 0.0036580483, %v1648_v60  ;;  %v1659_v22 = vmul.f32 %v1658_v31, %v3522_v44 }
 0x236   : > { %v1350_v46 = vmul.f32 %v2160_v37, %v1349_v12  ;;  %v1614_v16 = vmul.f32 %v1613_v9, %v3485_v4  ;;  %v1371_v13 = vadd.f32 0.05243302, %v1370_v3  ;;  %v1384_v11 = vadd.f32 0.4994258, %v1383_v29  ;;  %vm1354_vm6 = vmor %vm1352_vm5, %vm1353_vm4  ;;  %v3593_v12 = vpop.f32.mrf.mxu3 }
 0x237   : > { %v1992_v53 = vclamps-f32 %v1601_v57, 1.0  ;;  %v1336_v59 = vmul.f32 %v1335_v23, %v3407_v8  ;;  %v1359_v42 = vor.u32 1.1754944e-38, %v1358_v7  ;;  %v1660_v34 = vadd.f32 0.014752088, %v1659_v22 }
 0x238   : > { %v1351_v27 = vadd.f32 %v2160_v37, %v1350_v46  ;;  %v1406_v56 = vmul.f32 2.1237322e-06, %v3557_v54  ;;  %vm1357_vm7 = vcmp.eq.f32.partialorder %v1356_v0, 8.507059e+37  ;;  %v1385_v52 = vmul.f32 %v1384_v11, %v3519_v47 }
 0x239   : > { %1775 = vst [vmem:[%s3328_s18 + $0x58] sm:$0xff] %v1992_v53  ;;  %v1417_v26 = vmul.f32 3.8918573e-05, %v3557_v54  ;;  %v1650_v40 = vmul.f32 %v1649_v49, %v3522_v44  ;;  %v1661_v21 = vmul.f32 %v1660_v34, %v3522_v44  ;;  %v1615_v36 = vadd.f32 1.1283791, %v1614_v16 }
 0x23a   : > { %v1355_v50 = vsel %vm1354_vm6, %v2160_v37, %v1351_v27  ;;  %v2162_v62 = vpop.eup %2161  ;;  %v1407_v8 = vadd.f32 0.00028619796, %v1406_v56  ;;  %v1372_v55 = vmul.f32 %v1371_v13, %v3519_v47  ;;  %v1638_v48 = vand.u32 2147483648, %v3551_v30 }
 0x23b   : > { %v1360_v4 = vsel %vm1357_vm7, %v1359_v42, %v1355_v50  ;;  %v1628_v17 = vmul.f32 %v2162_v62, %v3551_v30  ;;  %v3576_v20 = vadd.f32 1.0, %v1385_v52  ;;  %v1662_v10 = vadd.f32 0.112945676, %v1661_v21 }
 0x23c   : > { %v1361_v38 = vmul.f32 %v1360_v4, %v1336_v59  ;;  %v1684_v39 = vmul.f32 %v3567_v33, %v3567_v33  ;;  %v1408_v1 = vmul.f32 %v1407_v8, %v3557_v54  ;;  %v1418_v61 = vadd.f32 0.001143296, %v1417_v26 }
 0x23d   : > { %v1629_v15 = vsub.f32 1.0, %v1628_v17  ;;  %v1636_v41 = vand.u32 2147483647, %v3551_v30  ;;  %2163 = vrcp.f32 %v3576_v20  ;;  %v1651_v23 = vadd.f32 0.05243302, %v1650_v40 }
 0x23e   : > { %v1986_v5 = vclamps-f32 %v1361_v38, 1.0  ;;  %vm1633_vm8 = vweird.f32 %v2162_v62  ;;  %v1373_v45 = vadd.f32 0.18741608, %v1372_v55  ;;  %v1663_v37 = vmul.f32 %v1662_v10, %v3522_v44 }
 0x23f   : > { %v1630_v63 = vmul.f32 %v2162_v62, %v1629_v15  ;;  %v1616_v19 = vmul.f32 %v1615_v36, %v3442_v25  ;;  %vm1632_vm9 = vweird.f32 %v3551_v30  ;;  %v1419_v28 = vmul.f32 %v1418_v61, %v3557_v54 }
 0x240   : > { %1769 = vst [vmem:[%s3328_s18 + $0x28] sm:$0xff] %v1986_v5  ;;  %v3588_v51 = vmin.f32 %v1684_v39, 16.0  ;;  %v1639_v58 = vor.u32 1.1754944e-38, %v1638_v48  ;;  %v1664_v43 = vadd.f32 0.4994258, %v1663_v37  ;;  %vm1634_vm10 = vmor %vm1632_vm9, %vm1633_vm8  ;;  %v1652_v35 = vmul.f32 %v1651_v23, %v3522_v44 }
 0x241   : > { %v1631_v2 = vadd.f32 %v2162_v62, %v1630_v63  ;;  %v1409_v9 = vadd.f32 0.0036580483, %v1408_v1  ;;  %v1420_v14 = vadd.f32 0.014752088, %v1419_v28  ;;  %vm1637_vm11 = vcmp.eq.f32.partialorder %v1636_v41, 8.507059e+37 }
 0x242   : > { %v1686_v60 = vmul.f32 2.1237322e-06, %v3588_v51  ;;  %v1697_v18 = vmul.f32 3.8918573e-05, %v3588_v51  ;;  %v1374_v30 = vmul.f32 %v1373_v45, %v3519_v47  ;;  %v1665_v3 = vmul.f32 %v1664_v43, %v3522_v44 }
 0x243   : > { %v1635_v25 = vsel %vm1634_vm10, %v2162_v62, %v1631_v2  ;;  %v2164_v31 = vpop.eup %2163  ;;  %v1421_v7 = vmul.f32 %v1420_v14, %v3557_v54  ;;  %v1724_v22 = vmul.f32 %v3593_v12, %v3593_v12  ;;  %v1653_v27 = vadd.f32 0.18741608, %v1652_v35 }
 0x244   : > { %v1640_v57 = vsel %vm1637_vm11, %v1639_v58, %v1635_v25  ;;  %v1687_v46 = vadd.f32 0.00028619796, %v1686_v60  ;;  %v1698_v0 = vadd.f32 0.001143296, %v1697_v18  ;;  %v1388_v53 = vmul.f32 %v2164_v31, %v3576_v20 }
 0x245   : > { %v1641_v29 = vmul.f32 %v1640_v57, %v1616_v19  ;;  %v3599_v49 = vadd.f32 1.0, %v1665_v3  ;;  %v1410_v47 = vmul.f32 %v1409_v9, %v3557_v54  ;;  %v1422_v16 = vadd.f32 0.112945676, %v1421_v7 }
 0x246   : > { %v1699_v13 = vmul.f32 %v1698_v0, %v3588_v51  ;;  %v1389_v59 = vsub.f32 1.0, %v1388_v53  ;;  %v1688_v42 = vmul.f32 %v1687_v46, %v3588_v51  ;;  %v1375_v34 = vadd.f32 1.1283791, %v1374_v30 }
 0x247   : > { %v1993_v11 = vclamps-f32 %v1641_v29, 1.0  ;;  %2165 = vrcp.f32 %v3599_v49  ;;  %v1396_v56 = vand.u32 2147483647, %v3576_v20  ;;  %v1398_v50 = vand.u32 2147483648, %v3576_v20 }
 0x248   : > { %v1423_v52 = vmul.f32 %v1422_v16, %v3557_v54  ;;  %v1390_v26 = vmul.f32 %v2164_v31, %v1389_v59  ;;  %vm1393_vm12 = vweird.f32 %v2164_v31  ;;  %v1700_v62 = vadd.f32 0.014752088, %v1699_v13 }
 0x249   : > { %1776 = vst [vmem:[%s3328_s18 + $0x60] sm:$0xff] %v1993_v11  ;;  %v3611_v4 = vmin.f32 %v1724_v22, 16.0  ;;  %v1654_v40 = vmul.f32 %v1653_v27, %v3522_v44  ;;  %v1411_v21 = vadd.f32 0.05243302, %v1410_v47  ;;  %vm1392_vm13 = vweird.f32 %v3576_v20 }
 0x24a   : > { %v1424_v8 = vadd.f32 0.4994258, %v1423_v52  ;;  %v1391_v38 = vadd.f32 %v2164_v31, %v1390_v26  ;;  %v1689_v36 = vadd.f32 0.0036580483, %v1688_v42  ;;  %v1701_v17 = vmul.f32 %v1700_v62, %v3588_v51  ;;  %vm1394_vm14 = vmor %vm1392_vm13, %vm1393_vm12 }
 0x24b   : > { %v1399_v55 = vor.u32 1.1754944e-38, %v1398_v50  ;;  %v1726_v10 = vmul.f32 2.1237322e-06, %v3611_v4  ;;  %v1737_v39 = vmul.f32 3.8918573e-05, %v3611_v4  ;;  %v1376_v15 = vmul.f32 %v1375_v34, %v3497_v6 }
 0x24c   : > { %v1425_v48 = vmul.f32 %v1424_v8, %v3557_v54  ;;  %v1395_v44 = vsel %vm1394_vm14, %v2164_v31, %v1391_v38  ;;  %vm1397_vm15 = vcmp.eq.f32.partialorder %v1396_v56, 8.507059e+37  ;;  %v1702_v1 = vadd.f32 0.112945676, %v1701_v17 }
 0x24d   : > { %v2166_v5 = vpop.eup %2165  ;;  %v1400_v61 = vsel %vm1397_vm15, %v1399_v55, %v1395_v44  ;;  %v1655_v41 = vadd.f32 1.1283791, %v1654_v40  ;;  %v1412_v23 = vmul.f32 %v1411_v21, %v3557_v54  ;;  %v1690_v37 = vmul.f32 %v1689_v36, %v3588_v51 }
 0x24e   : > { %v1668_v20 = vmul.f32 %v2166_v5, %v3599_v49  ;;  %v1401_v63 = vmul.f32 %v1400_v61, %v1376_v15  ;;  %v1426_v45 = vadd.f32 1.0, %v1425_v48  ;;  %v1703_v19 = vmul.f32 %v1702_v1, %v3588_v51 }
 0x24f   : > { %v1727_v2 = vadd.f32 0.00028619796, %v1726_v10  ;;  %v1738_v58 = vadd.f32 0.001143296, %v1737_v39  ;;  %v1676_v43 = vand.u32 2147483647, %v3599_v49  ;;  %vm1673_vm0 = vweird.f32 %v2166_v5 }
 0x250   : > { %v1669_v28 = vsub.f32 1.0, %v1668_v20  ;;  %v1987_v6 = vclamps-f32 %v1401_v63, 1.0  ;;  %v1678_v9 = vand.u32 2147483648, %v3599_v49  ;;  %2167 = vrcp.f32 %v1426_v45 }
 0x251   : > { %v1413_v14 = vadd.f32 0.18741608, %v1412_v23  ;;  %v1704_v60 = vadd.f32 0.4994258, %v1703_v19  ;;  %v1691_v18 = vadd.f32 0.05243302, %v1690_v37  ;;  %v1739_v25 = vmul.f32 %v1738_v58, %v3611_v4 }
 0x252   : > { %v1670_v35 = vmul.f32 %v2166_v5, %v1669_v28  ;;  %1770 = vst [vmem:[%s3328_s18 + $0x30] sm:$0xff] %v1987_v6  ;;  %vm1672_vm1 = vweird.f32 %v3599_v49  ;;  %v1728_v31 = vmul.f32 %v1727_v2, %v3611_v4  ;;  %v1656_v57 = vmul.f32 %v1655_v41, %v3501_v24 }
 0x253   : > { %v1705_v3 = vmul.f32 %v1704_v60, %v3588_v51  ;;  %vm1674_vm2 = vmor %vm1672_vm1, %vm1673_vm0  ;;  %v1679_v7 = vor.u32 1.1754944e-38, %v1678_v9  ;;  %v1740_v46 = vadd.f32 0.014752088, %v1739_v25  ;;  %vm1677_vm3 = vcmp.eq.f32.partialorder %v1676_v43, 8.507059e+37 }
 0x254   : > { %v1671_v30 = vadd.f32 %v2166_v5, %v1670_v35  ;;  %v1414_v29 = vmul.f32 %v1413_v14, %v3557_v54  ;;  %v1692_v47 = vmul.f32 %v1691_v18, %v3588_v51  ;;  %v1729_v11 = vadd.f32 0.0036580483, %v1728_v31 }
 0x255   : > { %v1706_v53 = vadd.f32 1.0, %v1705_v3  ;;  %v1741_v49 = vmul.f32 %v1740_v46, %v3611_v4  ;;  %v1436_v56 = vand.u32 2147483647, %v1426_v45  ;;  %v1438_v50 = vand.u32 2147483648, %v1426_v45 }
 0x256   : > { %v1675_v0 = vsel %vm1674_vm2, %v2166_v5, %v1671_v30  ;;  %v2168_v22 = vpop.eup %2167  ;;  %v1415_v59 = vadd.f32 1.1283791, %v1414_v29  ;;  %v1693_v52 = vadd.f32 0.18741608, %v1692_v47  ;;  %v1730_v26 = vmul.f32 %v1729_v11, %v3611_v4 }
 0x257   : > { %v1680_v27 = vsel %vm1677_vm3, %v1679_v7, %v1675_v0  ;;  %v1428_v13 = vmul.f32 %v2168_v22, %v1426_v45  ;;  %2169 = vrcp.f32 %v1706_v53  ;;  %v1742_v34 = vadd.f32 0.112945676, %v1741_v49 }
 0x258   : > { %v1681_v16 = vmul.f32 %v1680_v27, %v1656_v57  ;;  %vm1433_vm4 = vweird.f32 %v2168_v22  ;;  %vm1432_vm5 = vweird.f32 %v1426_v45  ;;  %v1416_v38 = vmul.f32 %v1415_v59, %v3541_v32 }
 0x259   : > { %v1429_v42 = vsub.f32 1.0, %v1428_v13  ;;  %v1743_v62 = vmul.f32 %v1742_v34, %v3611_v4  ;;  %vm1434_vm6 = vmor %vm1432_vm5, %vm1433_vm4  ;;  %v1439_v36 = vor.u32 1.1754944e-38, %v1438_v50  ;;  %v1694_v17 = vmul.f32 %v1693_v52, %v3588_v51 }
 0x25a   : > { %v1994_v24 = vclamps-f32 %v1681_v16, 1.0  ;;  %vm1437_vm7 = vcmp.eq.f32.partialorder %v1436_v56, 8.507059e+37  ;;  %v1731_v10 = vadd.f32 0.05243302, %v1730_v26  ;;  %v1716_v61 = vand.u32 2147483647, %v1706_v53 }
 0x25b   : > { %v1430_v54 = vmul.f32 %v2168_v22, %v1429_v42  ;;  %v1744_v21 = vadd.f32 0.4994258, %v1743_v62  ;;  %v1695_v1 = vadd.f32 1.1283791, %v1694_v17  ;;  %v1718_v41 = vand.u32 2147483648, %v1706_v53 }
 0x25c   : > { %1777 = vst [vmem:[%s3328_s18 + $0x68] sm:$0xff] %v1994_v24  ;;  %v1732_v63 = vmul.f32 %v1731_v10, %v3611_v4  ;;  %vm1712_vm9 = vweird.f32 %v1706_v53  ;;  %vm1717_vm11 = vcmp.eq.f32.partialorder %v1716_v61, 8.507059e+37 }
 0x25d   : > { %v1431_v40 = vadd.f32 %v2168_v22, %v1430_v54  ;;  %v2170_v8 = vpop.eup %2169  ;;  %v1745_v5 = vmul.f32 %v1744_v21, %v3611_v4  ;;  %v1719_v45 = vor.u32 1.1754944e-38, %v1718_v41  ;;  %v1696_v37 = vmul.f32 %v1695_v1, %v3567_v33 }
 0x25e   : > { %v1708_v48 = vmul.f32 %v2170_v8, %v1706_v53  ;;  %vm1713_vm8 = vweird.f32 %v2170_v8  ;;  %v1733_v28 = vadd.f32 0.18741608, %v1732_v63 }
 0x25f   : > { %v1435_v55 = vsel %vm1434_vm6, %v2168_v22, %v1431_v40  ;;  %v1746_v20 = vadd.f32 1.0, %v1745_v5  ;;  %vm1714_vm10 = vmor %vm1712_vm9, %vm1713_vm8 }
 0x260   : > { %v1440_v39 = vsel %vm1437_vm7, %v1439_v36, %v1435_v55  ;;  %v1709_v44 = vsub.f32 1.0, %v1708_v48  ;;  %v1734_v9 = vmul.f32 %v1733_v28, %v3611_v4 }
 0x261   : > { %v1441_v15 = vmul.f32 %v1440_v39, %v1416_v38  ;;  %2171 = vrcp.f32 %v1746_v20  ;;  %v1758_v60 = vand.u32 2147483648, %v1746_v20  ;;  %v1756_v30 = vand.u32 2147483647, %v1746_v20 }
 0x262   : > { %v1710_v32 = vmul.f32 %v2170_v8, %v1709_v44  ;;  %v1735_v18 = vadd.f32 1.1283791, %v1734_v9  ;;  %vm1752_vm13 = vweird.f32 %v1746_v20 }
 0x263   : > { %v1988_v23 = vclamps-f32 %v1441_v15, 1.0  ;;  %v1759_v4 = vor.u32 1.1754944e-38, %v1758_v60  ;;  %vm1757_vm15 = vcmp.eq.f32.partialorder %v1756_v30, 8.507059e+37 }
 0x264   : > { %v1711_v51 = vadd.f32 %v2170_v8, %v1710_v32  ;;  %v1736_v3 = vmul.f32 %v1735_v18, %v3593_v12 }
 0x265   : > { %1771 = vst [vmem:[%s3328_s18 + $0x38] sm:$0xff] %v1988_v23 }
 0x266   : > { %v1715_v19 = vsel %vm1714_vm10, %v2170_v8, %v1711_v51 }
 0x267   : > { %v1720_v2 = vsel %vm1717_vm11, %v1719_v45, %v1715_v19  ;;  %v2172_v6 = vpop.eup %2171 }
 0x268   : > { %v1721_v58 = vmul.f32 %v1720_v2, %v1696_v37  ;;  %v1748_v35 = vmul.f32 %v2172_v6, %v1746_v20  ;;  %vm1753_vm12 = vweird.f32 %v2172_v6 }
 0x269   : > { %vm1754_vm14 = vmor %vm1752_vm13, %vm1753_vm12 }
 0x26a   : > { %v1995_v43 = vclamps-f32 %v1721_v58, 1.0  ;;  %v1749_v14 = vsub.f32 1.0, %v1748_v35 }
 0x26c   : > { %1778 = vst [vmem:[%s3328_s18 + $0x70] sm:$0xff] %v1995_v43  ;;  %v1750_v25 = vmul.f32 %v2172_v6, %v1749_v14 }
 0x26e   : > { %v1751_v33 = vadd.f32 %v2172_v6, %v1750_v25 }
 0x270   : > { %v1755_v31 = vsel %vm1754_vm14, %v2172_v6, %v1751_v33 }
 0x271   : > { %v1760_v57 = vsel %vm1757_vm15, %v1759_v4, %v1755_v31 }
 0x272   : > { %v1761_v7 = vmul.f32 %v1760_v57, %v1736_v3 }
 0x274   : > { %v1996_v46 = vclamps-f32 %v1761_v7, 1.0 }
 0x276   : > { %1779 = vst [vmem:[%s3328_s18 + $0x78] sm:$0xff] %v1996_v46 }
 0x277   : > { %2290 = shalt.err (!%p2287_p10)
}
 0x278   : > { %s2341_s22 = smov 128   ;;  %s2342_s24 = smov 8  }
 0x279   : > { %2046 = dma.vmem_to_hbm [thread:$0]  (%p2429_p3), %s1794_s16, 2048, %s1796_s29, %s1781_s4, %s2341_s22, %s2341_s22, %s2342_s24  }
 0x27a PF: > { %s1810_s25 = sand.u32 1, %s2321_s12   ;;  %p3751_p12 = scmp.ge.s32.totalorder %s2333_s15, 2 }
 0x27b   : > { %s1811_s30 = scalar_lea.sflag [#allocation4], %s1810_s25 }
 0x27c   : > { %p2060_p13 = pnand %p3751_p12, %p2398_p6 }
 0x27e   : > { %p2061_p0 = pneg %p2060_p13 }
 0x280   : > { %2316 = dma.done.wait (%p2061_p0), %s1811_s30, 2048  }
 0x281   : > { %2318 = vsyncadd (%p2061_p0), %s1811_s30, 4294965248  ;;  %p17_p5 = scmp.ge.s32.totalorder %s2419_s6, 4   ;;  %s3752_s12 = smov %s2325_s13 }
 0x282   : > { %s3753_s13 = smov %s2329_s14  ;;  %s3754_s14 = smov %s2435_s10 }
 0x283   : > { %s3755_s15 = smov %s2419_s6  ;;  %19 = sbr.rel (!%p17_p5) target bundleno = 6 (0x6), region = 85 }
 0x288   :  { %1817 = vsyncpa [#allocation3], 1 }
 0x289   :  { %1819 = vsyncpa [#allocation3 + $0x1], 1 }
 0x28a   :  { %1820 = vsyncpa [#allocation6], 1 }
 0x28b   :  { %1821 = vsyncpa [#allocation4], 1 }
 0x28c   :  { %1823 = vsyncpa [#allocation4 + $0x1], 1 }

</bundles_post_ra>
